<compile_context>
chip_gen: v7x
topology: tpu7x:2x2x1
jax: 0.10.0
libtpu: 0.0.40
codegen_flags: <defaults>
</compile_context>

<pallas_src>
import functools

import jax
import jax.numpy as jnp
from jax import lax
from jax.experimental import pallas as pl
from jax.experimental.pallas import tpu as pltpu

NUM_HEADS = 8
LN_EPS = 1e-5
BN_EPS = 1e-5

# rows of the packed (16, D) parameter-vector array
(_BQ, _BK, _BV, _BO,
 _LN1G, _LN1B,
 _FB1, _FB2, _F0B1, _F0B2,
 _LN0G, _LN0B, _LN2G, _LN2B,
 _WP, _BP) = range(16)


def _layer_norm(z, g, b):
    mu = jnp.mean(z, axis=-1, keepdims=True)
    var = jnp.mean((z - mu) ** 2, axis=-1, keepdims=True)
    return (z - mu) * lax.rsqrt(var + LN_EPS) * g + b


def sakt_kernel(x_ref, e_ref,
                wq_ref, wkv_ref, wo_ref, wff1_ref, wf2_ref, wf02_ref,
                vec_ref, bn_ref,
                out_ref, attw_ref=None,
                *, seq_len, block_b, heads):
    S = seq_len
    TB = block_b
    M, D = x_ref.shape                     # M = TB * S
    hd = D // heads

    x = x_ref[...]                         # (M, D) bf16  -> key / value source
    e = e_ref[...]                         # (M, D) bf16  -> query + residual
    vec = vec_ref[...]                     # (16, D) f32 packed small params

    def vrow(i):
        return vec[i:i + 1, :]

    # --- projections (bf16 matmul operands, f32 accumulation) ---
    # 1/sqrt(head_dim) is pre-folded into wq / bq on the host, so no score scale.
    q = jnp.dot(e, wq_ref[...], preferred_element_type=jnp.float32) + vrow(_BQ)
    kv = jnp.dot(x, wkv_ref[...], preferred_element_type=jnp.float32)
    k = kv[:, :D] + vrow(_BK)
    v = kv[:, D:] + vrow(_BV)

    # --- multi-head attention batched over (head, sequence) ---
    # One lane split + one "mhd->hmd" transpose per tensor instead of
    # 3 * heads * TB static lane slices at non-128-aligned offsets.
    def split_heads(t):
        t = t.astype(jnp.bfloat16).reshape(M, heads, hd)
        t = jnp.transpose(t, (1, 0, 2))                  # (heads, M, hd)
        return t.reshape(heads * TB, S, hd)              # batch = h * TB + b

    qh = split_heads(q)
    kh = split_heads(k)
    vh = split_heads(v)

    row = lax.broadcasted_iota(jnp.int32, (S, S), 0)
    col = lax.broadcasted_iota(jnp.int32, (S, S), 1)
    allowed = (col <= row)[None, :, :]     # future_mask: above-diagonal disallowed

    # TODO(synk): for long sequences (S >= ~256) tile the key axis with an
    # online (flash-style) softmax instead of materializing (BH, S, S) scores.
    s = jnp.einsum('bqd,bkd->bqk', qh, kh, preferred_element_type=jnp.float32)
    s = jnp.where(allowed, s, -1e30)
    m = jnp.max(s, axis=-1, keepdims=True)
    p = jnp.exp(s - m)
    l = jnp.sum(p, axis=-1, keepdims=True)
    # exact reciprocal: attention rows must sum to 1 within 1e-4
    p = p * pl.reciprocal(l, approx=False)

    if attw_ref is not None:               # nn.MultiheadAttention averages heads
        attw_ref[...] = jnp.mean(p.reshape(heads, TB, S, S),
                                 axis=0).astype(attw_ref.dtype)

    ctx = jnp.einsum('bqk,bkd->bqd', p.astype(jnp.bfloat16), vh,
                     preferred_element_type=jnp.float32)          # (BH, S, hd)
    ctx = jnp.transpose(ctx.reshape(heads, M, hd), (1, 0, 2)).reshape(M, D)

    att_out = jnp.dot(ctx.astype(jnp.bfloat16), wo_ref[...],
                      preferred_element_type=jnp.float32) + vrow(_BO)
    # residual with e (the "value" arg of TransformerBlock), then LayerNorm
    att_out = _layer_norm(att_out + e.astype(jnp.float32),
                          vrow(_LN1G), vrow(_LN1B))

    # --- fused first linear of FFN and FFN0 ---
    ab16 = att_out.astype(jnp.bfloat16)
    h01 = jnp.dot(ab16, wff1_ref[...],
                  preferred_element_type=jnp.float32)             # (M, 2D)
    h1 = jnp.maximum(h01[:, :D] + vrow(_FB1), 0.0)
    h0 = jnp.maximum(h01[:, D:] + vrow(_F0B1), 0.0)

    # FFN branch: BatchNorm1d (eval) folded to per-seq-position scale/shift -> lr2
    bn = bn_ref[...]                                              # (2, M, 1) f32
    h1 = h1 * bn[0] + bn[1]
    ffn = jnp.dot(h1.astype(jnp.bfloat16), wf2_ref[...],
                  preferred_element_type=jnp.float32) + vrow(_FB2)

    # FFN0 branch: lr2 -> LayerNorm
    f0 = jnp.dot(h0.astype(jnp.bfloat16), wf02_ref[...],
                 preferred_element_type=jnp.float32) + vrow(_F0B2)
    ffn0 = _layer_norm(f0, vrow(_LN0G), vrow(_LN0B))

    z = _layer_norm(ffn + ffn0 + att_out, vrow(_LN2G), vrow(_LN2B))

    # --- prediction head: single lane-reduce, no M=1 MXU passes, no concat ---
    wp = vrow(_WP).reshape(1, 1, D)
    bp = vec[_BP:_BP + 1, 0:1]
    out_ref[...] = jnp.sum(z.reshape(TB, S, D) * wp, axis=-1) + bp


# ---------------- chip-aware tiling helpers ----------------

@functools.lru_cache(maxsize=None)
def _physical_vmem_bytes():
    try:
        info = pltpu.get_tpu_info()
        v = int(getattr(info, "vmem_capacity_bytes", 0) or 0)
        if v > 0:
            return v
    except Exception:
        pass
    return 128 << 20      # v5e/v6e default; v7x reports its 64 MiB via get_tpu_info


def _vmem_limit_bytes():
    # ~75% of physical VMEM: explicit ceiling so big blocks are not rejected by
    # the default scoped limit (16 MiB v5e / 32 MiB v6e+), headroom for compiler.
    return max(32 << 20, (_physical_vmem_bytes() * 3) // 4)


def _row_cap(D, S, heads, attw_bytes):
    """Max rows M = tb*S per grid step so one step's live set fits in VMEM."""
    f32, bf16 = 4, 2
    budget = _vmem_limit_bytes() - (8 << 20)           # compiler-scratch headroom
    budget -= 8 * D * D * bf16 + 16 * D * f32          # resident fused weights + vec pack
    per_row = (14 * f32 + 8 * bf16) * D                # live (M,D)/(M,2D) intermediates
    per_row += heads * S * (2 * f32 + bf16)            # scores + probs per query row
    per_row += 2 * 2 * bf16 * D                        # double-buffered x / e input blocks
    per_row += 2 * attw_bytes * S                      # attw output block (pipelined)
    per_row += 2 * f32 * 128                           # lane-padded (2, M, 1) BN pack
    return max(8, budget // per_row)


def _pick_block_batch(B, S, D, heads, attw_bytes):
    # Tile-legal candidates: tb == B (full-array blocks) or tb % 8 == 0, so the
    # (tb*S, D) activation blocks and the (tb, S) logits block obey the (8, 128)
    # rule without padded / masked stores.
    valid = [tb for tb in range(1, B + 1)
             if B % tb == 0 and (tb == B or tb % 8 == 0)]
    cap = _row_cap(D, S, heads, attw_bytes)
    fitting = [tb for tb in valid if tb * S <= cap]
    pool = fitting if fitting else [min(valid)]
    # keep grid >= 2 when possible so both TensorCores stay busy on v7x
    multi = [tb for tb in pool if B // tb >= 2]
    if multi:
        pool = multi
    return max(pool)


def _probe_kernel(x_ref, o_ref):
    o_ref[...] = x_ref[...] + 1.0


@functools.lru_cache(maxsize=None)
def _buffered_const_supported():
    """Whether pipeline_mode=pl.Buffered(1) (single-buffered constants) works here."""
    try:
        spec = pl.BlockSpec((8, 128), lambda i: (0, 0), pipeline_mode=pl.Buffered(1))
        fn = pl.pallas_call(
            _probe_kernel,
            out_shape=jax.ShapeDtypeStruct((8, 128), jnp.float32),
            grid=(1,),
            in_specs=[spec],
            out_specs=pl.BlockSpec((8, 128), lambda i: (0, 0)),
        )
        jax.block_until_ready(fn(jnp.zeros((8, 128), jnp.float32)))
        return True
    except Exception:
        return False


def _const_spec(arr, single_buffer):
    nd = arr.ndim
    idx = lambda i, _nd=nd: (0,) * _nd
    if single_buffer:
        # constant block index never changes -> no need to double-buffer the
        # 8*D^2 bf16 weights (matters most on v7x's 64 MiB VMEM)
        return pl.BlockSpec(arr.shape, idx, pipeline_mode=pl.Buffered(1))
    return pl.BlockSpec(arr.shape, idx)


# ---------------- wrapper ----------------

def sakt_forward(x_tok, q_ids, params, *, block_batch=None,
                 return_att_weights=True, att_weights_dtype=jnp.float32):
    """x_tok: (B, S) int32 interaction ids; q_ids: (B, S) int32 question ids.

    Returns (logits (B, S) f32, att_weight (B, S, S)) when return_att_weights,
    else just logits.  att_weights_dtype=jnp.bfloat16 halves the largest HBM
    writeback on bandwidth-poor chips (v5e)."""
    B, S = x_tok.shape
    D = params["emb"].shape[1]
    assert D % NUM_HEADS == 0
    hd = D // NUM_HEADS

    attw_bytes = jnp.dtype(att_weights_dtype).itemsize if return_att_weights else 0
    tb = (block_batch if block_batch is not None
          else _pick_block_batch(B, S, D, NUM_HEADS, attw_bytes))
    assert B % tb == 0
    M = tb * S

    # glue: embedding lookups + positional embedding (plain JAX gathers)
    pos = params["pos"][jnp.arange(S)]
    x_emb = params["emb"][x_tok] + pos[None, :, :]
    e_emb = params["e_emb"][q_ids]
    x_flat = x_emb.reshape(B * S, D).astype(jnp.bfloat16)
    e_flat = e_emb.reshape(B * S, D).astype(jnp.bfloat16)

    bf16, f32 = jnp.bfloat16, jnp.float32
    scale = 1.0 / (hd ** 0.5)                 # folded into wq / bq (MHA q-scaling)
    wq = (params["wq"] * scale).astype(bf16)
    wkv = jnp.concatenate([params["wk"], params["wv"]], axis=1).astype(bf16)
    wo = params["wo"].astype(bf16)
    wff1 = jnp.concatenate([params["ffn_w1"], params["ffn0_w1"]], axis=1).astype(bf16)
    wf2 = params["ffn_w2"].astype(bf16)
    wf02 = params["ffn0_w2"].astype(bf16)

    def row(v):
        return v.reshape(1, D).astype(f32)

    vec = jnp.concatenate([
        row(params["bq"] * scale), row(params["bk"]), row(params["bv"]), row(params["bo"]),
        row(params["ln1_g"]), row(params["ln1_b"]),
        row(params["ffn_b1"]), row(params["ffn_b2"]),
        row(params["ffn0_b1"]), row(params["ffn0_b2"]),
        row(params["ln0_g"]), row(params["ln0_b"]),
        row(params["ln2_g"]), row(params["ln2_b"]),
        row(params["wp"]),
        jnp.broadcast_to(params["bp"].reshape(1, 1), (1, D)).astype(f32),
    ], axis=0)                                                # (16, D)

    # fold BatchNorm1d(eval) into per-seq-position scale/shift, tiled to tb seqs
    bn_scale = (params["bn_g"] / jnp.sqrt(params["bn_v"] + BN_EPS)).reshape(S, 1)
    bn_shift = (params["bn_b"] - params["bn_m"] * bn_scale).reshape(S, 1)
    bn_pack = jnp.stack([jnp.tile(bn_scale, (tb, 1)),
                         jnp.tile(bn_shift, (tb, 1))], axis=0).astype(f32)  # (2, M, 1)

    weights = [wq, wkv, wo, wff1, wf2, wf02, vec, bn_pack]

    act_spec = pl.BlockSpec((M, D), lambda i: (i, 0))
    single_buf = _buffered_const_supported()
    in_specs = ([act_spec, act_spec]
                + [_const_spec(w, single_buf and w.ndim == 2) for w in weights])

    if return_att_weights:
        out_shape = (jax.ShapeDtypeStruct((B, S), jnp.float32),
                     jax.ShapeDtypeStruct((B, S, S), att_weights_dtype))
        out_specs = (pl.BlockSpec((tb, S), lambda i: (i, 0)),
                     pl.BlockSpec((tb, S, S), lambda i: (i, 0, 0)))
    else:
        out_shape = jax.ShapeDtypeStruct((B, S), jnp.float32)
        out_specs = pl.BlockSpec((tb, S), lambda i: (i, 0))

    kernel = functools.partial(sakt_kernel, seq_len=S, block_b=tb, heads=NUM_HEADS)

    return pl.pallas_call(
        kernel,
        out_shape=out_shape,
        grid_spec=pltpu.PrefetchScalarGridSpec(
            num_scalar_prefetch=0,
            grid=(B // tb,),
            in_specs=in_specs,
            out_specs=out_specs,
        ),
        compiler_params=pltpu.CompilerParams(
            dimension_semantics=("parallel",),
            vmem_limit_bytes=int(_vmem_limit_bytes()),
        ),
    )(x_flat, e_flat, *weights)


def init_params(key, n_skill, max_seq, D, S):
    ks = jax.random.split(key, 24)

    def nrm(k, shape, scale=0.05):
        return (scale * jax.random.normal(k, shape)).astype(jnp.float32)

    p = {}
    p["emb"] = nrm(ks[0], (2 * n_skill + 1, D))
    p["pos"] = nrm(ks[1], (max_seq - 1, D))
    p["e_emb"] = nrm(ks[2], (n_skill + 1, D))
    # MHA in/out projections (stored pre-transposed so kernel does x @ W + b)
    p["wq"] = nrm(ks[3], (D, D)); p["bq"] = nrm(ks[4], (1, D))
    p["wk"] = nrm(ks[5], (D, D)); p["bk"] = nrm(ks[6], (1, D))
    p["wv"] = nrm(ks[7], (D, D)); p["bv"] = nrm(ks[8], (1, D))
    p["wo"] = nrm(ks[9], (D, D)); p["bo"] = nrm(ks[10], (1, D))
    p["ln1_g"] = jnp.ones((1, D), jnp.float32); p["ln1_b"] = jnp.zeros((1, D), jnp.float32)
    # FFN (BatchNorm1d over the S "channel" dim, eval-mode running stats)
    p["ffn_w1"] = nrm(ks[11], (D, D)); p["ffn_b1"] = nrm(ks[12], (1, D))
    p["bn_g"] = jnp.ones((S, 1), jnp.float32)
    p["bn_b"] = jnp.zeros((S, 1), jnp.float32)
    p["bn_m"] = nrm(ks[13], (S, 1))
    p["bn_v"] = jnp.abs(nrm(ks[14], (S, 1))) + 1.0
    p["ffn_w2"] = nrm(ks[15], (D, D)); p["ffn_b2"] = nrm(ks[16], (1, D))
    # FFN0
    p["ffn0_w1"] = nrm(ks[17], (D, D)); p["ffn0_b1"] = nrm(ks[18], (1, D))
    p["ffn0_w2"] = nrm(ks[19], (D, D)); p["ffn0_b2"] = nrm(ks[20], (1, D))
    p["ln0_g"] = jnp.ones((1, D), jnp.float32); p["ln0_b"] = jnp.zeros((1, D), jnp.float32)
    p["ln2_g"] = jnp.ones((1, D), jnp.float32); p["ln2_b"] = jnp.zeros((1, D), jnp.float32)
    # prediction head
    p["wp"] = nrm(ks[21], (D, 1)); p["bp"] = nrm(ks[22], (1, 1))
    return p


if __name__ == "__main__":
    # small, MultiheadAttention-compatible shapes: D divisible by 8 heads
    n_skill, D, B, S = 10, 32, 2, 8
    max_seq = S + 1

    key = jax.random.PRNGKey(0)
    kp, kx, kq = jax.random.split(key, 3)
    params = init_params(kp, n_skill, max_seq, D, S)

    x_tok = jax.random.randint(kx, (B, S), 0, 2 * n_skill + 1, dtype=jnp.int32)
    q_ids = jax.random.randint(kq, (B, S), 0, n_skill + 1, dtype=jnp.int32)

    logits, att_weight = sakt_forward(x_tok, q_ids, params)
    jax.block_until_ready((logits, att_weight))

    assert logits.shape == (B, S)
    assert att_weight.shape == (B, S, S)
    assert bool(jnp.all(jnp.isfinite(logits))) and bool(jnp.all(jnp.isfinite(att_weight)))
    # causal-mask sanity: attention rows sum to 1
    assert bool(jnp.allclose(att_weight.sum(-1), 1.0, atol=1e-4))

    # fast path: skip the (B, S, S) HBM writeback entirely
    logits_only = sakt_forward(x_tok, q_ids, params, return_att_weights=False)
    jax.block_until_ready(logits_only)
    assert bool(jnp.allclose(logits_only, logits, atol=1e-3, rtol=1e-3))

    print("KERNEL_OK")
</pallas_src>

<mosaic_0001>
module attributes {stable_mosaic.version = 11 : i64} {
  func.func @_probe_kernel(%arg0: i32, %arg1: memref<8x128xf32, #tpu.memory_space<vmem>>, %arg2: memref<8x128xf32, #tpu.memory_space<vmem>>) attributes {dimension_semantics = [#tpu.dimension_semantics<arbitrary>], iteration_bounds = array<i64: 1>, scalar_prefetch = 0 : i64, scratch_operands = 0 : i64, tpu.core_type = #tpu.core_type<tc>, window_params = [{pipeline_mode = #tpu.pipeline_mode<synchronous>, transform_indices = @transform_0, window_bounds = array<i64: 8, 128>}, {pipeline_mode = #tpu.pipeline_mode<synchronous>, transform_indices = @transform_1, window_bounds = array<i64: 8, 128>}]} {
    %c0 = arith.constant 0 : index
    %c0_0 = arith.constant 0 : index
    %0 = vector.load %arg1[%c0, %c0_0] : memref<8x128xf32, #tpu.memory_space<vmem>>, vector<8x128xf32>
    %cst = arith.constant 1.000000e+00 : f32
    %1 = vector.broadcast %cst : f32 to vector<8x128xf32>
    %2 = arith.addf %0, %1 : vector<8x128xf32>
    %c0_1 = arith.constant 0 : index
    %c0_2 = arith.constant 0 : index
    %3 = vector.load %arg2[%c0_1, %c0_2] : memref<8x128xf32, #tpu.memory_space<vmem>>, vector<8x128xf32>
    tpu.vector_store %arg2[%c0_1, %c0_2], %2 {strides = array<i32>} : memref<8x128xf32, #tpu.memory_space<vmem>>, vector<8x128xf32>,
    return
  }
  func.func @transform_0(%arg0: i32) -> (i32, i32) {
    %c0_i32 = arith.constant 0 : i32
    %c0_i32_0 = arith.constant 0 : i32
    %c0_i32_1 = arith.constant 0 : i32
    return %c0_i32, %c0_i32_0 : i32, i32
  }
  func.func @transform_1(%arg0: i32) -> (i32, i32) {
    %c0_i32 = arith.constant 0 : i32
    %c0_i32_0 = arith.constant 0 : i32
    %c0_i32_1 = arith.constant 0 : i32
    return %c0_i32, %c0_i32_0 : i32, i32
  }
}

module attributes {stable_mosaic.version = 11 : i64} {
  func.func @sakt_kernel(%arg0: i32, %arg1: memref<16x32xbf16, #tpu.memory_space<vmem>>, %arg2: memref<16x32xbf16, #tpu.memory_space<vmem>>, %arg3: memref<32x32xbf16, #tpu.memory_space<vmem>>, %arg4: memref<32x64xbf16, #tpu.memory_space<vmem>>, %arg5: memref<32x32xbf16, #tpu.memory_space<vmem>>, %arg6: memref<32x64xbf16, #tpu.memory_space<vmem>>, %arg7: memref<32x32xbf16, #tpu.memory_space<vmem>>, %arg8: memref<32x32xbf16, #tpu.memory_space<vmem>>, %arg9: memref<16x32xf32, #tpu.memory_space<vmem>>, %arg10: memref<2x16x1xf32, #tpu.memory_space<vmem>>, %arg11: memref<2x8xf32, #tpu.memory_space<vmem>>, %arg12: memref<2x8x8xf32, #tpu.memory_space<vmem>>) attributes {dimension_semantics = [#tpu.dimension_semantics<parallel>], iteration_bounds = array<i64: 1>, scalar_prefetch = 0 : i64, scratch_operands = 0 : i64, tpu.core_type = #tpu.core_type<tc>, window_params = [{transform_indices = @transform_0, window_bounds = array<i64: 16, 32>}, {transform_indices = @transform_1, window_bounds = array<i64: 16, 32>}, {pipeline_mode = #tpu.pipeline_mode<synchronous>, transform_indices = @transform_2, window_bounds = array<i64: 32, 32>}, {pipeline_mode = #tpu.pipeline_mode<synchronous>, transform_indices = @transform_3, window_bounds = array<i64: 32, 64>}, {pipeline_mode = #tpu.pipeline_mode<synchronous>, transform_indices = @transform_4, window_bounds = array<i64: 32, 32>}, {pipeline_mode = #tpu.pipeline_mode<synchronous>, transform_indices = @transform_5, window_bounds = array<i64: 32, 64>}, {pipeline_mode = #tpu.pipeline_mode<synchronous>, transform_indices = @transform_6, window_bounds = array<i64: 32, 32>}, {pipeline_mode = #tpu.pipeline_mode<synchronous>, transform_indices = @transform_7, window_bounds = array<i64: 32, 32>}, {pipeline_mode = #tpu.pipeline_mode<synchronous>, transform_indices = @transform_8, window_bounds = array<i64: 16, 32>}, {pipeline_mode = #tpu.pipeline_mode<synchronous>, transform_indices = @transform_9, window_bounds = array<i64: 2, 16, 1>}, {transform_indices = @transform_10, window_bounds = array<i64: 2, 8>}, {transform_indices = @transform_11, window_bounds = array<i64: 2, 8, 8>}]} {
    %c0 = arith.constant 0 : index
    %c0_0 = arith.constant 0 : index
    %0 = vector.load %arg1[%c0, %c0_0] : memref<16x32xbf16, #tpu.memory_space<vmem>>, vector<16x32xbf16>
    %c0_1 = arith.constant 0 : index
    %c0_2 = arith.constant 0 : index
    %1 = vector.load %arg2[%c0_1, %c0_2] : memref<16x32xbf16, #tpu.memory_space<vmem>>, vector<16x32xbf16>
    %c0_3 = arith.constant 0 : index
    %c0_4 = arith.constant 0 : index
    %2 = vector.load %arg9[%c0_3, %c0_4] : memref<16x32xf32, #tpu.memory_space<vmem>>, vector<16x32xf32>
    %c0_5 = arith.constant 0 : index
    %c0_6 = arith.constant 0 : index
    %3 = vector.load %arg3[%c0_5, %c0_6] : memref<32x32xbf16, #tpu.memory_space<vmem>>, vector<32x32xbf16>
    %cst = arith.constant dense<0.000000e+00> : vector<16x32xf32>
    %4 = tpu.matmul %1, %3, %cst {dimension_numbers = #tpu.dot_dimension_numbers<[1], [0], [0], [1], [0, 0, 1, 1], [], []>} : vector<16x32xbf16>, vector<32x32xbf16>, vector<16x32xf32> -> vector<16x32xf32>
    %5 = vector.extract_strided_slice %2 {offsets = [0, 0], sizes = [1, 32], strides = [1, 1]} : vector<16x32xf32> to vector<1x32xf32>
    %6 = vector.broadcast %5 : vector<1x32xf32> to vector<16x32xf32>
    %7 = arith.addf %4, %6 : vector<16x32xf32>
    %c0_7 = arith.constant 0 : index
    %c0_8 = arith.constant 0 : index
    %8 = vector.load %arg4[%c0_7, %c0_8] : memref<32x64xbf16, #tpu.memory_space<vmem>>, vector<32x64xbf16>
    %cst_9 = arith.constant dense<0.000000e+00> : vector<16x64xf32>
    %9 = tpu.matmul %0, %8, %cst_9 {dimension_numbers = #tpu.dot_dimension_numbers<[1], [0], [0], [1], [0, 0, 1, 1], [], []>} : vector<16x32xbf16>, vector<32x64xbf16>, vector<16x64xf32> -> vector<16x64xf32>
    %10 = vector.extract_strided_slice %9 {offsets = [0, 0], sizes = [16, 32], strides = [1, 1]} : vector<16x64xf32> to vector<16x32xf32>
    %11 = vector.extract_strided_slice %2 {offsets = [1, 0], sizes = [1, 32], strides = [1, 1]} : vector<16x32xf32> to vector<1x32xf32>
    %12 = vector.broadcast %11 : vector<1x32xf32> to vector<16x32xf32>
    %13 = arith.addf %10, %12 : vector<16x32xf32>
    %14 = vector.extract_strided_slice %9 {offsets = [0, 32], sizes = [16, 32], strides = [1, 1]} : vector<16x64xf32> to vector<16x32xf32>
    %15 = vector.extract_strided_slice %2 {offsets = [2, 0], sizes = [1, 32], strides = [1, 1]} : vector<16x32xf32> to vector<1x32xf32>
    %16 = vector.broadcast %15 : vector<1x32xf32> to vector<16x32xf32>
    %17 = arith.addf %14, %16 : vector<16x32xf32>
    %18 = arith.truncf %7 : vector<16x32xf32> to vector<16x32xbf16>
    %19 = vector.shape_cast %18 : vector<16x32xbf16> to vector<16x8x4xbf16>
    %20 = tpu.transpose %19, [1, 0, 2] : vector<16x8x4xbf16> -> vector<8x16x4xbf16>
    %21 = vector.shape_cast %20 : vector<8x16x4xbf16> to vector<16x8x4xbf16>
    %22 = arith.truncf %13 : vector<16x32xf32> to vector<16x32xbf16>
    %23 = vector.shape_cast %22 : vector<16x32xbf16> to vector<16x8x4xbf16>
    %24 = tpu.transpose %23, [1, 0, 2] : vector<16x8x4xbf16> -> vector<8x16x4xbf16>
    %25 = vector.shape_cast %24 : vector<8x16x4xbf16> to vector<16x8x4xbf16>
    %26 = arith.truncf %17 : vector<16x32xf32> to vector<16x32xbf16>
    %27 = vector.shape_cast %26 : vector<16x32xbf16> to vector<16x8x4xbf16>
    %28 = tpu.transpose %27, [1, 0, 2] : vector<16x8x4xbf16> -> vector<8x16x4xbf16>
    %29 = vector.shape_cast %28 : vector<8x16x4xbf16> to vector<16x8x4xbf16>
    %30 = tpu.iota {dimensions = array<i32: 0>} : vector<8x8xi32>
    %31 = tpu.iota {dimensions = array<i32: 1>} : vector<8x8xi32>
    %32 = arith.cmpi sle, %31, %30 : vector<8x8xi32>
    %33 = vector.shape_cast %32 : vector<8x8xi1> to vector<1x8x8xi1>
    "tpu.trace_start"() <{level = 10 : i32, message = "bqd,bkd->bqk"}> : () -> ()
    %cst_10 = arith.constant dense<0.000000e+00> : vector<16x8x8xf32>
    %34 = tpu.matmul %21, %25, %cst_10 {dimension_numbers = #tpu.dot_dimension_numbers<[2], [2], [1], [1], [0, 0, 0, 1, 1, 1], [0], [0]>} : vector<16x8x4xbf16>, vector<16x8x4xbf16>, vector<16x8x8xf32> -> vector<16x8x8xf32>
    %cst_11 = arith.constant -1.000000e+30 : f32
    "tpu.trace_stop"() : () -> ()
    %35 = vector.shape_cast %33 : vector<1x8x8xi1> to vector<1x8x8xi1>
    %36 = vector.broadcast %35 : vector<1x8x8xi1> to vector<16x8x8xi1>
    %37 = vector.broadcast %cst_11 : f32 to vector<16x8x8xf32>
    %38 = arith.select %36, %34, %37 : vector<16x8x8xi1>, vector<16x8x8xf32>
    %cst_12 = arith.constant dense<0xFF800000> : vector<16x8xf32>
    %39 = vector.multi_reduction <maximumf>, %38, %cst_12 [2] : vector<16x8x8xf32> to vector<16x8xf32>
    %40 = vector.shape_cast %39 : vector<16x8xf32> to vector<16x8x1xf32>
    %41 = vector.broadcast %40 : vector<16x8x1xf32> to vector<16x8x8xf32>
    %42 = arith.subf %38, %41 : vector<16x8x8xf32>
    %43 = math.exp %42 : vector<16x8x8xf32>
    %cst_13 = arith.constant dense<0.000000e+00> : vector<16x8xf32>
    %44 = vector.multi_reduction <add>, %43, %cst_13 [2] : vector<16x8x8xf32> to vector<16x8xf32>
    %45 = vector.shape_cast %44 : vector<16x8xf32> to vector<16x8x1xf32>
    %46 = tpu.reciprocal %45 : vector<16x8x1xf32> -> vector<16x8x1xf32>
    %47 = vector.broadcast %46 : vector<16x8x1xf32> to vector<16x8x8xf32>
    %48 = arith.mulf %43, %47 : vector<16x8x8xf32>
    %49 = vector.shape_cast %48 : vector<16x8x8xf32> to vector<8x2x8x8xf32>
    %cst_14 = arith.constant dense<0.000000e+00> : vector<2x8x8xf32>
    %50 = vector.multi_reduction <add>, %49, %cst_14 [0] : vector<8x2x8x8xf32> to vector<2x8x8xf32>
    %cst_15 = arith.constant 8.000000e+00 : f32
    %51 = vector.broadcast %cst_15 : f32 to vector<2x8x8xf32>
    %52 = arith.divf %50, %51 : vector<2x8x8xf32>
    %c0_16 = arith.constant 0 : index
    %c0_17 = arith.constant 0 : index
    %c0_18 = arith.constant 0 : index
    %53 = vector.load %arg12[%c0_16, %c0_17, %c0_18] : memref<2x8x8xf32, #tpu.memory_space<vmem>>, vector<2x8x8xf32>
    tpu.vector_store %arg12[%c0_16, %c0_17, %c0_18], %52 {strides = array<i32>} : memref<2x8x8xf32, #tpu.memory_space<vmem>>, vector<2x8x8xf32>,
    %54 = arith.truncf %48 : vector<16x8x8xf32> to vector<16x8x8xbf16>
    "tpu.trace_start"() <{level = 10 : i32, message = "bqk,bkd->bqd"}> : () -> ()
    %cst_19 = arith.constant dense<0.000000e+00> : vector<16x8x4xf32>
    %55 = tpu.matmul %54, %29, %cst_19 {dimension_numbers = #tpu.dot_dimension_numbers<[2], [1], [1], [2], [0, 0, 0, 1, 1, 2], [0], [0]>} : vector<16x8x8xbf16>, vector<16x8x4xbf16>, vector<16x8x4xf32> -> vector<16x8x4xf32>
    "tpu.trace_stop"() : () -> ()
    %56 = vector.shape_cast %55 : vector<16x8x4xf32> to vector<8x16x4xf32>
    %57 = tpu.transpose %56, [1, 0, 2] : vector<8x16x4xf32> -> vector<16x8x4xf32>
    %58 = vector.shape_cast %57 : vector<16x8x4xf32> to vector<16x32xf32>
    %59 = arith.truncf %58 : vector<16x32xf32> to vector<16x32xbf16>
    %c0_20 = arith.constant 0 : index
    %c0_21 = arith.constant 0 : index
    %60 = vector.load %arg5[%c0_20, %c0_21] : memref<32x32xbf16, #tpu.memory_space<vmem>>, vector<32x32xbf16>
    %cst_22 = arith.constant dense<0.000000e+00> : vector<16x32xf32>
    %61 = tpu.matmul %59, %60, %cst_22 {dimension_numbers = #tpu.dot_dimension_numbers<[1], [0], [0], [1], [0, 0, 1, 1], [], []>} : vector<16x32xbf16>, vector<32x32xbf16>, vector<16x32xf32> -> vector<16x32xf32>
    %62 = vector.extract_strided_slice %2 {offsets = [3, 0], sizes = [1, 32], strides = [1, 1]} : vector<16x32xf32> to vector<1x32xf32>
    %63 = vector.broadcast %62 : vector<1x32xf32> to vector<16x32xf32>
    %64 = arith.addf %61, %63 : vector<16x32xf32>
    %65 = arith.extf %1 : vector<16x32xbf16> to vector<16x32xf32>
    %66 = arith.addf %64, %65 : vector<16x32xf32>
    %67 = vector.extract_strided_slice %2 {offsets = [4, 0], sizes = [1, 32], strides = [1, 1]} : vector<16x32xf32> to vector<1x32xf32>
    %68 = vector.extract_strided_slice %2 {offsets = [5, 0], sizes = [1, 32], strides = [1, 1]} : vector<16x32xf32> to vector<1x32xf32>
    %cst_23 = arith.constant dense<0.000000e+00> : vector<16xf32>
    %69 = vector.multi_reduction <add>, %66, %cst_23 [1] : vector<16x32xf32> to vector<16xf32>
    %70 = vector.shape_cast %69 : vector<16xf32> to vector<16x1xf32>
    %cst_24 = arith.constant 3.200000e+01 : f32
    %71 = vector.broadcast %cst_24 : f32 to vector<16x1xf32>
    %72 = arith.divf %70, %71 : vector<16x1xf32>
    %73 = vector.broadcast %72 : vector<16x1xf32> to vector<16x32xf32>
    %74 = arith.subf %66, %73 : vector<16x32xf32>
    %75 = arith.mulf %74, %74 : vector<16x32xf32>
    %cst_25 = arith.constant dense<0.000000e+00> : vector<16xf32>
    %76 = vector.multi_reduction <add>, %75, %cst_25 [1] : vector<16x32xf32> to vector<16xf32>
    %77 = vector.shape_cast %76 : vector<16xf32> to vector<16x1xf32>
    %cst_26 = arith.constant 3.200000e+01 : f32
    %78 = vector.broadcast %cst_26 : f32 to vector<16x1xf32>
    %79 = arith.divf %77, %78 : vector<16x1xf32>
    %80 = vector.broadcast %72 : vector<16x1xf32> to vector<16x32xf32>
    %81 = arith.subf %66, %80 : vector<16x32xf32>
    %cst_27 = arith.constant 9.99999974E-6 : f32
    %82 = vector.broadcast %cst_27 : f32 to vector<16x1xf32>
    %83 = arith.addf %79, %82 : vector<16x1xf32>
    %84 = math.rsqrt %83 : vector<16x1xf32>
    %85 = vector.broadcast %84 : vector<16x1xf32> to vector<16x32xf32>
    %86 = arith.mulf %81, %85 : vector<16x32xf32>
    %87 = vector.broadcast %67 : vector<1x32xf32> to vector<16x32xf32>
    %88 = arith.mulf %86, %87 : vector<16x32xf32>
    %89 = vector.broadcast %68 : vector<1x32xf32> to vector<16x32xf32>
    %90 = arith.addf %88, %89 : vector<16x32xf32>
    %91 = arith.truncf %90 : vector<16x32xf32> to vector<16x32xbf16>
    %c0_28 = arith.constant 0 : index
    %c0_29 = arith.constant 0 : index
    %92 = vector.load %arg6[%c0_28, %c0_29] : memref<32x64xbf16, #tpu.memory_space<vmem>>, vector<32x64xbf16>
    %cst_30 = arith.constant dense<0.000000e+00> : vector<16x64xf32>
    %93 = tpu.matmul %91, %92, %cst_30 {dimension_numbers = #tpu.dot_dimension_numbers<[1], [0], [0], [1], [0, 0, 1, 1], [], []>} : vector<16x32xbf16>, vector<32x64xbf16>, vector<16x64xf32> -> vector<16x64xf32>
    %94 = vector.extract_strided_slice %93 {offsets = [0, 0], sizes = [16, 32], strides = [1, 1]} : vector<16x64xf32> to vector<16x32xf32>
    %95 = vector.extract_strided_slice %2 {offsets = [6, 0], sizes = [1, 32], strides = [1, 1]} : vector<16x32xf32> to vector<1x32xf32>
    %96 = vector.broadcast %95 : vector<1x32xf32> to vector<16x32xf32>
    %97 = arith.addf %94, %96 : vector<16x32xf32>
    %cst_31 = arith.constant 0.000000e+00 : f32
    %98 = vector.broadcast %cst_31 : f32 to vector<16x32xf32>
    %99 = arith.maximumf %97, %98 : vector<16x32xf32>
    %100 = vector.extract_strided_slice %93 {offsets = [0, 32], sizes = [16, 32], strides = [1, 1]} : vector<16x64xf32> to vector<16x32xf32>
    %101 = vector.extract_strided_slice %2 {offsets = [8, 0], sizes = [1, 32], strides = [1, 1]} : vector<16x32xf32> to vector<1x32xf32>
    %102 = vector.broadcast %101 : vector<1x32xf32> to vector<16x32xf32>
    %103 = arith.addf %100, %102 : vector<16x32xf32>
    %cst_32 = arith.constant 0.000000e+00 : f32
    %104 = vector.broadcast %cst_32 : f32 to vector<16x32xf32>
    %105 = arith.maximumf %103, %104 : vector<16x32xf32>
    %c0_33 = arith.constant 0 : index
    %c0_34 = arith.constant 0 : index
    %c0_35 = arith.constant 0 : index
    %106 = vector.load %arg10[%c0_33, %c0_34, %c0_35] : memref<2x16x1xf32, #tpu.memory_space<vmem>>, vector<2x16x1xf32>
    %107 = vector.extract_strided_slice %106 {offsets = [0, 0, 0], sizes = [1, 16, 1], strides = [1, 1, 1]} : vector<2x16x1xf32> to vector<1x16x1xf32>
    %108 = vector.shape_cast %107 : vector<1x16x1xf32> to vector<16x1xf32>
    %109 = vector.broadcast %108 : vector<16x1xf32> to vector<16x32xf32>
    %110 = arith.mulf %99, %109 : vector<16x32xf32>
    %111 = vector.extract_strided_slice %106 {offsets = [1, 0, 0], sizes = [1, 16, 1], strides = [1, 1, 1]} : vector<2x16x1xf32> to vector<1x16x1xf32>
    %112 = vector.shape_cast %111 : vector<1x16x1xf32> to vector<16x1xf32>
    %113 = vector.broadcast %112 : vector<16x1xf32> to vector<16x32xf32>
    %114 = arith.addf %110, %113 : vector<16x32xf32>
    %115 = arith.truncf %114 : vector<16x32xf32> to vector<16x32xbf16>
    %c0_36 = arith.constant 0 : index
    %c0_37 = arith.constant 0 : index
    %116 = vector.load %arg7[%c0_36, %c0_37] : memref<32x32xbf16, #tpu.memory_space<vmem>>, vector<32x32xbf16>
    %cst_38 = arith.constant dense<0.000000e+00> : vector<16x32xf32>
    %117 = tpu.matmul %115, %116, %cst_38 {dimension_numbers = #tpu.dot_dimension_numbers<[1], [0], [0], [1], [0, 0, 1, 1], [], []>} : vector<16x32xbf16>, vector<32x32xbf16>, vector<16x32xf32> -> vector<16x32xf32>
    %118 = vector.extract_strided_slice %2 {offsets = [7, 0], sizes = [1, 32], strides = [1, 1]} : vector<16x32xf32> to vector<1x32xf32>
    %119 = vector.broadcast %118 : vector<1x32xf32> to vector<16x32xf32>
    %120 = arith.addf %117, %119 : vector<16x32xf32>
    %121 = arith.truncf %105 : vector<16x32xf32> to vector<16x32xbf16>
    %c0_39 = arith.constant 0 : index
    %c0_40 = arith.constant 0 : index
    %122 = vector.load %arg8[%c0_39, %c0_40] : memref<32x32xbf16, #tpu.memory_space<vmem>>, vector<32x32xbf16>
    %cst_41 = arith.constant dense<0.000000e+00> : vector<16x32xf32>
    %123 = tpu.matmul %121, %122, %cst_41 {dimension_numbers = #tpu.dot_dimension_numbers<[1], [0], [0], [1], [0, 0, 1, 1], [], []>} : vector<16x32xbf16>, vector<32x32xbf16>, vector<16x32xf32> -> vector<16x32xf32>
    %124 = vector.extract_strided_slice %2 {offsets = [9, 0], sizes = [1, 32], strides = [1, 1]} : vector<16x32xf32> to vector<1x32xf32>
    %125 = vector.broadcast %124 : vector<1x32xf32> to vector<16x32xf32>
    %126 = arith.addf %123, %125 : vector<16x32xf32>
    %127 = vector.extract_strided_slice %2 {offsets = [10, 0], sizes = [1, 32], strides = [1, 1]} : vector<16x32xf32> to vector<1x32xf32>
    %128 = vector.extract_strided_slice %2 {offsets = [11, 0], sizes = [1, 32], strides = [1, 1]} : vector<16x32xf32> to vector<1x32xf32>
    %cst_42 = arith.constant dense<0.000000e+00> : vector<16xf32>
    %129 = vector.multi_reduction <add>, %126, %cst_42 [1] : vector<16x32xf32> to vector<16xf32>
    %130 = vector.shape_cast %129 : vector<16xf32> to vector<16x1xf32>
    %cst_43 = arith.constant 3.200000e+01 : f32
    %131 = vector.broadcast %cst_43 : f32 to vector<16x1xf32>
    %132 = arith.divf %130, %131 : vector<16x1xf32>
    %133 = vector.broadcast %132 : vector<16x1xf32> to vector<16x32xf32>
    %134 = arith.subf %126, %133 : vector<16x32xf32>
    %135 = arith.mulf %134, %134 : vector<16x32xf32>
    %cst_44 = arith.constant dense<0.000000e+00> : vector<16xf32>
    %136 = vector.multi_reduction <add>, %135, %cst_44 [1] : vector<16x32xf32> to vector<16xf32>
    %137 = vector.shape_cast %136 : vector<16xf32> to vector<16x1xf32>
    %cst_45 = arith.constant 3.200000e+01 : f32
    %138 = vector.broadcast %cst_45 : f32 to vector<16x1xf32>
    %139 = arith.divf %137, %138 : vector<16x1xf32>
    %140 = vector.broadcast %132 : vector<16x1xf32> to vector<16x32xf32>
    %141 = arith.subf %126, %140 : vector<16x32xf32>
    %cst_46 = arith.constant 9.99999974E-6 : f32
    %142 = vector.broadcast %cst_46 : f32 to vector<16x1xf32>
    %143 = arith.addf %139, %142 : vector<16x1xf32>
    %144 = math.rsqrt %143 : vector<16x1xf32>
    %145 = vector.broadcast %144 : vector<16x1xf32> to vector<16x32xf32>
    %146 = arith.mulf %141, %145 : vector<16x32xf32>
    %147 = vector.broadcast %127 : vector<1x32xf32> to vector<16x32xf32>
    %148 = arith.mulf %146, %147 : vector<16x32xf32>
    %149 = vector.broadcast %128 : vector<1x32xf32> to vector<16x32xf32>
    %150 = arith.addf %148, %149 : vector<16x32xf32>
    %151 = arith.addf %120, %150 : vector<16x32xf32>
    %152 = arith.addf %151, %90 : vector<16x32xf32>
    %153 = vector.extract_strided_slice %2 {offsets = [12, 0], sizes = [1, 32], strides = [1, 1]} : vector<16x32xf32> to vector<1x32xf32>
    %154 = vector.extract_strided_slice %2 {offsets = [13, 0], sizes = [1, 32], strides = [1, 1]} : vector<16x32xf32> to vector<1x32xf32>
    %cst_47 = arith.constant dense<0.000000e+00> : vector<16xf32>
    %155 = vector.multi_reduction <add>, %152, %cst_47 [1] : vector<16x32xf32> to vector<16xf32>
    %156 = vector.shape_cast %155 : vector<16xf32> to vector<16x1xf32>
    %cst_48 = arith.constant 3.200000e+01 : f32
    %157 = vector.broadcast %cst_48 : f32 to vector<16x1xf32>
    %158 = arith.divf %156, %157 : vector<16x1xf32>
    %159 = vector.broadcast %158 : vector<16x1xf32> to vector<16x32xf32>
    %160 = arith.subf %152, %159 : vector<16x32xf32>
    %161 = arith.mulf %160, %160 : vector<16x32xf32>
    %cst_49 = arith.constant dense<0.000000e+00> : vector<16xf32>
    %162 = vector.multi_reduction <add>, %161, %cst_49 [1] : vector<16x32xf32> to vector<16xf32>
    %163 = vector.shape_cast %162 : vector<16xf32> to vector<16x1xf32>
    %cst_50 = arith.constant 3.200000e+01 : f32
    %164 = vector.broadcast %cst_50 : f32 to vector<16x1xf32>
    %165 = arith.divf %163, %164 : vector<16x1xf32>
    %166 = vector.broadcast %158 : vector<16x1xf32> to vector<16x32xf32>
    %167 = arith.subf %152, %166 : vector<16x32xf32>
    %cst_51 = arith.constant 9.99999974E-6 : f32
    %168 = vector.broadcast %cst_51 : f32 to vector<16x1xf32>
    %169 = arith.addf %165, %168 : vector<16x1xf32>
    %170 = math.rsqrt %169 : vector<16x1xf32>
    %171 = vector.broadcast %170 : vector<16x1xf32> to vector<16x32xf32>
    %172 = arith.mulf %167, %171 : vector<16x32xf32>
    %173 = vector.broadcast %153 : vector<1x32xf32> to vector<16x32xf32>
    %174 = arith.mulf %172, %173 : vector<16x32xf32>
    %175 = vector.broadcast %154 : vector<1x32xf32> to vector<16x32xf32>
    %176 = arith.addf %174, %175 : vector<16x32xf32>
    %177 = vector.extract_strided_slice %2 {offsets = [14, 0], sizes = [1, 32], strides = [1, 1]} : vector<16x32xf32> to vector<1x32xf32>
    %178 = vector.shape_cast %177 : vector<1x32xf32> to vector<1x1x32xf32>
    %179 = vector.extract_strided_slice %2 {offsets = [15, 0], sizes = [1, 1], strides = [1, 1]} : vector<16x32xf32> to vector<1x1xf32>
    %180 = vector.shape_cast %176 : vector<16x32xf32> to vector<2x8x32xf32>
    %181 = vector.broadcast %178 : vector<1x1x32xf32> to vector<2x8x32xf32>
    %182 = arith.mulf %180, %181 : vector<2x8x32xf32>
    %cst_52 = arith.constant dense<0.000000e+00> : vector<2x8xf32>
    %183 = vector.multi_reduction <add>, %182, %cst_52 [2] : vector<2x8x32xf32> to vector<2x8xf32>
    %184 = vector.broadcast %179 : vector<1x1xf32> to vector<2x8xf32>
    %185 = arith.addf %183, %184 : vector<2x8xf32>
    %c0_53 = arith.constant 0 : index
    %c0_54 = arith.constant 0 : index
    %186 = vector.load %arg11[%c0_53, %c0_54] : memref<2x8xf32, #tpu.memory_space<vmem>>, vector<2x8xf32>
    tpu.vector_store %arg11[%c0_53, %c0_54], %185 {strides = array<i32>} : memref<2x8xf32, #tpu.memory_space<vmem>>, vector<2x8xf32>,
    return
  }
  func.func @transform_0(%arg0: i32) -> (i32, i32) {
    %c0_i32 = arith.constant 0 : i32
    %c0_i32_0 = arith.constant 0 : i32
    return %arg0, %c0_i32 : i32, i32
  }
  func.func @transform_1(%arg0: i32) -> (i32, i32) {
    %c0_i32 = arith.constant 0 : i32
    %c0_i32_0 = arith.constant 0 : i32
    return %arg0, %c0_i32 : i32, i32
  }
  func.func @transform_2(%arg0: i32) -> (i32, i32) {
    %c0_i32 = arith.constant 0 : i32
    %c0_i32_0 = arith.constant 0 : i32
    %c0_i32_1 = arith.constant 0 : i32
    return %c0_i32, %c0_i32_0 : i32, i32
  }
  func.func @transform_3(%arg0: i32) -> (i32, i32) {
    %c0_i32 = arith.constant 0 : i32
    %c0_i32_0 = arith.constant 0 : i32
    %c0_i32_1 = arith.constant 0 : i32
    return %c0_i32, %c0_i32_0 : i32, i32
  }
  func.func @transform_4(%arg0: i32) -> (i32, i32) {
    %c0_i32 = arith.constant 0 : i32
    %c0_i32_0 = arith.constant 0 : i32
    %c0_i32_1 = arith.constant 0 : i32
    return %c0_i32, %c0_i32_0 : i32, i32
  }
  func.func @transform_5(%arg0: i32) -> (i32, i32) {
    %c0_i32 = arith.constant 0 : i32
    %c0_i32_0 = arith.constant 0 : i32
    %c0_i32_1 = arith.constant 0 : i32
    return %c0_i32, %c0_i32_0 : i32, i32
  }
  func.func @transform_6(%arg0: i32) -> (i32, i32) {
    %c0_i32 = arith.constant 0 : i32
    %c0_i32_0 = arith.constant 0 : i32
    %c0_i32_1 = arith.constant 0 : i32
    return %c0_i32, %c0_i32_0 : i32, i32
  }
  func.func @transform_7(%arg0: i32) -> (i32, i32) {
    %c0_i32 = arith.constant 0 : i32
    %c0_i32_0 = arith.constant 0 : i32
    %c0_i32_1 = arith.constant 0 : i32
    return %c0_i32, %c0_i32_0 : i32, i32
  }
  func.func @transform_8(%arg0: i32) -> (i32, i32) {
    %c0_i32 = arith.constant 0 : i32
    %c0_i32_0 = arith.constant 0 : i32
    %c0_i32_1 = arith.constant 0 : i32
    return %c0_i32, %c0_i32_0 : i32, i32
  }
  func.func @transform_9(%arg0: i32) -> (i32, i32, i32) {
    %c0_i32 = arith.constant 0 : i32
    %c0_i32_0 = arith.constant 0 : i32
    %c0_i32_1 = arith.constant 0 : i32
    %c0_i32_2 = arith.constant 0 : i32
    return %c0_i32, %c0_i32_0, %c0_i32_1 : i32, i32, i32
  }
  func.func @transform_10(%arg0: i32) -> (i32, i32) {
    %c0_i32 = arith.constant 0 : i32
    %c0_i32_0 = arith.constant 0 : i32
    return %arg0, %c0_i32 : i32, i32
  }
  func.func @transform_11(%arg0: i32) -> (i32, i32, i32) {
    %c0_i32 = arith.constant 0 : i32
    %c0_i32_0 = arith.constant 0 : i32
    %c0_i32_1 = arith.constant 0 : i32
    return %arg0, %c0_i32, %c0_i32_0 : i32, i32, i32
  }
}

</mosaic_0001>

<bundles_post_ra>
// kernel: tpu_custom_call.1
= control target key start
LH: loop header
LB: loop body
LE: loop exit
PB: predicated region body
PF: predicated region fallthrough
CT: control target
= control target key end

     0   :  { %6 = vsyncpa [#allocation3], 0  ;;  %s125_s0 = inlined_call_operand.hbm [shape: f32[8,128], index: 0, kind: input, shape index: {}]   ;;  %s126_s1 = inlined_call_operand.hbm [shape: f32[8,128], index: 1, kind: output, shape index: {}]  }
   0x1   :  { %7 = vsyncpa [#allocation4], 0  ;;  %s89_s6 = smov [#allocation2]   ;;  %s41_s10 = scalar_lea.hbm %s125_s0, 128 }
   0x2   :  { %s14_s7 = sshll.u32 %s89_s6, 4  ;;  %p42_p0 = scmp.ne.s32.totalorder %s125_s0, %s41_s10  ;;  %s15_s7 = int_to_ptr.vmem [resolvable:$true] %s14_s7 }
   0x3   :  { %p45_p1 = scmp.lt.u32.totalorder %s41_s10, %s125_s0 }
   0x5   :  { %p47_p2 = pnand %p45_p1, %p42_p0 }
   0x7   :  { %50 = shalt.err (!%p47_p2)
}
   0x8   :  { %s51_s15 = scalar_lea.vmem %s15_s7, 128  ;;  %p56_p4 = scmp.lt.s32.totalorder %s15_s7, %s15_s7 }
   0x9   :  { %p52_p3 = scmp.ne.s32.totalorder %s15_s7, %s51_s15  ;;  %p57_p5 = scmp.lt.s32.totalorder %s51_s15, %s51_s15 }
   0xb   :  { %p58_p6 = por %p57_p5, %p56_p4 }
   0xd   :  { %p59_p7 = pnand %p58_p6, %p52_p3 }
   0xf   :  { %62 = shalt.err (!%p59_p7)
}
  0x10   :  { %17 = dma.hbm_to_vmem [thread:$0]  %s125_s0, 128, %s15_s7, [#allocation3]  }
  0x11   :  { %85 = dma.done.wait [#allocation3], 128  }
  0x12   :  { %86 = vsyncadd [#allocation3], 4294967168  ;;  %s90_s18 = smov [#allocation5]   ;;  %v21_v0 = vld [vmem:[#allocation2] sm:$0xff] }
  0x13   :  { %s30_s19 = sshll.u32 %s90_s18, 4  ;;  %v22_v1 = vadd.f32 1.0, %v21_v0  ;;  %s31_s19 = int_to_ptr.vmem [resolvable:$true] %s30_s19 }
  0x14   :  { %s63_s20 = scalar_lea.vmem %s31_s19, 128  ;;  %p68_p9 = scmp.lt.s32.totalorder %s31_s19, %s31_s19 }
  0x15   :  { %23 = vst [vmem:[#allocation5] sm:$0xff] %v22_v1  ;;  %p64_p8 = scmp.ne.s32.totalorder %s31_s19, %s63_s20  ;;  %p69_p10 = scmp.lt.s32.totalorder %s63_s20, %s63_s20 }
  0x17   :  { %p70_p11 = por %p69_p10, %p68_p9 }
  0x19   :  { %p71_p12 = pnand %p70_p11, %p64_p8 }
  0x1b   :  { %74 = shalt.err (!%p71_p12)
}
  0x1c   :  { %s75_s23 = scalar_lea.hbm %s126_s1, 128 }
  0x1d   :  { %p76_p13 = scmp.ne.s32.totalorder %s126_s1, %s75_s23  ;;  %p79_p0 = scmp.lt.u32.totalorder %s75_s23, %s126_s1 }
  0x1f   :  { %p81_p1 = pnand %p79_p0, %p76_p13 }
  0x21   :  { %84 = shalt.err (!%p81_p1)
}
  0x22   :  { %33 = dma.vmem_to_hbm [thread:$0]  %s31_s19, 128, %s126_s1, [#allocation4]  }
  0x23   :  { %87 = dma.done.wait [#allocation4], 128  }
  0x24   :  { %88 = vsyncadd [#allocation4], 4294967168 }
  0x25   :  { %37 = vsyncpa [#allocation3], 1 }
  0x26   :  { %38 = vsyncpa [#allocation4], 1 }

// kernel: tpu_custom_call.1
= control target key start
LH: loop header
LB: loop body
LE: loop exit
PB: predicated region body
PF: predicated region fallthrough
CT: control target
= control target key end

     0   :  { %17 = vsyncpa [#allocation3], 0  ;;  %s6415_s0 = inlined_call_operand.hbm [shape: bf16[16,32], index: 0, kind: input, shape index: {}]   ;;  %s6416_s1 = inlined_call_operand.hbm [shape: bf16[16,32], index: 1, kind: input, shape index: {}]   ;;  %s6417_s2 = inlined_call_operand.hbm [shape: bf16[32,32], index: 2, kind: input, shape index: {}]   ;;  %s6418_s3 = inlined_call_operand.hbm [shape: bf16[32,64], index: 3, kind: input, shape index: {}]   ;;  %s6419_s4 = inlined_call_operand.hbm [shape: bf16[32,32], index: 4, kind: input, shape index: {}]   ;;  %s6420_s5 = inlined_call_operand.hbm [shape: bf16[32,64], index: 5, kind: input, shape index: {}]   ;;  %s6421_s6 = inlined_call_operand.hbm [shape: bf16[32,32], index: 6, kind: input, shape index: {}]   ;;  %s6422_s7 = inlined_call_operand.hbm [shape: bf16[32,32], index: 7, kind: input, shape index: {}]   ;;  %s6423_s8 = inlined_call_operand.hbm [shape: f32[16,32], index: 8, kind: input, shape index: {}]   ;;  %s6424_s9 = inlined_call_operand.hbm [shape: f32[2,16,1], index: 9, kind: input, shape index: {}]   ;;  %s6425_s10 = inlined_call_operand.hbm [shape: f32[2,8], index: 10, kind: output, shape index: {0}]   ;;  %s6426_s11 = inlined_call_operand.hbm [shape: f32[2,8,8], index: 11, kind: output, shape index: {1}]  }
   0x1   :  { %18 = vsyncpa [#allocation6], 0 }
   0x2   :  { %19 = vsyncpa [#allocation9], 0 }
   0x3   :  { %20 = vsyncpa [#allocation12], 0 }
   0x4   :  { %21 = vsyncpa [#allocation15], 0 }
   0x5   :  { %22 = vsyncpa [#allocation18], 0 }
   0x6   :  { %23 = vsyncpa [#allocation4], 0 }
   0x7   :  { %24 = vsyncpa [#allocation21], 0  ;;  %s5218_s17 = smov [#allocation5]   ;;  %s5219_s19 = smov [#allocation8]  }
   0x8   :  { %s42_s18 = sshll.u32 %s5218_s17, 4  ;;  %s66_s20 = sshll.u32 %s5219_s19, 4  ;;  %s43_s18 = int_to_ptr.vmem [resolvable:$true] %s42_s18  ;;  %s5313_s20 = int_to_ptr.vmem [resolvable:$true] %s66_s20 }
   0x9   :  { %s4938_s23 = scalar_lea.hbm %s6416_s1, 128 }
   0xa   :  { %p4939_p0 = scmp.ne.s32.totalorder %s6416_s1, %s4938_s23  ;;  %p4942_p1 = scmp.lt.u32.totalorder %s4938_s23, %s6416_s1 }
   0xc   :  { %p4944_p2 = pnand %p4942_p1, %p4939_p0 }
   0xe   :  { %4947 = shalt.err (!%p4944_p2)
}
   0xf   :  { %s4948_s28 = scalar_lea.vmem %s43_s18, 128  ;;  %p4953_p4 = scmp.lt.s32.totalorder %s43_s18, %s43_s18 }
  0x10   :  { %p4949_p3 = scmp.ne.s32.totalorder %s43_s18, %s4948_s28  ;;  %p4954_p5 = scmp.lt.s32.totalorder %s4948_s28, %s4948_s28 }
  0x12   :  { %p4955_p6 = por %p4954_p5, %p4953_p4 }
  0x14   :  { %p4956_p7 = pnand %p4955_p6, %p4949_p3 }
  0x16   :  { %4959 = shalt.err (!%p4956_p7)
}
  0x17   :  { %s5220_s29 = smov 64   ;;  %s5221_s30 = smov 4  }
  0x18   :  { %48 = dma.hbm_to_vmem [thread:$0]  %s6416_s1, 128, %s43_s18, [#allocation6], %s5220_s29, %s5220_s29, %s5221_s30  }
  0x19   :  { %s4960_s16 = scalar_lea.hbm %s6418_s3, 256 }
  0x1a   :  { %p4961_p8 = scmp.ne.s32.totalorder %s6418_s3, %s4960_s16  ;;  %p4964_p9 = scmp.lt.u32.totalorder %s4960_s16, %s6418_s3 }
  0x1c   :  { %p4966_p10 = pnand %p4964_p9, %p4961_p8 }
  0x1e   :  { %4969 = shalt.err (!%p4966_p10)
}
  0x1f   :  { %s4970_s23 = scalar_lea.vmem %s5313_s20, 256  ;;  %p4975_p12 = scmp.lt.s32.totalorder %s5313_s20, %s5313_s20 }
  0x20   :  { %p4971_p11 = scmp.ne.s32.totalorder %s5313_s20, %s4970_s23  ;;  %p4976_p13 = scmp.lt.s32.totalorder %s4970_s23, %s4970_s23 }
  0x22   :  { %p4977_p0 = por %p4976_p13, %p4975_p12 }
  0x24   :  { %p4978_p1 = pnand %p4977_p0, %p4971_p11 }
  0x26   :  { %4981 = shalt.err (!%p4978_p1)
}
  0x27   :  { %72 = dma.hbm_to_vmem [thread:$0]  %s6418_s3, 256, %s5313_s20, [#allocation9], %s5220_s29, %s5220_s29, %s5221_s30  }
  0x28   :  { %s5222_s24 = smov [#allocation11]   ;;  %s5223_s26 = smov [#allocation14]  }
  0x29   :  { %s90_s25 = sshll.u32 %s5222_s24, 4  ;;  %s114_s27 = sshll.u32 %s5223_s26, 4  ;;  %s91_s25 = int_to_ptr.vmem [resolvable:$true] %s90_s25  ;;  %s5350_s27 = int_to_ptr.vmem [resolvable:$true] %s114_s27 }
  0x2a   :  { %s4982_s13 = scalar_lea.hbm %s6420_s5, 256 }
  0x2b   :  { %p4983_p2 = scmp.ne.s32.totalorder %s6420_s5, %s4982_s13  ;;  %p4986_p3 = scmp.lt.u32.totalorder %s4982_s13, %s6420_s5 }
  0x2d   :  { %p4988_p4 = pnand %p4986_p3, %p4983_p2 }
  0x2f   :  { %4991 = shalt.err (!%p4988_p4)
}
  0x30   :  { %s4992_s3 = scalar_lea.vmem %s91_s25, 256  ;;  %p4997_p6 = scmp.lt.s32.totalorder %s91_s25, %s91_s25 }
  0x31   :  { %p4993_p5 = scmp.ne.s32.totalorder %s91_s25, %s4992_s3  ;;  %p4998_p7 = scmp.lt.s32.totalorder %s4992_s3, %s4992_s3 }
  0x33   :  { %p4999_p8 = por %p4998_p7, %p4997_p6 }
  0x35   :  { %p5000_p9 = pnand %p4999_p8, %p4993_p5 }
  0x37   :  { %5003 = shalt.err (!%p5000_p9)
}
  0x38   :  { %96 = dma.hbm_to_vmem [thread:$0]  %s6420_s5, 256, %s91_s25, [#allocation12], %s5220_s29, %s5220_s29, %s5221_s30  }
  0x39   :  { %s5004_s23 = scalar_lea.hbm %s6422_s7, 256 }
  0x3a   :  { %p5005_p10 = scmp.ne.s32.totalorder %s6422_s7, %s5004_s23  ;;  %p5008_p11 = scmp.lt.u32.totalorder %s5004_s23, %s6422_s7 }
  0x3c   :  { %p5010_p12 = pnand %p5008_p11, %p5005_p10 }
  0x3e   :  { %5013 = shalt.err (!%p5010_p12)
}
  0x3f   :  { %s5014_s28 = scalar_lea.vmem %s5350_s27, 256  ;;  %p5019_p0 = scmp.lt.s32.totalorder %s5350_s27, %s5350_s27 }
  0x40   :  { %p5015_p13 = scmp.ne.s32.totalorder %s5350_s27, %s5014_s28  ;;  %p5020_p1 = scmp.lt.s32.totalorder %s5014_s28, %s5014_s28 }
  0x42   :  { %p5021_p2 = por %p5020_p1, %p5019_p0 }
  0x44   :  { %p5022_p3 = pnand %p5021_p2, %p5015_p13 }
  0x46   :  { %5025 = shalt.err (!%p5022_p3)
}
  0x47   :  { %120 = dma.hbm_to_vmem [thread:$0]  %s6422_s7, 256, %s5350_s27, [#allocation15], %s5220_s29, %s5220_s29, %s5221_s30  }
  0x48   :  { %s5224_s12 = smov [#allocation2]   ;;  %s5225_s14 = smov [#allocation7]  }
  0x49   :  { %s30_s13 = sshll.u32 %s5224_s12, 4  ;;  %s54_s15 = sshll.u32 %s5225_s14, 4  ;;  %s31_s13 = int_to_ptr.vmem [resolvable:$true] %s30_s13  ;;  %s5387_s15 = int_to_ptr.vmem [resolvable:$true] %s54_s15 }
  0x4a   :  { %s5026_s3 = scalar_lea.hbm %s6415_s0, 128 }
  0x4b   :  { %p5027_p4 = scmp.ne.s32.totalorder %s6415_s0, %s5026_s3  ;;  %p5030_p5 = scmp.lt.u32.totalorder %s5026_s3, %s6415_s0 }
  0x4d   :  { %p5032_p6 = pnand %p5030_p5, %p5027_p4 }
  0x4f   :  { %5035 = shalt.err (!%p5032_p6)
}
  0x50   :  { %s5036_s7 = scalar_lea.vmem %s31_s13, 128  ;;  %p5041_p8 = scmp.lt.s32.totalorder %s31_s13, %s31_s13 }
  0x51   :  { %p5037_p7 = scmp.ne.s32.totalorder %s31_s13, %s5036_s7  ;;  %p5042_p9 = scmp.lt.s32.totalorder %s5036_s7, %s5036_s7 }
  0x53   :  { %p5043_p10 = por %p5042_p9, %p5041_p8 }
  0x55   :  { %p5044_p11 = pnand %p5043_p10, %p5037_p7 }
  0x57   :  { %5047 = shalt.err (!%p5044_p11)
}
  0x58   :  { %36 = dma.hbm_to_vmem [thread:$0]  %s6415_s0, 128, %s31_s13, [#allocation3], %s5220_s29, %s5220_s29, %s5221_s30  }
  0x59   :  { %s5048_s24 = scalar_lea.hbm %s6417_s2, 256 }
  0x5a   :  { %p5049_p12 = scmp.ne.s32.totalorder %s6417_s2, %s5048_s24  ;;  %p5052_p13 = scmp.lt.u32.totalorder %s5048_s24, %s6417_s2 }
  0x5c   :  { %p5054_p0 = pnand %p5052_p13, %p5049_p12 }
  0x5e   :  { %5057 = shalt.err (!%p5054_p0)
}
  0x5f   :  { %s5058_s12 = scalar_lea.vmem %s5387_s15, 256  ;;  %p5063_p2 = scmp.lt.s32.totalorder %s5387_s15, %s5387_s15 }
  0x60   :  { %p5059_p1 = scmp.ne.s32.totalorder %s5387_s15, %s5058_s12  ;;  %p5064_p3 = scmp.lt.s32.totalorder %s5058_s12, %s5058_s12 }
  0x62   :  { %p5065_p4 = por %p5064_p3, %p5063_p2 }
  0x64   :  { %p5066_p5 = pnand %p5065_p4, %p5059_p1 }
  0x66   :  { %5069 = shalt.err (!%p5066_p5)
}
  0x67   :  { %60 = dma.hbm_to_vmem [thread:$0]  %s6417_s2, 256, %s5387_s15, [#allocation6], %s5220_s29, %s5220_s29, %s5221_s30  }
  0x68   :  { %s5226_s14 = smov [#allocation10]   ;;  %s5227_s17 = smov [#allocation13]  }
  0x69   :  { %s78_s16 = sshll.u32 %s5226_s14, 4  ;;  %s102_s3 = sshll.u32 %s5227_s17, 4  ;;  %s79_s16 = int_to_ptr.vmem [resolvable:$true] %s78_s16  ;;  %s5424_s3 = int_to_ptr.vmem [resolvable:$true] %s102_s3 }
  0x6a   :  { %s5070_s21 = scalar_lea.hbm %s6419_s4, 256 }
  0x6b   :  { %p5071_p6 = scmp.ne.s32.totalorder %s6419_s4, %s5070_s21  ;;  %p5074_p7 = scmp.lt.u32.totalorder %s5070_s21, %s6419_s4 }
  0x6d   :  { %p5076_p8 = pnand %p5074_p7, %p5071_p6 }
  0x6f   :  { %5079 = shalt.err (!%p5076_p8)
}
  0x70   :  { %s5080_s2 = scalar_lea.vmem %s79_s16, 256  ;;  %p5085_p10 = scmp.lt.s32.totalorder %s79_s16, %s79_s16 }
  0x71   :  { %p5081_p9 = scmp.ne.s32.totalorder %s79_s16, %s5080_s2  ;;  %p5086_p11 = scmp.lt.s32.totalorder %s5080_s2, %s5080_s2 }
  0x73   :  { %p5087_p12 = por %p5086_p11, %p5085_p10 }
  0x75   :  { %p5088_p13 = pnand %p5087_p12, %p5081_p9 }
  0x77   :  { %5091 = shalt.err (!%p5088_p13)
}
  0x78   :  { %84 = dma.hbm_to_vmem [thread:$0]  %s6419_s4, 256, %s79_s16, [#allocation9], %s5220_s29, %s5220_s29, %s5221_s30  }
  0x79   :  { %s5092_s26 = scalar_lea.hbm %s6421_s6, 256 }
  0x7a   :  { %p5093_p0 = scmp.ne.s32.totalorder %s6421_s6, %s5092_s26  ;;  %p5096_p1 = scmp.lt.u32.totalorder %s5092_s26, %s6421_s6 }
  0x7c   :  { %p5098_p2 = pnand %p5096_p1, %p5093_p0 }
  0x7e   :  { %5101 = shalt.err (!%p5098_p2)
}
  0x7f   :  { %s5102_s0 = scalar_lea.vmem %s5424_s3, 256  ;;  %p5107_p4 = scmp.lt.s32.totalorder %s5424_s3, %s5424_s3 }
  0x80   :  { %p5103_p3 = scmp.ne.s32.totalorder %s5424_s3, %s5102_s0  ;;  %p5108_p5 = scmp.lt.s32.totalorder %s5102_s0, %s5102_s0 }
  0x82   :  { %p5109_p6 = por %p5108_p5, %p5107_p4 }
  0x84   :  { %p5110_p7 = pnand %p5109_p6, %p5103_p3 }
  0x86   :  { %5113 = shalt.err (!%p5110_p7)
}
  0x87   :  { %108 = dma.hbm_to_vmem [thread:$0]  %s6421_s6, 256, %s5424_s3, [#allocation12], %s5220_s29, %s5220_s29, %s5221_s30  }
  0x88   :  { %s5228_s14 = smov [#allocation16]   ;;  %s5114_s19 = scalar_lea.hbm %s6423_s8, 256 }
  0x89   :  { %s126_s16 = sshll.u32 %s5228_s14, 4  ;;  %p5115_p8 = scmp.ne.s32.totalorder %s6423_s8, %s5114_s19  ;;  %s127_s16 = int_to_ptr.vmem [resolvable:$true] %s126_s16 }
  0x8a   :  { %p5118_p9 = scmp.lt.u32.totalorder %s5114_s19, %s6423_s8 }
  0x8c   :  { %p5120_p10 = pnand %p5118_p9, %p5115_p8 }
  0x8e   :  { %5123 = shalt.err (!%p5120_p10)
}
  0x8f   :  { %s5124_s23 = scalar_lea.vmem %s127_s16, 256  ;;  %p5129_p12 = scmp.lt.s32.totalorder %s127_s16, %s127_s16 }
  0x90   :  { %p5125_p11 = scmp.ne.s32.totalorder %s127_s16, %s5124_s23  ;;  %p5130_p13 = scmp.lt.s32.totalorder %s5124_s23, %s5124_s23 }
  0x92   :  { %p5131_p0 = por %p5130_p13, %p5129_p12 }
  0x94   :  { %p5132_p1 = pnand %p5131_p0, %p5125_p11 }
  0x96   :  { %5135 = shalt.err (!%p5132_p1)
}
  0x97   :  { %s5229_s6 = smov 128   ;;  %s5230_s29 = smov 8  }
  0x98   :  { %132 = dma.hbm_to_vmem [thread:$0]  %s6423_s8, 256, %s127_s16, [#allocation15], %s5229_s6, %s5229_s6, %s5230_s29  }
  0x99   :  { %s5231_s15 = smov [#allocation17]   ;;  %s5136_s26 = scalar_lea.hbm %s6424_s9, 512 }
  0x9a   :  { %s138_s1 = sshll.u32 %s5231_s15, 4  ;;  %p5137_p2 = scmp.ne.s32.totalorder %s6424_s9, %s5136_s26  ;;  %s139_s1 = int_to_ptr.vmem [resolvable:$true] %s138_s1 }
  0x9b   :  { %p5140_p3 = scmp.lt.u32.totalorder %s5136_s26, %s6424_s9 }
  0x9d   :  { %p5142_p4 = pnand %p5140_p3, %p5137_p2 }
  0x9f   :  { %5145 = shalt.err (!%p5142_p4)
}
  0xa0   :  { %s5146_s0 = scalar_lea.vmem %s139_s1, 512  ;;  %p5151_p6 = scmp.lt.s32.totalorder %s139_s1, %s139_s1 }
  0xa1   :  { %p5147_p5 = scmp.ne.s32.totalorder %s139_s1, %s5146_s0  ;;  %p5152_p7 = scmp.lt.s32.totalorder %s5146_s0, %s5146_s0 }
  0xa3   :  { %p5153_p8 = por %p5152_p7, %p5151_p6 }
  0xa5   :  { %p5154_p9 = pnand %p5153_p8, %p5147_p5 }
  0xa7   :  { %5157 = shalt.err (!%p5154_p9)
}
  0xa8   :  { %144 = dma.hbm_to_vmem [thread:$0]  %s6424_s9, 512, %s139_s1, [#allocation18], %s5229_s6, %s5229_s6, %s5230_s29  }
  0xa9   :  { %5202 = dma.done.wait [#allocation3], 128  }
  0xaa   :  { %5203 = vsyncadd [#allocation3], 4294967168 }
  0xab   :  { %5204 = dma.done.wait [#allocation6], 384  }
  0xac   :  { %5205 = vsyncadd [#allocation6], 4294966912 }
  0xad   :  { %5206 = dma.done.wait [#allocation9], 512  }
  0xae   :  { %5207 = vsyncadd [#allocation9], 4294966784 }
  0xaf   :  { %5208 = dma.done.wait [#allocation12], 512  }
  0xb0   :  { %5209 = vsyncadd [#allocation12], 4294966784 }
  0xb1   :  { %5210 = dma.done.wait [#allocation15], 512  }
  0xb2   :  { %5211 = vsyncadd [#allocation15], 4294966784 }
  0xb3   :  { %5212 = dma.done.wait [#allocation18], 512  }
  0xb4   :  { %5213 = vsyncadd [#allocation18], 4294966784  ;;  %v5232_v0 = vmov 0.0   ;;  %vm5233_vm0 = vmmov 0   ;;  %v4845_v1 = vld [vmem:[#allocation8] sm:$0xff]   ;;  %v4846_v2 = vld [vmem:[#allocation8 + $0x8] sm:$0xff]   ;;  %v186_v7 = vlaneseq }
  0xb5   :  { %4539 = vmatprep.subr.bf16.mxu1 %v5232_v0  ;;  %4543 = vmatprep.mubr.msk.bf16.mxu1 %vm5233_vm0, %v5232_v0  ;;  %v4848_v3 = vld [vmem:[#allocation7] sm:$0xff]   ;;  %v4847_v4 = vld [vmem:[#allocation2] sm:$0xff]   ;;  %vm207_vm1 = vcmask 261120   ;;  %v4849_v5 = vld [vmem:[#allocation7 + $0x8] sm:$0xff]   ;;  %s5234_s9 = smov 116   ;;  %s5235_s13 = smov 124  }
  0xb6   :  { %4531 = vmatprep.subr.bf16.mxu0 %v5232_v0  ;;  %4535 = vmatprep.mubr.msk.bf16.mxu0 %vm5233_vm0, %v5232_v0  ;;  %v178_v6 = vld [vmem:[#allocation5] sm:$0xff]   ;;  %v5508_v8 = vshrl.u32 %v186_v7, 7  ;;  %v180_v10 = vld [vmem:[#allocation16] sm:$0xff]  ;;  %s5236_s14 = smov 112   ;;  %s5237_s16 = smov 120   ;;  %vm1482_vm2 = vcmask 31744  }
  0xb7   :  { %4540 = vmatpush3.bf16.msra.mxu1 %v4845_v1  ;;  %4532 = vmatpush3.bf16.msra.mxu0 %v4848_v3  ;;  %s5238_s17 = smov 104   ;;  %s5239_s20 = smov 108   ;;  %v5242_v34 = vmov 1983009808   ;;  %v5243_v39 = vmov 1934713408  }
  0xb8   :  { %4541 = vmatprep.subr.bf16.mxu1 %v5232_v0  ;;  %4533 = vmatprep.subr.bf16.mxu0 %v5232_v0  ;;  %v319_v9 = vsub.s32 1, %v5508_v8  ;;  %v188_v11 = vsub.s32 0, %v5508_v8  ;;  %s5240_s19 = smov 100   ;;  %v325_v28 = vsub.s32 2, %v5508_v8  ;;  %s5241_s21 = smov 32   ;;  %v384_v35 = vunpack.c.l.s4 %v5242_v34 }
  0xb9   :  { %v416_v40 = vunpack.c.l.s4 %v5243_v39  ;;  %s5244_s22 = smov 96   ;;  %vm2237_vm4 = vcmask 64512   ;;  %vm2468_vm5 = vcmask 1043456   ;;  %s5245_s7 = smov 12   ;;  %vm3806_vm6 = vcmask 97280  }
  0xba   :  { %v320_v12 = vrot.slane %v180_v10, %v319_v9  ;;  %v189_v14 = vrot.slane %v180_v10, %v188_v11  ;;  %v326_v29 = vrot.slane %v180_v10, %v325_v28  ;;  %v385_v37 = vunpack.c.0.s8 %v384_v35  ;;  %s5247_s27 = smov 16   ;;  %s5248_s23 = smov 28  }
  0xbb   :  { %4542 = vmatpush3.bf16.msra.mxu1 %v4846_v2  ;;  %4534 = vmatpush3.bf16.msra.mxu0 %v4849_v5  ;;  %v417_v50 = vunpack.c.0.s8 %v416_v40  ;;  %s5249_s3 = smov 24   ;;  %vm3809_vm7 = vcmask 130048   ;;  %vm3812_vm8 = vcmask 162816   ;;  %vm3815_vm9 = vcmask 195584   ;;  %s5251_s2 = smov [#allocation20]  }
  0xbc   :  { %4553 = vmatprep.subr.bf16.mxu1 %v5232_v0  ;;  %4547 = vmatprep.subr.bf16.mxu0 %v5232_v0  ;;  %v5550_v48 = vsub.s32 %v385_v37, %v5508_v8  ;;  %vm3818_vm10 = vcmask 228352   ;;  %s4300_s15 = sshll.u32 %s5251_s2, 4  ;;  %s4301_s15 = int_to_ptr.vmem [resolvable:$true] %s4300_s15 }
  0xbd   :  { %v5555_v10 = vsub.s32 %v417_v50, %v5508_v8  ;;  %s5158_s1 = scalar_lea.vmem %s4301_s15, 256  ;;  %p5163_p11 = scmp.lt.s32.totalorder %s4301_s15, %s4301_s15 }
  0xbe   :  { %4544 = vmatmul.mubr.msk.bf16.vlgmr.msra.gmra.mrb[0].mxu1 %vm207_vm1, %v4847_v4  ;;  %4536 = vmatmul.mubr.msk.bf16.vlgmr.msra.gmra.mrb[0].mxu0 %vm207_vm1, %v178_v6  ;;  %p5159_p10 = scmp.ne.s32.totalorder %s4301_s15, %s5158_s1  ;;  %p5164_p12 = scmp.lt.s32.totalorder %s5158_s1, %s5158_s1 }
  0xbf   :  { %4555 = vmatprep.mubr.msk.bf16.mxu1 %vm5233_vm0, %v5232_v0  ;;  %4549 = vmatprep.mubr.msk.bf16.mxu0 %vm5233_vm0, %v5232_v0 }
  0xc0   :  { %p5165_p13 = por %p5164_p12, %p5163_p11 }
  0xc2   :  { %p5166_p0 = pnand %p5165_p13, %p5159_p10 }
 0x191   :  { %v5514_v13 = vpop.f32.mrb[0].mxu1  ;;  %v245_v20 = vpop.f32.mrb[0].mxu0 }
 0x192   :  { %v4545_v15 = vpop.f32.mrb[1].mxu1  ;;  %v321_v17 = vadd.f32 %v320_v12, %v5514_v13  ;;  %v246_v21 = vadd.f32 %v245_v20, %v189_v14  ;;  %v4537_v22 = vpop.f32.mrb[1].mxu0 }
 0x193   :  { %v5518_v16 = vpop.f32.mrb[2].mxu1  ;;  %v248_v24 = vpop.f32.mrb[2].mxu0 }
 0x194   :  { %v322_v18 = vadd.f32 %v320_v12, %v5518_v16  ;;  %v4546_v19 = vpop.f32.mrb[3].mxu1  ;;  %v249_v25 = vadd.f32 %v248_v24, %v189_v14  ;;  %v4538_v26 = vpop.f32.mrb[3].mxu0 }
 0x196   :  { %v709_v23 = vpack.c.bf16 %v322_v18, %v321_v17  ;;  %v5524_v27 = vpack.c.bf16 %v249_v25, %v246_v21 }
 0x198   :  { %715 = vrot.lane.b32.xlu1 %v709_v23, %s5234_s9  ;;  %711 = vrot.lane.b32.xlu0 %v709_v23, %s5235_s13  ;;  %v729_v46 = vshrl.u32 %v709_v23, 16  ;;  %v353_v35 = vshrl.u32 %v5524_v27, 16 }
 0x19c   :  { %717 = vrot.lane.b32.xlu1 %v709_v23, %s5236_s14  ;;  %713 = vrot.lane.b32.xlu0 %v709_v23, %s5237_s16 }
 0x1a0   :  { %721 = vrot.lane.b32.xlu1 %v709_v23, %s5238_s17  ;;  %719 = vrot.lane.b32.xlu0 %v709_v23, %s5239_s20 }
 0x1a4   :  { %335 = vrot.lane.b32.xlu1 %v5524_v27, %s5235_s13  ;;  %723 = vrot.lane.b32.xlu0 %v709_v23, %s5240_s19 }
 0x1a8   :  { %339 = vrot.lane.b32.xlu1 %v5524_v27, %s5234_s9  ;;  %337 = vrot.lane.b32.xlu0 %v5524_v27, %s5237_s16 }
 0x1ac   :  { %343 = vrot.lane.b32.xlu1 %v5524_v27, %s5239_s20  ;;  %341 = vrot.lane.b32.xlu0 %v5524_v27, %s5236_s14 }
 0x1b0   :  { %347 = vrot.lane.b32.xlu1 %v5524_v27, %s5240_s19  ;;  %345 = vrot.lane.b32.xlu0 %v5524_v27, %s5238_s17 }
 0x1b4   :  { %328 = vrot.lane.b32.xlu0 %v326_v29, %s5241_s21 }
 0x20a   :  { %v716_v30 = vpop.permute.xlu1 %715  ;;  %v712_v31 = vpop.permute.xlu0 %711 }
 0x20b   :  { %v727_v43 = vpack.i.b16 %v712_v31, %v709_v23  ;;  %v730_v44 = vshrl.u32 %v712_v31, 16  ;;  %v738_v52 = vshrl.u32 %v716_v30, 16 }
 0x20d   :  { %v731_v60 = vpack.i.b16 %v730_v44, %v729_v46 }
 0x20e   :  { %v718_v32 = vpop.permute.xlu1 %717  ;;  %v714_v33 = vpop.permute.xlu0 %713 }
 0x20f   :  { %v745_v45 = vshrl.u32 %v718_v32, 16  ;;  %v737_v47 = vshrl.u32 %v714_v33, 16  ;;  %v735_v56 = vpack.i.b16 %v716_v30, %v714_v33 }
 0x211   :  { %v739_v61 = vpack.i.b16 %v738_v52, %v737_v47 }
 0x212   :  { %v722_v36 = vpop.permute.xlu1 %721  ;;  %v720_v38 = vpop.permute.xlu0 %719 }
 0x213   :  { %v743_v41 = vpack.i.b16 %v720_v38, %v718_v32  ;;  %v746_v42 = vshrl.u32 %v720_v38, 16  ;;  %v753_v57 = vshrl.u32 %v722_v36, 16 }
 0x215   :  { %v747_v53 = vpack.i.b16 %v746_v42, %v745_v45  ;;  %v757_v54 = vcombine.low %v727_v43, %v743_v41  ;;  %v758_v55 = vcombine.high %v727_v43, %v743_v41 }
 0x216   :  { %v336_v49 = vpop.permute.xlu1 %335  ;;  %v724_v51 = vpop.permute.xlu0 %723 }
 0x217   :  { %v751_v58 = vpack.i.b16 %v724_v51, %v722_v36  ;;  %v754_v59 = vshrl.u32 %v724_v51, 16  ;;  %v765_v4 = vrot.slane %v757_v54, %v5550_v48  ;;  %v772_v5 = vrot.slane %v758_v55, %v5550_v48 }
 0x218   :  { %v825_v6 = vcombine.low %v731_v60, %v747_v53  ;;  %v826_v18 = vcombine.high %v731_v60, %v747_v53  ;;  %v354_v19 = vshrl.u32 %v336_v49, 16  ;;  %v351_v40 = vpack.i.b16 %v336_v49, %v5524_v27 }
 0x219   :  { %v755_v62 = vpack.i.b16 %v754_v59, %v753_v57  ;;  %v773_v63 = vcombine.low %v735_v56, %v751_v58  ;;  %v774_v1 = vcombine.high %v735_v56, %v751_v58 }
 0x21a   :  { %v340_v2 = vpop.permute.xlu1 %339  ;;  %v338_v3 = vpop.permute.xlu0 %337  ;;  %v833_v26 = vrot.slane %v825_v6, %v5550_v48  ;;  %v840_v39 = vrot.slane %v826_v18, %v5550_v48  ;;  %v355_v43 = vpack.i.b16 %v354_v19, %v353_v35 }
 0x21b   :  { %v781_v12 = vrot.slane %v773_v63, %v5550_v48  ;;  %v788_v14 = vrot.slane %v774_v1, %v5550_v48  ;;  %v841_v15 = vcombine.low %v739_v61, %v755_v62  ;;  %v842_v17 = vcombine.high %v739_v61, %v755_v62 }
 0x21c   :  { %v362_v30 = vshrl.u32 %v340_v2, 16  ;;  %v361_v31 = vshrl.u32 %v338_v3, 16  ;;  %v359_v44 = vpack.i.b16 %v340_v2, %v338_v3 }
 0x21d   :  { %v789_v20 = vcombine.low %v765_v4, %v781_v12  ;;  %v790_v21 = vcombine.high %v765_v4, %v781_v12  ;;  %v805_v22 = vcombine.low %v772_v5, %v788_v14  ;;  %v806_v23 = vcombine.high %v772_v5, %v788_v14 }
 0x21e   :  { %v344_v24 = vpop.permute.xlu1 %343  ;;  %v342_v25 = vpop.permute.xlu0 %341  ;;  %v849_v29 = vrot.slane %v841_v15, %v5550_v48  ;;  %v856_v34 = vrot.slane %v842_v17, %v5550_v48  ;;  %v363_v45 = vpack.i.b16 %v362_v30, %v361_v31 }
 0x21f   :  { %v797_v32 = vrot.slane %v789_v20, %v5555_v10  ;;  %v804_v33 = vrot.slane %v790_v21, %v5555_v10  ;;  %v813_v36 = vrot.slane %v805_v22, %v5555_v10  ;;  %v820_v37 = vrot.slane %v806_v23, %v5555_v10 }
 0x220   :  { %v857_v38 = vcombine.low %v833_v26, %v849_v29  ;;  %v367_v41 = vpack.i.b16 %v344_v24, %v342_v25  ;;  %v370_v46 = vshrl.u32 %v344_v24, 16  ;;  %v858_v50 = vcombine.high %v833_v26, %v849_v29 }
 0x221   :  { %v873_v51 = vcombine.low %v840_v39, %v856_v34  ;;  %v874_v52 = vcombine.high %v840_v39, %v856_v34  ;;  %v893_v53 = vcombine.low %v797_v32, %v804_v33  ;;  %v4349_v55 = vcombine.high %v797_v32, %v804_v33 }
 0x222   :  { %v346_v42 = vpop.permute.xlu0 %345  ;;  %v348_v47 = vpop.permute.xlu1 %347  ;;  %v5570_v54 = vrot.slane %v857_v38, %v5555_v10  ;;  %v909_v56 = vcombine.low %v813_v36, %v820_v37  ;;  %v4350_v57 = vcombine.high %v813_v36, %v820_v37  ;;  %v369_v58 = vshrl.u32 %v342_v25, 16 }
 0x223   :  { %v381_v59 = vcombine.low %v351_v40, %v367_v41  ;;  %v382_v27 = vcombine.high %v351_v40, %v367_v41  ;;  %v378_v49 = vshrl.u32 %v348_v47, 16  ;;  %v375_v61 = vpack.i.b16 %v348_v47, %v346_v42 }
 0x224   :  { %v377_v62 = vshrl.u32 %v346_v42, 16  ;;  %v872_v2 = vrot.slane %v858_v50, %v5555_v10  ;;  %v5576_v3 = vrot.slane %v873_v51, %v5555_v10  ;;  %v5579_v4 = vrot.slane %v874_v52, %v5555_v10 }
 0x225   :  { %v371_v5 = vpack.i.b16 %v370_v46, %v369_v58  ;;  %v397_v12 = vcombine.low %v359_v44, %v375_v61  ;;  %v398_v14 = vcombine.high %v359_v44, %v375_v61  ;;  %v389_v17 = vrot.slane %v381_v59, %v5550_v48 }
 0x226   :  { %v329_v60 = vpop.permute.xlu0 %328  ;;  %v379_v6 = vpack.i.b16 %v378_v49, %v377_v62  ;;  %v5590_v23 = vrot.slane %v893_v53, %v5550_v48  ;;  %v5593_v24 = vrot.slane %v4349_v55, %v5550_v48  ;;  %v5596_v25 = vrot.slane %v909_v56, %v5550_v48 }
 0x227   :  { %v331_v63 = vadd.f32 %v329_v60, %v5514_v13  ;;  %v332_v1 = vadd.f32 %v329_v60, %v5518_v16  ;;  %v396_v13 = vrot.slane %v382_v27, %v5550_v48  ;;  %v449_v18 = vcombine.low %v355_v43, %v371_v5 }
 0x228   :  { %v450_v16 = vcombine.high %v355_v43, %v371_v5  ;;  %v405_v19 = vrot.slane %v397_v12, %v5550_v48  ;;  %v412_v20 = vrot.slane %v398_v14, %v5550_v48  ;;  %v465_v21 = vcombine.low %v363_v45, %v379_v6 }
 0x229   :  { %v5581_v15 = vpack.c.bf16 %v332_v1, %v331_v63  ;;  %v466_v22 = vcombine.high %v363_v45, %v379_v6  ;;  %v5599_v26 = vrot.slane %v4350_v57, %v5550_v48  ;;  %v457_v33 = vrot.slane %v449_v18, %v5550_v48 }
 0x22a   :  { %v413_v29 = vcombine.low %v389_v17, %v405_v19  ;;  %v414_v30 = vcombine.high %v389_v17, %v405_v19  ;;  %v429_v31 = vcombine.low %v396_v13, %v412_v20  ;;  %v430_v32 = vcombine.high %v396_v13, %v412_v20 }
 0x22b   :  { %1089 = vrot.lane.b32.xlu1 %v5581_v15, %s5237_s16  ;;  %1087 = vrot.lane.b32.xlu0 %v5581_v15, %s5235_s13  ;;  %v464_v34 = vrot.slane %v450_v16, %v5550_v48  ;;  %v473_v35 = vrot.slane %v465_v21, %v5550_v48  ;;  %v480_v36 = vrot.slane %v466_v22, %v5550_v48 }
 0x22c   :  { %v421_v37 = vrot.slane %v413_v29, %v5555_v10  ;;  %v428_v38 = vrot.slane %v414_v30, %v5555_v10  ;;  %v437_v39 = vrot.slane %v429_v31, %v5555_v10  ;;  %v444_v40 = vrot.slane %v430_v32, %v5555_v10 }
 0x22d   :  { %v481_v41 = vcombine.low %v457_v33, %v473_v35  ;;  %v482_v42 = vcombine.high %v457_v33, %v473_v35  ;;  %v497_v43 = vcombine.low %v464_v34, %v480_v36  ;;  %v498_v44 = vcombine.high %v464_v34, %v480_v36 }
 0x22e   :  { %v961_v45 = vcombine.low %v5570_v54, %v872_v2  ;;  %v4351_v46 = vcombine.high %v5570_v54, %v872_v2  ;;  %v977_v47 = vcombine.low %v5576_v3, %v5579_v4  ;;  %v4352_v50 = vcombine.high %v5576_v3, %v5579_v4 }
 0x22f   :  { %1091 = vrot.lane.b32.xlu1 %v5581_v15, %s5234_s9  ;;  %1093 = vrot.lane.b32.xlu0 %v5581_v15, %s5236_s14  ;;  %v489_v51 = vrot.slane %v481_v41, %v5555_v10  ;;  %v496_v52 = vrot.slane %v482_v42, %v5555_v10  ;;  %v505_v53 = vrot.slane %v497_v43, %v5555_v10 }
 0x230   :  { %v512_v55 = vrot.slane %v498_v44, %v5555_v10  ;;  %v517_v56 = vcombine.low %v421_v37, %v428_v38  ;;  %v4329_v57 = vcombine.high %v421_v37, %v428_v38  ;;  %v533_v58 = vcombine.low %v437_v39, %v444_v40 }
 0x231   :  { %v4330_v59 = vcombine.high %v437_v39, %v444_v40  ;;  %v585_v54 = vcombine.low %v489_v51, %v496_v52  ;;  %v4331_v27 = vcombine.high %v489_v51, %v496_v52  ;;  %v925_v61 = vcombine.low %v5590_v23, %v5593_v24 }
 0x232   :  { %v601_v49 = vcombine.low %v505_v53, %v512_v55  ;;  %v4332_v60 = vcombine.high %v505_v53, %v512_v55  ;;  %v941_v62 = vcombine.low %v5596_v25, %v5599_v26  ;;  %v5634_v63 = vrot.slane %v961_v45, %v5550_v48 }
 0x233   :  { %1095 = vrot.lane.b32.xlu1 %v5581_v15, %s5239_s20  ;;  %1097 = vrot.lane.b32.xlu0 %v5581_v15, %s5238_s17  ;;  %v5637_v1 = vrot.slane %v4351_v46, %v5550_v48  ;;  %v5640_v2 = vrot.slane %v585_v54, %v5550_v48  ;;  %v5643_v3 = vrot.slane %v4331_v27, %v5550_v48 }
 0x234   :  { %v5646_v4 = vrot.slane %v601_v49, %v5550_v48  ;;  %v5649_v5 = vrot.slane %v4332_v60, %v5550_v48  ;;  %v5652_v6 = vrot.slane %v517_v56, %v5550_v48  ;;  %v5655_v12 = vrot.slane %v4329_v57, %v5550_v48 }
 0x235   :  { %v5658_v14 = vrot.slane %v533_v58, %v5550_v48  ;;  %v5661_v17 = vrot.slane %v4330_v59, %v5550_v48  ;;  %v617_v13 = vcombine.low %v5640_v2, %v5643_v3  ;;  %v5670_v16 = vrot.slane %v977_v47, %v5550_v48 }
 0x236   :  { %v633_v18 = vcombine.low %v5646_v4, %v5649_v5  ;;  %v5673_v19 = vrot.slane %v4352_v50, %v5550_v48  ;;  %v993_v20 = vcombine.low %v5634_v63, %v5637_v1  ;;  %v933_v21 = vrot.slane %v925_v61, %v5555_v10 }
 0x237   :  { %1099 = vrot.lane.b32.xlu1 %v5581_v15, %s5240_s19  ;;  %v949_v22 = vrot.slane %v941_v62, %v5555_v10  ;;  %v549_v29 = vcombine.low %v5652_v6, %v5655_v12  ;;  %v565_v30 = vcombine.low %v5658_v14, %v5661_v17  ;;  %v625_v34 = vrot.slane %v617_v13, %v5555_v10 }
 0x238   :  { %v1001_v31 = vrot.slane %v993_v20, %v5555_v10  ;;  %v1009_v32 = vcombine.low %v5670_v16, %v5673_v19  ;;  %v641_v35 = vrot.slane %v633_v18, %v5555_v10  ;;  %v994_v20 = vcombine.high %v5634_v63, %v5637_v1 }
 0x239   :  { %v557_v36 = vrot.slane %v549_v29, %v5555_v10  ;;  %v573_v37 = vrot.slane %v565_v30, %v5555_v10  ;;  %v957_v38 = vcombine.low %v933_v21, %v949_v22  ;;  %v958_v59 = vcombine.high %v933_v21, %v949_v22 }
 0x23a   :  { %v1017_v33 = vrot.slane %v1009_v32, %v5555_v10  ;;  %v649_v41 = vcombine.low %v625_v34, %v641_v35  ;;  %v1010_v21 = vcombine.high %v5670_v16, %v5673_v19  ;;  %v650_v22 = vcombine.high %v625_v34, %v641_v35 }
 0x23b   :  { %1101 = vrot.lane.b32.xlu1 %v5581_v15, %s5244_s22  ;;  %v581_v45 = vcombine.low %v557_v36, %v573_v37  ;;  %v1032_v15 = vshrl.u32 %v957_v38, 16  ;;  %v1038_v29 = vshrl.u32 %v958_v59, 16  ;;  %v926_v32 = vcombine.high %v5590_v23, %v5593_v24 }
 0x23c   :  { %v1025_v39 = vcombine.low %v1001_v31, %v1017_v33  ;;  %v1026_v52 = vcombine.high %v1001_v31, %v1017_v33  ;;  %v657_v58 = vshrl.u32 %v649_v41, 16  ;;  %v942_v33 = vcombine.high %v5596_v25, %v5599_v26 }
 0x23d   :  { %v655_v50 = vpack.i.b16 %v649_v41, %v581_v45  ;;  %v656_v49 = vshrl.u32 %v581_v45, 16  ;;  %v1008_v16 = vrot.slane %v994_v20, %v5555_v10  ;;  %v1024_v19 = vrot.slane %v1010_v21, %v5555_v10 }
 0x23e   :  { %v1031_v40 = vpack.i.b16 %v1025_v39, %v957_v38  ;;  %v1033_v42 = vshrl.u32 %v1025_v39, 16  ;;  %v1037_v60 = vpack.i.b16 %v1026_v52, %v958_v59  ;;  %v1039_v62 = vshrl.u32 %v1026_v52, 16 }
 0x23f   :  { %v4333_v53 = vcombine.low %v655_v50, %v655_v50  ;;  %v4334_v55 = vcombine.high %v655_v50, %v655_v50  ;;  %v658_v61 = vpack.i.b16 %v657_v58, %v656_v49  ;;  %v582_v38 = vcombine.high %v557_v36, %v573_v37 }
 0x240   :  { %v4353_v43 = vcombine.low %v1031_v40, %v1031_v40  ;;  %v4354_v44 = vcombine.high %v1031_v40, %v1031_v40  ;;  %v1034_v51 = vpack.i.b16 %v1033_v42, %v1032_v15  ;;  %v4357_v13 = vcombine.low %v1037_v60, %v1037_v60 }
 0x241   :  { %v4358_v18 = vcombine.high %v1037_v60, %v1037_v60  ;;  %v4335_v30 = vcombine.low %v658_v61, %v658_v61  ;;  %v4336_v31 = vcombine.high %v658_v61, %v658_v61  ;;  %v1040_v39 = vpack.i.b16 %v1039_v62, %v1038_v29 }
 0x242   :  { %v1487_v46 = vsel %vm1482_vm2, %v4353_v43, 0  ;;  %v1533_v47 = vsel %vm1482_vm2, %v4354_v44, 0  ;;  %v4355_v56 = vcombine.low %v1034_v51, %v1034_v51  ;;  %v4356_v57 = vcombine.high %v1034_v51, %v1034_v51 }
 0x243   :  { %4548 = vmatpush3.bf16.xpose.msra.mxu0 %v1487_v46  ;;  %4554 = vmatpush3.bf16.xpose.msra.mxu1 %v1533_v47  ;;  %v1671_v63 = vsel %vm1482_vm2, %v4357_v13, 0  ;;  %v1717_v1 = vsel %vm1482_vm2, %v4358_v18, 0  ;;  %v661_v23 = vpack.i.b16 %v650_v22, %v582_v38  ;;  %v940_v24 = vrot.slane %v926_v32, %v5555_v10 }
 0x244   :  { %4559 = vmatprep.subr.bf16.mxu0 %v5232_v0  ;;  %4565 = vmatprep.subr.bf16.mxu1 %v5232_v0  ;;  %v1579_v54 = vsel %vm1482_vm2, %v4355_v56, 0  ;;  %v1625_v27 = vsel %vm1482_vm2, %v4356_v57, 0  ;;  %v956_v25 = vrot.slane %v942_v33, %v5555_v10  ;;  %v4359_v26 = vcombine.low %v1040_v39, %v1040_v39 }
 0x245   :  { %v4360_v34 = vcombine.high %v1040_v39, %v1040_v39  ;;  %v1027_v35 = vcombine.low %v1008_v16, %v1024_v19  ;;  %v618_v36 = vcombine.high %v5640_v2, %v5643_v3  ;;  %v634_v37 = vcombine.high %v5646_v4, %v5649_v5 }
 0x246   :  { %v4337_v40 = vcombine.low %v661_v23, %v661_v23  ;;  %v4338_v41 = vcombine.high %v661_v23, %v661_v23  ;;  %v663_v42 = vshrl.u32 %v650_v22, 16  ;;  %v959_v43 = vcombine.low %v940_v24, %v956_v25 }
 0x247   :  { %v550_v44 = vcombine.high %v5652_v6, %v5655_v12  ;;  %v566_v45 = vcombine.high %v5658_v14, %v5661_v17  ;;  %v1763_v15 = vsel %vm1482_vm2, %v4359_v26, 0  ;;  %v1809_v2 = vsel %vm1482_vm2, %v4360_v34, 0 }
 0x248   :  { %v662_v3 = vshrl.u32 %v582_v38, 16  ;;  %v1043_v4 = vpack.i.b16 %v1027_v35, %v959_v43  ;;  %v632_v6 = vrot.slane %v618_v36, %v5555_v10  ;;  %v648_v12 = vrot.slane %v634_v37, %v5555_v10 }
 0x249   :  { %v564_v14 = vrot.slane %v550_v44, %v5555_v10  ;;  %v580_v17 = vrot.slane %v566_v45, %v5555_v10  ;;  %v1045_v50 = vshrl.u32 %v1027_v35, 16  ;;  %v1028_v60 = vcombine.high %v1008_v16, %v1024_v19 }
 0x24a   :  { %4550 = vmatmul.mubr.msk.bf16.vlgmr.msra.gmra.mrb[4].mxu0 %vm1482_vm2, %v4333_v53  ;;  %4556 = vmatmul.mubr.msk.bf16.vlgmr.msra.gmra.mrb[4].mxu1 %vm1482_vm2, %v4334_v55  ;;  %v664_v5 = vpack.i.b16 %v663_v42, %v662_v3  ;;  %v4361_v46 = vcombine.low %v1043_v4, %v1043_v4  ;;  %v4362_v47 = vcombine.high %v1043_v4, %v1043_v4  ;;  %v1044_v55 = vshrl.u32 %v959_v43, 16 }
 0x24b   :  { %4560 = vmatpush3.bf16.xpose.msra.mxu0 %v1579_v54  ;;  %4566 = vmatpush3.bf16.xpose.msra.mxu1 %v1625_v27  ;;  %v651_v53 = vcombine.low %v632_v6, %v648_v12  ;;  %v583_v58 = vcombine.low %v564_v14, %v580_v17  ;;  %v960_v18 = vcombine.high %v940_v24, %v956_v25  ;;  %v1051_v33 = vshrl.u32 %v1028_v60, 16 }
 0x24c   :  { %4561 = vmatprep.mubr.msk.bf16.mxu0 %vm5233_vm0, %v5232_v0  ;;  %4567 = vmatprep.mubr.msk.bf16.mxu1 %vm5233_vm0, %v5232_v0  ;;  %v4339_v51 = vcombine.low %v664_v5, %v664_v5  ;;  %v4340_v52 = vcombine.high %v664_v5, %v664_v5  ;;  %v1855_v56 = vsel %vm1482_vm2, %v4361_v46, 0  ;;  %v1901_v57 = vsel %vm1482_vm2, %v4362_v47, 0 }
 0x24d   :  { %4571 = vmatprep.subr.bf16.mxu0 %v5232_v0  ;;  %4577 = vmatprep.subr.bf16.mxu1 %v5232_v0  ;;  %v1046_v59 = vpack.i.b16 %v1045_v50, %v1044_v55  ;;  %v667_v54 = vpack.i.b16 %v651_v53, %v583_v58  ;;  %v669_v13 = vshrl.u32 %v651_v53, 16  ;;  %v668_v22 = vshrl.u32 %v583_v58, 16 }
 0x24e   :  { %v1049_v29 = vpack.i.b16 %v1028_v60, %v960_v18  ;;  %v584_v23 = vcombine.high %v564_v14, %v580_v17  ;;  %v5801_v4 = vand.u32 127, %v186_v7 }
 0x24f   :  { %v4363_v27 = vcombine.low %v1046_v59, %v1046_v59  ;;  %v4364_v49 = vcombine.high %v1046_v59, %v1046_v59  ;;  %v4341_v61 = vcombine.low %v667_v54, %v667_v54  ;;  %v4342_v62 = vcombine.high %v667_v54, %v667_v54 }
 0x250   :  { %v4366_v32 = vcombine.high %v1049_v29, %v1049_v29  ;;  %v674_v42 = vshrl.u32 %v584_v23, 16  ;;  %vm5805_vm3 = vcmp.le.s32.totalorder %v5801_v4, %v5508_v8 }
 0x251   :  { %v1947_v20 = vsel %vm1482_vm2, %v4363_v27, 0  ;;  %v1993_v21 = vsel %vm1482_vm2, %v4364_v49, 0 }
 0x252   :  { %4562 = vmatmul.mubr.msk.bf16.vlgmr.msra.gmra.mrb[8].mxu0 %vm1482_vm2, %v4335_v30  ;;  %4568 = vmatmul.mubr.msk.bf16.vlgmr.msra.gmra.mrb[8].mxu1 %vm1482_vm2, %v4336_v31  ;;  %v670_v30 = vpack.i.b16 %v669_v13, %v668_v22  ;;  %v4365_v31 = vcombine.low %v1049_v29, %v1049_v29  ;;  %v2085_v19 = vsel %vm1482_vm2, %v4366_v32, 0 }
 0x253   :  { %4572 = vmatpush3.bf16.xpose.msra.mxu0 %v1671_v63  ;;  %4578 = vmatpush3.bf16.xpose.msra.mxu1 %v1717_v1  ;;  %v652_v63 = vcombine.high %v632_v6, %v648_v12  ;;  %v1050_v1 = vshrl.u32 %v960_v18, 16 }
 0x254   :  { %4573 = vmatprep.mubr.msk.bf16.mxu0 %vm5233_vm0, %v5232_v0  ;;  %4579 = vmatprep.mubr.msk.bf16.mxu1 %vm5233_vm0, %v5232_v0  ;;  %v4343_v38 = vcombine.low %v670_v30, %v670_v30  ;;  %v4344_v39 = vcombine.high %v670_v30, %v670_v30  ;;  %v2039_v16 = vsel %vm1482_vm2, %v4365_v31, 0 }
 0x255   :  { %4583 = vmatprep.subr.bf16.mxu0 %v5232_v0  ;;  %4589 = vmatprep.subr.bf16.mxu1 %v5232_v0  ;;  %v1052_v24 = vpack.i.b16 %v1051_v33, %v1050_v1  ;;  %v673_v25 = vpack.i.b16 %v652_v63, %v584_v23  ;;  %v675_v37 = vshrl.u32 %v652_v63, 16 }
 0x257   :  { %v4367_v26 = vcombine.low %v1052_v24, %v1052_v24  ;;  %v4368_v34 = vcombine.high %v1052_v24, %v1052_v24  ;;  %v4345_v35 = vcombine.low %v673_v25, %v673_v25  ;;  %v4346_v36 = vcombine.high %v673_v25, %v673_v25 }
 0x258   :  { %v676_v43 = vpack.i.b16 %v675_v37, %v674_v42 }
 0x25a   :  { %4574 = vmatmul.mubr.msk.bf16.vlgmr.msra.gmra.mrb[12].mxu0 %vm1482_vm2, %v4337_v40  ;;  %4580 = vmatmul.mubr.msk.bf16.vlgmr.msra.gmra.mrb[12].mxu1 %vm1482_vm2, %v4338_v41  ;;  %v2131_v40 = vsel %vm1482_vm2, %v4367_v26, 0  ;;  %v2177_v41 = vsel %vm1482_vm2, %v4368_v34, 0  ;;  %v4347_v44 = vcombine.low %v676_v43, %v676_v43  ;;  %v4348_v45 = vcombine.high %v676_v43, %v676_v43 }
 0x25b   :  { %4584 = vmatpush3.bf16.xpose.msra.mxu0 %v1763_v15  ;;  %4590 = vmatpush3.bf16.xpose.msra.mxu1 %v1809_v2 }
 0x25c   :  { %4585 = vmatprep.mubr.msk.bf16.mxu0 %vm5233_vm0, %v5232_v0  ;;  %4591 = vmatprep.mubr.msk.bf16.mxu1 %vm5233_vm0, %v5232_v0 }
 0x25d   :  { %4595 = vmatprep.subr.bf16.mxu0 %v5232_v0  ;;  %4601 = vmatprep.subr.bf16.mxu1 %v5232_v0 }
 0x262   :  { %4586 = vmatmul.mubr.msk.bf16.vlgmr.msra.gmra.mrb[16].mxu0 %vm1482_vm2, %v4339_v51  ;;  %4592 = vmatmul.mubr.msk.bf16.vlgmr.msra.gmra.mrb[16].mxu1 %vm1482_vm2, %v4340_v52 }
 0x263   :  { %4596 = vmatpush3.bf16.xpose.msra.mxu0 %v1855_v56  ;;  %4602 = vmatpush3.bf16.xpose.msra.mxu1 %v1901_v57 }
 0x264   :  { %4597 = vmatprep.mubr.msk.bf16.mxu0 %vm5233_vm0, %v5232_v0  ;;  %4603 = vmatprep.mubr.msk.bf16.mxu1 %vm5233_vm0, %v5232_v0 }
 0x265   :  { %4607 = vmatprep.subr.bf16.mxu0 %v5232_v0  ;;  %4613 = vmatprep.subr.bf16.mxu1 %v5232_v0 }
 0x26a   :  { %4598 = vmatmul.mubr.msk.bf16.vlgmr.msra.gmra.mrb[20].mxu0 %vm1482_vm2, %v4341_v61  ;;  %4604 = vmatmul.mubr.msk.bf16.vlgmr.msra.gmra.mrb[20].mxu1 %vm1482_vm2, %v4342_v62 }
 0x26b   :  { %4608 = vmatpush3.bf16.xpose.msra.mxu0 %v1947_v20  ;;  %4614 = vmatpush3.bf16.xpose.msra.mxu1 %v1993_v21 }
 0x26c   :  { %4609 = vmatprep.mubr.msk.bf16.mxu0 %vm5233_vm0, %v5232_v0  ;;  %4615 = vmatprep.mubr.msk.bf16.mxu1 %vm5233_vm0, %v5232_v0 }
 0x26d   :  { %4619 = vmatprep.subr.bf16.mxu0 %v5232_v0  ;;  %4625 = vmatprep.subr.bf16.mxu1 %v5232_v0 }
 0x272   :  { %4610 = vmatmul.mubr.msk.bf16.vlgmr.msra.gmra.mrb[24].mxu0 %vm1482_vm2, %v4343_v38  ;;  %4616 = vmatmul.mubr.msk.bf16.vlgmr.msra.gmra.mrb[24].mxu1 %vm1482_vm2, %v4344_v39 }
 0x273   :  { %4620 = vmatpush3.bf16.xpose.msra.mxu0 %v2039_v16  ;;  %4626 = vmatpush3.bf16.xpose.msra.mxu1 %v2085_v19 }
 0x274   :  { %4621 = vmatprep.mubr.msk.bf16.mxu0 %vm5233_vm0, %v5232_v0  ;;  %4627 = vmatprep.mubr.msk.bf16.mxu1 %vm5233_vm0, %v5232_v0 }
 0x275   :  { %4631 = vmatprep.subr.bf16.mxu0 %v5232_v0  ;;  %4637 = vmatprep.subr.bf16.mxu1 %v5232_v0 }
 0x27a   :  { %4622 = vmatmul.mubr.msk.bf16.vlgmr.msra.gmra.mrb[28].mxu0 %vm1482_vm2, %v4345_v35  ;;  %4628 = vmatmul.mubr.msk.bf16.vlgmr.msra.gmra.mrb[28].mxu1 %vm1482_vm2, %v4346_v36 }
 0x27b   :  { %4632 = vmatpush3.bf16.xpose.msra.mxu0 %v2131_v40  ;;  %4638 = vmatpush3.bf16.xpose.msra.mxu1 %v2177_v41 }
 0x27c   :  { %4633 = vmatprep.mubr.msk.bf16.mxu0 %vm5233_vm0, %v5232_v0  ;;  %4639 = vmatprep.mubr.msk.bf16.mxu1 %vm5233_vm0, %v5232_v0 }
 0x27d   :  { %4643 = vmatprep.subr.bf16.mxu0 %v5232_v0  ;;  %4649 = vmatprep.subr.bf16.mxu1 %v5232_v0 }
 0x282   :  { %4634 = vmatmul.mubr.msk.bf16.vlgmr.msra.gmra.mrb[32].mxu0 %vm1482_vm2, %v4347_v44  ;;  %4640 = vmatmul.mubr.msk.bf16.vlgmr.msra.gmra.mrb[32].mxu1 %vm1482_vm2, %v4348_v45 }
 0x283   :  { %4645 = vmatprep.mubr.msk.bf16.mxu0 %vm5233_vm0, %v5232_v0  ;;  %4651 = vmatprep.mubr.msk.bf16.mxu1 %vm5233_vm0, %v5232_v0 }
 0x29d   :  { %v1090_v15 = vpop.permute.xlu1 %1089  ;;  %v1088_v2 = vpop.permute.xlu0 %1087 }
 0x29e   :  { %1105 = vrot.lane.b32.xlu1 %v1090_v15, %s5244_s22  ;;  %1103 = vrot.lane.b32.xlu0 %v1088_v2, %s5244_s22 }
 0x2a1   :  { %v1092_v3 = vpop.permute.xlu1 %1091  ;;  %v1094_v38 = vpop.permute.xlu0 %1093 }
 0x2a2   :  { %1107 = vrot.lane.b32.xlu1 %v1092_v3, %s5244_s22 }
 0x2a5   :  { %v1096_v34 = vpop.permute.xlu1 %1095 }
 0x31d   :  { %v1523_v6 = vpop.f32.mrb[4].mxu0  ;;  %v1569_v12 = vpop.f32.mrb[4].mxu1 }
 0x31e   :  { %v5811_v14 = vsel %vm5805_vm3, %v1523_v6, -1e+30  ;;  %v5815_v17 = vsel %vm5805_vm3, %v1569_v12, -1e+30  ;;  %v4551_v46 = vpop.f32.mrb[5].mxu0  ;;  %v4557_v7 = vpop.f32.mrb[5].mxu1 }
 0x31f   :  { %v1526_v47 = vpop.f32.mrb[6].mxu0  ;;  %v1572_v50 = vpop.f32.mrb[6].mxu1  ;;  %v2238_v51 = vsel %vm2237_vm4, %v5811_v14, -inf  ;;  %v2241_v52 = vsel %vm2237_vm4, %v5815_v17, -inf }
 0x320   :  { %2239 = vmax.xlane.f32.xlu1 %v2238_v51  ;;  %v4552_v53 = vpop.f32.mrb[7].mxu0  ;;  %2242 = vmax.xlane.f32.xlu0 %v2241_v52  ;;  %v4558_v55 = vpop.f32.mrb[7].mxu1 }
 0x325   :  { %v5821_v56 = vpop.f32.mrb[8].mxu0  ;;  %v1661_v57 = vpop.f32.mrb[8].mxu1 }
 0x326   :  { %v5825_v58 = vsel %vm5805_vm3, %v1661_v57, -1e+30  ;;  %v4563_v59 = vpop.f32.mrb[9].mxu0  ;;  %v4569_v54 = vpop.f32.mrb[9].mxu1 }
 0x327   :  { %v1618_v27 = vpop.f32.mrb[10].mxu0  ;;  %v1664_v49 = vpop.f32.mrb[10].mxu1  ;;  %v2247_v60 = vsel %vm2237_vm4, %v5825_v58, -inf }
 0x328   :  { %v4564_v61 = vpop.f32.mrb[11].mxu0  ;;  %2248 = vmax.xlane.f32.xlu1 %v2247_v60  ;;  %v4570_v62 = vpop.f32.mrb[11].mxu1 }
 0x32d   :  { %v1707_v13 = vpop.f32.mrb[12].mxu0  ;;  %v1753_v18 = vpop.f32.mrb[12].mxu1 }
 0x32e   :  { %v5831_v20 = vsel %vm5805_vm3, %v1753_v18, -1e+30  ;;  %v4575_v21 = vpop.f32.mrb[13].mxu0  ;;  %v4581_v22 = vpop.f32.mrb[13].mxu1  ;;  %v5868_v18 = vsel %vm5805_vm3, %v5821_v56, -1e+30 }
 0x32f   :  { %v1710_v29 = vpop.f32.mrb[14].mxu0  ;;  %v1756_v30 = vpop.f32.mrb[14].mxu1  ;;  %v2253_v31 = vsel %vm2237_vm4, %v5831_v20, -inf  ;;  %v2244_v21 = vsel %vm2237_vm4, %v5868_v18, -inf  ;;  %v5874_v22 = vsel %vm5805_vm3, %v1707_v13, -1e+30 }
 0x330   :  { %v4576_v32 = vpop.f32.mrb[15].mxu0  ;;  %2254 = vmax.xlane.f32.xlu1 %v2253_v31  ;;  %v4582_v33 = vpop.f32.mrb[15].mxu1  ;;  %v2250_v13 = vsel %vm2237_vm4, %v5874_v22, -inf }
 0x335   :  { %v1799_v39 = vpop.f32.mrb[16].mxu0  ;;  %v1845_v63 = vpop.f32.mrb[16].mxu1 }
 0x336   :  { %v5837_v1 = vsel %vm5805_vm3, %v1845_v63, -1e+30  ;;  %v4587_v16 = vpop.f32.mrb[17].mxu0  ;;  %1109 = vrot.lane.b32.xlu0 %v1094_v38, %s5244_s22  ;;  %v4593_v19 = vpop.f32.mrb[17].mxu1 }
 0x337   :  { %v1802_v23 = vpop.f32.mrb[18].mxu0  ;;  %v1848_v24 = vpop.f32.mrb[18].mxu1 }
 0x338   :  { %v4588_v25 = vpop.f32.mrb[19].mxu0  ;;  %v4594_v26 = vpop.f32.mrb[19].mxu1  ;;  %v5888_v23 = vsel %vm5805_vm3, %v1799_v39, -1e+30 }
 0x339   :  { %v2256_v24 = vsel %vm2237_vm4, %v5888_v23, -inf }
 0x33d   :  { %v1891_v35 = vpop.f32.mrb[20].mxu0  ;;  %v1937_v36 = vpop.f32.mrb[20].mxu1 }
 0x33e   :  { %v5842_v37 = vsel %vm5805_vm3, %v1891_v35, -1e+30  ;;  %v5846_v40 = vsel %vm5805_vm3, %v1937_v36, -1e+30  ;;  %v4599_v41 = vpop.f32.mrb[21].mxu0  ;;  %v4605_v42 = vpop.f32.mrb[21].mxu1 }
 0x33f   :  { %v1894_v43 = vpop.f32.mrb[22].mxu0  ;;  %v1940_v44 = vpop.f32.mrb[22].mxu1  ;;  %v2262_v25 = vsel %vm2237_vm4, %v5842_v37, -inf  ;;  %v2265_v5 = vsel %vm2237_vm4, %v5846_v40, -inf }
 0x340   :  { %v4600_v45 = vpop.f32.mrb[23].mxu0  ;;  %v4606_v15 = vpop.f32.mrb[23].mxu1 }
 0x341   :  { %1111 = vrot.lane.b32.xlu1 %v1096_v34, %s5244_s22  ;;  %v2259_v34 = vsel %vm2237_vm4, %v5837_v1, -inf  ;;  %v1100_v43 = vpop.permute.xlu1 %1099  ;;  %v1098_v44 = vpop.permute.xlu0 %1097 }
 0x345   :  { %v1983_v2 = vpop.f32.mrb[24].mxu0  ;;  %v2029_v3 = vpop.f32.mrb[24].mxu1 }
 0x346   :  { %v5851_v6 = vsel %vm5805_vm3, %v1983_v2, -1e+30  ;;  %v5855_v12 = vsel %vm5805_vm3, %v2029_v3, -1e+30  ;;  %v4611_v46 = vpop.f32.mrb[25].mxu0  ;;  %v4617_v7 = vpop.f32.mrb[25].mxu1 }
 0x347   :  { %v1986_v47 = vpop.f32.mrb[26].mxu0  ;;  %v2032_v50 = vpop.f32.mrb[26].mxu1  ;;  %v2268_v26 = vsel %vm2237_vm4, %v5851_v6, -inf  ;;  %v2271_v39 = vsel %vm2237_vm4, %v5855_v12, -inf }
 0x348   :  { %v4612_v51 = vpop.f32.mrb[27].mxu0  ;;  %v4618_v52 = vpop.f32.mrb[27].mxu1 }
 0x349   :  { %v5912_v45 = vpop.permute.xlu1 %1101  ;;  %v5916_v2 = vpop.permute.xlu0 %1103 }
 0x34d   :  { %v2075_v53 = vpop.f32.mrb[28].mxu0  ;;  %v2121_v55 = vpop.f32.mrb[28].mxu1 }
 0x34e   :  { %v5859_v57 = vsel %vm5805_vm3, %v2075_v53, -1e+30  ;;  %v5863_v59 = vsel %vm5805_vm3, %v2121_v55, -1e+30  ;;  %v4623_v54 = vpop.f32.mrb[29].mxu0  ;;  %v4629_v27 = vpop.f32.mrb[29].mxu1 }
 0x34f   :  { %v2078_v49 = vpop.f32.mrb[30].mxu0  ;;  %v2124_v60 = vpop.f32.mrb[30].mxu1  ;;  %v2274_v35 = vsel %vm2237_vm4, %v5859_v57, -inf  ;;  %v2277_v36 = vsel %vm2237_vm4, %v5863_v59, -inf }
 0x350   :  { %v4624_v61 = vpop.f32.mrb[31].mxu0  ;;  %v4630_v62 = vpop.f32.mrb[31].mxu1 }
 0x351   :  { %v5914_v15 = vpop.permute.xlu1 %1105 }
 0x355   :  { %v2167_v29 = vpop.f32.mrb[32].mxu0  ;;  %2245 = vmax.xlane.f32.xlu0 %v2244_v21  ;;  %v2213_v30 = vpop.f32.mrb[32].mxu1 }
 0x356   :  { %v5878_v31 = vsel %vm5805_vm3, %v2167_v29, -1e+30  ;;  %v5882_v32 = vsel %vm5805_vm3, %v2213_v30, -1e+30  ;;  %v4635_v56 = vpop.f32.mrb[33].mxu0  ;;  %v4641_v33 = vpop.f32.mrb[33].mxu1 }
 0x357   :  { %v2170_v38 = vpop.f32.mrb[34].mxu0  ;;  %v2216_v63 = vpop.f32.mrb[34].mxu1  ;;  %v2280_v41 = vsel %vm2237_vm4, %v5878_v31, -inf  ;;  %v2283_v42 = vsel %vm2237_vm4, %v5882_v32, -inf }
 0x358   :  { %v4636_v16 = vpop.f32.mrb[35].mxu0  ;;  %v4642_v19 = vpop.f32.mrb[35].mxu1 }
 0x359   :  { %2251 = vmax.xlane.f32.xlu0 %v2250_v13  ;;  %v5918_v3 = vpop.permute.xlu1 %1107 }
 0x35d   :  { %2257 = vmax.xlane.f32.xlu0 %v2256_v24 }
 0x361   :  { %2263 = vmax.xlane.f32.xlu0 %v2262_v25 }
 0x365   :  { %2269 = vmax.xlane.f32.xlu0 %v2268_v26  ;;  %2260 = vmax.xlane.f32.xlu1 %v2259_v34 }
 0x369   :  { %2266 = vmax.xlane.f32.xlu1 %v2265_v5  ;;  %2272 = vmax.xlane.f32.xlu0 %v2271_v39 }
 0x36d   :  { %2275 = vmax.xlane.f32.xlu1 %v2274_v35  ;;  %2278 = vmax.xlane.f32.xlu0 %v2277_v36 }
 0x371   :  { %2281 = vmax.xlane.f32.xlu1 %v2280_v41  ;;  %2284 = vmax.xlane.f32.xlu0 %v2283_v42 }
 0x382   :  { %1115 = vrot.lane.b32.xlu1 %v1100_v43, %s5244_s22 }
 0x387   :  { %1113 = vrot.lane.b32.xlu0 %v1098_v44, %s5244_s22 }
 0x3ad   :  { %v2240_v46 = vpop.xlane.xlu1 %2239  ;;  %v2243_v7 = vpop.xlane.xlu0 %2242 }
 0x3ae   :  { %v2286_v47 = vsub.f32 %v5811_v14, %v2240_v46  ;;  %v2287_v50 = vsub.f32 %v5815_v17, %v2243_v7 }
 0x3b0   :  { %v2302_v51 = vmul.f32 1.442695, %v2286_v47  ;;  %v2304_v52 = vmul.f32 1.442695, %v2287_v50 }
 0x3b1   :  { %v5930_v49 = vpop.permute.xlu0 %1109 }
 0x3b2   :  { %4860 = vpow2.f32 %v2302_v51 }
 0x3b3   :  { %4862 = vpow2.f32 %v2304_v52 }
 0x3b5   :  { %v2249_v14 = vpop.xlane.xlu1 %2248 }
 0x3b6   :  { %v2289_v17 = vsub.f32 %v5825_v58, %v2249_v14 }
 0x3b8   :  { %v2308_v21 = vmul.f32 1.442695, %v2289_v17  ;;  %v1122_v17 = vshrl.u32 %v5916_v2, 16 }
 0x3bc   :  { %v5922_v53 = vpop.eup %4860 }
 0x3bd   :  { %v5924_v55 = vpop.eup %4862  ;;  %v2334_v54 = vsel %vm2237_vm4, %v5922_v53, 0.0  ;;  %v2255_v60 = vpop.xlane.xlu1 %2254 }
 0x3be   :  { %v2337_v27 = vsel %vm2237_vm4, %v5924_v55, 0.0  ;;  %2335 = vadd.xlane.f32.xlu0 %v2334_v54  ;;  %v2291_v29 = vsub.f32 %v5831_v20, %v2255_v60  ;;  %v1137_v60 = vshrl.u32 %v5930_v49, 16 }
 0x3bf   :  { %2338 = vadd.xlane.f32.xlu1 %v2337_v27 }
 0x3c0   :  { %v2312_v38 = vmul.f32 1.442695, %v2291_v29 }
 0x3c1   :  { %v1112_v13 = vpop.permute.xlu1 %1111 }
 0x3c2   :  { %v1138_v51 = vshrl.u32 %v1112_v13, 16  ;;  %v1135_v29 = vpack.i.b16 %v1112_v13, %v5930_v49  ;;  %v1129_v49 = vshrl.u32 %v5914_v15, 16  ;;  %v1127_v13 = vpack.i.b16 %v5918_v3, %v5914_v15 }
 0x3e2   :  { %v2246_v61 = vpop.xlane.xlu0 %2245 }
 0x3e3   :  { %v2288_v62 = vsub.f32 %v5868_v18, %v2246_v61 }
 0x3e5   :  { %v2306_v30 = vmul.f32 1.442695, %v2288_v62 }
 0x3e6   :  { %v2252_v56 = vpop.xlane.xlu0 %2251 }
 0x3e7   :  { %4864 = vpow2.f32 %v2306_v30  ;;  %v2290_v33 = vsub.f32 %v5874_v22, %v2252_v56  ;;  %v1139_v30 = vpack.i.b16 %v1138_v51, %v1137_v60 }
 0x3e8   :  { %4866 = vpow2.f32 %v2308_v21  ;;  %v1121_v21 = vshrl.u32 %v5912_v45, 16 }
 0x3e9   :  { %v2310_v63 = vmul.f32 1.442695, %v2290_v33 }
 0x3ea   :  { %v2258_v16 = vpop.xlane.xlu0 %2257 }
 0x3eb   :  { %4868 = vpow2.f32 %v2310_v63  ;;  %v2292_v19 = vsub.f32 %v5888_v23, %v2258_v16  ;;  %v1119_v63 = vpack.i.b16 %v5916_v2, %v5912_v45  ;;  %v1123_v16 = vpack.i.b16 %v1122_v17, %v1121_v21 }
 0x3ec   :  { %4870 = vpow2.f32 %v2312_v38 }
 0x3ed   :  { %v2314_v58 = vmul.f32 1.442695, %v2292_v19 }
 0x3ee   :  { %v2264_v24 = vpop.xlane.xlu0 %2263 }
 0x3ef   :  { %4872 = vpow2.f32 %v2314_v58  ;;  %v2294_v18 = vsub.f32 %v5842_v37, %v2264_v24  ;;  %v1130_v24 = vshrl.u32 %v5918_v3, 16 }
 0x3f1   :  { %v5938_v20 = vpop.eup %4864  ;;  %v2318_v25 = vmul.f32 1.442695, %v2294_v18 }
 0x3f2   :  { %v2270_v26 = vpop.xlane.xlu0 %2269  ;;  %v2261_v34 = vpop.xlane.xlu1 %2260  ;;  %v2340_v22 = vsel %vm2237_vm4, %v5938_v20, 0.0 }
 0x3f3   :  { %v5942_v5 = vpop.eup %4866  ;;  %4874 = vpow2.f32 %v2318_v25  ;;  %v2296_v23 = vsub.f32 %v5851_v6, %v2270_v26  ;;  %v2293_v39 = vsub.f32 %v5837_v1, %v2261_v34  ;;  %2341 = vadd.xlane.f32.xlu0 %v2340_v22  ;;  %v1150_v26 = vcombine.high %v1119_v63, %v1135_v29 }
 0x3f4   :  { %v2343_v44 = vsel %vm2237_vm4, %v5942_v5, 0.0  ;;  %v1217_v34 = vcombine.low %v1123_v16, %v1139_v30 }
 0x3f5   :  { %v5946_v35 = vpop.eup %4868  ;;  %v2322_v36 = vmul.f32 1.442695, %v2296_v23  ;;  %v2316_v37 = vmul.f32 1.442695, %v2293_v39 }
 0x3f6   :  { %v2267_v41 = vpop.xlane.xlu1 %2266  ;;  %v2273_v42 = vpop.xlane.xlu0 %2272  ;;  %v2346_v43 = vsel %vm2237_vm4, %v5946_v35, 0.0 }
 0x3f7   :  { %v5952_v46 = vpop.eup %4870  ;;  %4876 = vpow2.f32 %v2322_v36  ;;  %v2295_v6 = vsub.f32 %v5846_v40, %v2267_v41  ;;  %v2297_v1 = vsub.f32 %v5855_v12, %v2273_v42  ;;  %2347 = vadd.xlane.f32.xlu1 %v2346_v43  ;;  %2344 = vadd.xlane.f32.xlu0 %v2343_v44  ;;  %v1218_v36 = vcombine.high %v1123_v16, %v1139_v30 }
 0x3f8   :  { %4878 = vpow2.f32 %v2316_v37  ;;  %v2349_v14 = vsel %vm2237_vm4, %v5952_v46, 0.0  ;;  %v1131_v41 = vpack.i.b16 %v1130_v24, %v1129_v49 }
 0x3f9   :  { %v5956_v7 = vpop.eup %4872  ;;  %v2320_v47 = vmul.f32 1.442695, %v2295_v6  ;;  %v2324_v50 = vmul.f32 1.442695, %v2297_v1  ;;  %v1164_v1 = vrot.slane %v1150_v26, %v5550_v48 }
 0x3fa   :  { %v2276_v52 = vpop.xlane.xlu1 %2275  ;;  %v2279_v54 = vpop.xlane.xlu0 %2278  ;;  %v2352_v27 = vsel %vm2237_vm4, %v5956_v7, 0.0 }
 0x3fb   :  { %4880 = vpow2.f32 %v2320_v47  ;;  %v2298_v40 = vsub.f32 %v5859_v57, %v2276_v52  ;;  %v2299_v12 = vsub.f32 %v5863_v59, %v2279_v54  ;;  %2353 = vadd.xlane.f32.xlu1 %v2352_v27  ;;  %2350 = vadd.xlane.f32.xlu0 %v2349_v14  ;;  %v1225_v14 = vrot.slane %v1217_v34, %v5550_v48 }
 0x3fc   :  { %4882 = vpow2.f32 %v2324_v50 }
 0x3fd   :  { %v5966_v61 = vpop.eup %4874  ;;  %v2326_v62 = vmul.f32 1.442695, %v2298_v40  ;;  %v2328_v59 = vmul.f32 1.442695, %v2299_v12  ;;  %v1232_v40 = vrot.slane %v1218_v36, %v5550_v48 }
 0x3fe   :  { %v2282_v56 = vpop.xlane.xlu1 %2281  ;;  %v2285_v33 = vpop.xlane.xlu0 %2284  ;;  %v2358_v57 = vsel %vm2237_vm4, %v5966_v61, 0.0 }
 0x3ff   :  { %4884 = vpow2.f32 %v2326_v62  ;;  %v2300_v38 = vsub.f32 %v5878_v31, %v2282_v56  ;;  %2359 = vadd.xlane.f32.xlu1 %v2358_v57  ;;  %v2301_v19 = vsub.f32 %v5882_v32, %v2285_v33  ;;  %v1149_v31 = vcombine.low %v1119_v63, %v1135_v29 }
 0x400   :  { %4886 = vpow2.f32 %v2328_v59 }
 0x401   :  { %v5976_v58 = vpop.eup %4876  ;;  %v2330_v18 = vmul.f32 1.442695, %v2300_v38  ;;  %v2332_v15 = vmul.f32 1.442695, %v2301_v19  ;;  %v1157_v6 = vrot.slane %v1149_v31, %v5550_v48 }
 0x402   :  { %v5982_v25 = vpop.eup %4878  ;;  %v1116_v22 = vpop.permute.xlu1 %1115  ;;  %v2364_v32 = vsel %vm2237_vm4, %v5976_v58, 0.0 }
 0x403   :  { %v1114_v45 = vpop.permute.xlu0 %1113  ;;  %v1146_v2 = vshrl.u32 %v1116_v22, 16  ;;  %2365 = vadd.xlane.f32.xlu1 %v2364_v32  ;;  %4888 = vpow2.f32 %v2330_v18  ;;  %v2355_v3 = vsel %vm2237_vm4, %v5982_v25, 0.0 }
 0x404   :  { %v1143_v23 = vpack.i.b16 %v1116_v22, %v1114_v45  ;;  %v1145_v39 = vshrl.u32 %v1114_v45, 16  ;;  %2356 = vadd.xlane.f32.xlu0 %v2355_v3  ;;  %4890 = vpow2.f32 %v2332_v15 }
 0x405   :  { %v5988_v37 = vpop.eup %4880 }
 0x406   :  { %v1147_v42 = vpack.i.b16 %v1146_v2, %v1145_v39  ;;  %v1165_v43 = vcombine.low %v1127_v13, %v1143_v23  ;;  %v1166_v44 = vcombine.high %v1127_v13, %v1143_v23  ;;  %v2361_v47 = vsel %vm2237_vm4, %v5988_v37, 0.0  ;;  %v5994_v50 = vpop.eup %4882 }
 0x407   :  { %v2367_v33 = vsel %vm2237_vm4, %v5994_v50, 0.0 }
 0x408   :  { %v1173_v51 = vrot.slane %v1165_v43, %v5550_v48  ;;  %v1180_v52 = vrot.slane %v1166_v44, %v5550_v48  ;;  %v1233_v54 = vcombine.low %v1131_v41, %v1147_v42  ;;  %v1234_v27 = vcombine.high %v1131_v41, %v1147_v42  ;;  %2362 = vadd.xlane.f32.xlu0 %v2361_v47 }
 0x409   :  { %v6000_v12 = vpop.eup %4884 }
 0x40a   :  { %v1181_v17 = vcombine.low %v1157_v6, %v1173_v51  ;;  %v1182_v60 = vcombine.high %v1157_v6, %v1173_v51  ;;  %v1197_v62 = vcombine.low %v1164_v1, %v1180_v52  ;;  %v1198_v21 = vcombine.high %v1164_v1, %v1180_v52  ;;  %v6012_v24 = vpop.eup %4886 }
 0x40b   :  { %v1241_v29 = vrot.slane %v1233_v54, %v5550_v48  ;;  %v1248_v30 = vrot.slane %v1234_v27, %v5550_v48  ;;  %v2370_v56 = vsel %vm2237_vm4, %v6000_v12, 0.0  ;;  %v2373_v1 = vsel %vm2237_vm4, %v6012_v24, 0.0 }
 0x40c   :  { %v1189_v57 = vrot.slane %v1181_v17, %v5555_v10  ;;  %v1196_v59 = vrot.slane %v1182_v60, %v5555_v10  ;;  %v1205_v38 = vrot.slane %v1197_v62, %v5555_v10  ;;  %v1212_v63 = vrot.slane %v1198_v21, %v5555_v10  ;;  %2371 = vadd.xlane.f32.xlu1 %v2370_v56 }
 0x40d   :  { %v1249_v16 = vcombine.low %v1225_v14, %v1241_v29  ;;  %v1250_v19 = vcombine.high %v1225_v14, %v1241_v29  ;;  %v1265_v49 = vcombine.low %v1232_v40, %v1248_v30  ;;  %v1266_v13 = vcombine.high %v1232_v40, %v1248_v30  ;;  %2368 = vadd.xlane.f32.xlu0 %v2367_v33  ;;  %v6014_v22 = vpop.eup %4888 }
 0x40e   :  { %v1285_v18 = vcombine.low %v1189_v57, %v1196_v59  ;;  %v4369_v31 = vcombine.high %v1189_v57, %v1196_v59  ;;  %v1301_v26 = vcombine.low %v1205_v38, %v1212_v63  ;;  %v4370_v34 = vcombine.high %v1205_v38, %v1212_v63  ;;  %v6028_v51 = vpop.eup %4890 }
 0x40f   :  { %v1257_v45 = vrot.slane %v1249_v16, %v5555_v10  ;;  %v1264_v32 = vrot.slane %v1250_v19, %v5555_v10  ;;  %v1273_v2 = vrot.slane %v1265_v49, %v5555_v10  ;;  %v1280_v23 = vrot.slane %v1266_v13, %v5555_v10 }
 0x410   :  { %v1292_v39 = vrot.slane %v1285_v18, %v5550_v48  ;;  %v1300_v36 = vrot.slane %v4369_v31, %v5550_v48  ;;  %v1308_v15 = vrot.slane %v1301_v26, %v5550_v48  ;;  %v1316_v3 = vrot.slane %v4370_v34, %v5550_v48 }
 0x411   :  { %v1353_v41 = vcombine.low %v1257_v45, %v1264_v32  ;;  %v4371_v42 = vcombine.high %v1257_v45, %v1264_v32  ;;  %v1369_v43 = vcombine.low %v1273_v2, %v1280_v23  ;;  %v4372_v44 = vcombine.high %v1273_v2, %v1280_v23  ;;  %2374 = vadd.xlane.f32.xlu0 %v2373_v1 }
 0x412   :  { %v2376_v6 = vsel %vm2237_vm4, %v6014_v22, 0.0  ;;  %v1317_v47 = vcombine.low %v1292_v39, %v1300_v36  ;;  %v1333_v52 = vcombine.low %v1308_v15, %v1316_v3  ;;  %v1318_v60 = vcombine.high %v1292_v39, %v1300_v36 }
 0x413   :  { %2377 = vadd.xlane.f32.xlu1 %v2376_v6  ;;  %v1360_v54 = vrot.slane %v1353_v41, %v5550_v48  ;;  %v1368_v27 = vrot.slane %v4371_v42, %v5550_v48  ;;  %v1376_v40 = vrot.slane %v1369_v43, %v5550_v48  ;;  %v1384_v17 = vrot.slane %v4372_v44, %v5550_v48 }
 0x414   :  { %v1325_v14 = vrot.slane %v1317_v47, %v5555_v10  ;;  %v1341_v62 = vrot.slane %v1333_v52, %v5555_v10  ;;  %v1334_v29 = vcombine.high %v1308_v15, %v1316_v3  ;;  %v2379_v56 = vsel %vm2237_vm4, %v6028_v51, 0.0 }
 0x415   :  { %v1385_v21 = vcombine.low %v1360_v54, %v1368_v27  ;;  %v1386_v30 = vcombine.high %v1360_v54, %v1368_v27  ;;  %v1401_v33 = vcombine.low %v1376_v40, %v1384_v17  ;;  %v1332_v57 = vrot.slane %v1318_v60, %v5555_v10  ;;  %2380 = vadd.xlane.f32.xlu0 %v2379_v56 }
 0x416   :  { %v1402_v59 = vcombine.high %v1376_v40, %v1384_v17  ;;  %v1350_v63 = vcombine.high %v1325_v14, %v1341_v62  ;;  %v1348_v16 = vrot.slane %v1334_v29, %v5555_v10  ;;  %v1349_v18 = vcombine.low %v1325_v14, %v1341_v62 }
 0x417   :  { %v1393_v38 = vrot.slane %v1385_v21, %v5555_v10  ;;  %v1409_v19 = vrot.slane %v1401_v33, %v5555_v10  ;;  %v1400_v49 = vrot.slane %v1386_v30, %v5555_v10 }
 0x418   :  { %v1416_v13 = vrot.slane %v1402_v59, %v5555_v10  ;;  %v1351_v31 = vcombine.low %v1332_v57, %v1348_v16  ;;  %v1352_v26 = vcombine.high %v1332_v57, %v1348_v16  ;;  %v1430_v15 = vshrl.u32 %v1350_v63, 16 }
 0x419   :  { %v1417_v34 = vcombine.low %v1393_v38, %v1409_v19  ;;  %v1418_v45 = vcombine.high %v1393_v38, %v1409_v19 }
 0x41a   :  { %v1419_v32 = vcombine.low %v1400_v49, %v1416_v13  ;;  %v1420_v2 = vcombine.high %v1400_v49, %v1416_v13  ;;  %v1436_v40 = vshrl.u32 %v1351_v31, 16  ;;  %v1442_v33 = vshrl.u32 %v1352_v26, 16 }
 0x41b   :  { %v1423_v23 = vpack.i.b16 %v1417_v34, %v1349_v18  ;;  %v1429_v39 = vpack.i.b16 %v1418_v45, %v1350_v63  ;;  %v1431_v36 = vshrl.u32 %v1418_v45, 16 }
 0x41c   :  { %v1435_v3 = vpack.i.b16 %v1419_v32, %v1351_v31  ;;  %v1441_v41 = vpack.i.b16 %v1420_v2, %v1352_v26  ;;  %v1437_v6 = vshrl.u32 %v1419_v32, 16  ;;  %v1443_v17 = vshrl.u32 %v1420_v2, 16 }
 0x41d   :  { %v4373_v42 = vcombine.low %v1423_v23, %v1423_v23  ;;  %v4374_v43 = vcombine.high %v1423_v23, %v1423_v23  ;;  %v4377_v44 = vcombine.low %v1429_v39, %v1429_v39  ;;  %v4378_v1 = vcombine.high %v1429_v39, %v1429_v39 }
 0x41e   :  { %v1432_v47 = vpack.i.b16 %v1431_v36, %v1430_v15  ;;  %v4381_v52 = vcombine.low %v1435_v3, %v1435_v3  ;;  %v4382_v54 = vcombine.high %v1435_v3, %v1435_v3  ;;  %v1438_v38 = vpack.i.b16 %v1437_v6, %v1436_v40 }
 0x41f   :  { %v2470_v27 = vsel %vm2468_vm5, %v4373_v42, 0  ;;  %v2516_v14 = vsel %vm2468_vm5, %v4374_v43, 0  ;;  %v6047_v60 = vsel %vm2468_vm5, %v4377_v44, 0  ;;  %v6050_v62 = vsel %vm2468_vm5, %v4378_v1, 0 }
 0x420   :  { %4644 = vmatpush3.bf16.msra.mxu0 %v2470_v27  ;;  %4650 = vmatpush3.bf16.msra.mxu1 %v2516_v14  ;;  %v4379_v21 = vcombine.low %v1432_v47, %v1432_v47  ;;  %v4380_v29 = vcombine.high %v1432_v47, %v1432_v47  ;;  %v6055_v30 = vsel %vm2468_vm5, %v4381_v52, 0  ;;  %v6058_v56 = vsel %vm2468_vm5, %v4382_v54, 0 }
 0x421   :  { %4655 = vmatprep.subr.bf16.mxu0 %v5232_v0  ;;  %4661 = vmatprep.subr.bf16.mxu1 %v5232_v0  ;;  %v4385_v63 = vcombine.low %v1441_v41, %v1441_v41  ;;  %v4386_v16 = vcombine.high %v1441_v41, %v1441_v41  ;;  %v1444_v19 = vpack.i.b16 %v1443_v17, %v1442_v33  ;;  %v1425_v41 = vshrl.u32 %v1417_v34, 16 }
 0x422   :  { %v6061_v57 = vsel %vm2468_vm5, %v4379_v21, 0  ;;  %v6064_v59 = vsel %vm2468_vm5, %v4380_v29, 0  ;;  %v4383_v49 = vcombine.low %v1438_v38, %v1438_v38  ;;  %v4384_v13 = vcombine.high %v1438_v38, %v1438_v38 }
 0x423   :  { %v6067_v31 = vsel %vm2468_vm5, %v4385_v63, 0  ;;  %v6070_v45 = vsel %vm2468_vm5, %v4386_v16, 0  ;;  %v4387_v32 = vcombine.low %v1444_v19, %v1444_v19  ;;  %v4388_v26 = vcombine.high %v1444_v19, %v1444_v19 }
 0x424   :  { %v6073_v2 = vsel %vm2468_vm5, %v4383_v49, 0  ;;  %v6076_v23 = vsel %vm2468_vm5, %v4384_v13, 0  ;;  %v1424_v42 = vshrl.u32 %v1349_v18, 16 }
 0x425   :  { %v6079_v39 = vsel %vm2468_vm5, %v4387_v32, 0  ;;  %v6082_v36 = vsel %vm2468_vm5, %v4388_v26, 0 }
 0x426   :  { %v1426_v43 = vpack.i.b16 %v1425_v41, %v1424_v42 }
 0x428   :  { %v4375_v47 = vcombine.low %v1426_v43, %v1426_v43  ;;  %v4376_v54 = vcombine.high %v1426_v43, %v1426_v43 }
 0x42a   :  { %v2562_v18 = vsel %vm2468_vm5, %v4375_v47, 0 }
 0x44b   :  { %v2336_v15 = vpop.xlane.xlu0 %2335 }
 0x44c   :  { %v2339_v3 = vpop.xlane.xlu1 %2338  ;;  %4892 = vrcp.f32 %v2336_v15 }
 0x44d   :  { %4894 = vrcp.f32 %v2339_v3 }
 0x456   :  { %v4893_v44 = vpop.eup %4892 }
 0x457   :  { %v4895_v6 = vpop.eup %4894  ;;  %v6085_v1 = vmul.f32 %v4893_v44, %v5922_v53  ;;  %v2608_v53 = vsel %vm2468_vm5, %v4376_v54, 0 }
 0x458   :  { %v6088_v52 = vmul.f32 %v4895_v6, %v5924_v55 }
 0x459   :  { %v2449_v27 = vpack.c.bf16 %v6085_v1, %v6085_v1 }
 0x45a   :  { %v2450_v14 = vpack.c.bf16 %v6088_v52, %v6088_v52 }
 0x45b   :  { %4646 = vmatmul.mubr.msk.bf16.vlgmr.msra.gmra.mrb[36].mxu0 %vm2237_vm4, %v2449_v27 }
 0x45c   :  { %4652 = vmatmul.mubr.msk.bf16.vlgmr.msra.gmra.mrb[36].mxu1 %vm2237_vm4, %v2450_v14  ;;  %4656 = vmatpush3.bf16.msra.mxu0 %v2562_v18  ;;  %v2414_v14 = vsel %vm2237_vm4, %v6085_v1, 0.0 }
 0x45d   :  { %4662 = vmatpush3.bf16.msra.mxu1 %v2608_v53  ;;  %4657 = vmatprep.mubr.msk.bf16.mxu0 %vm5233_vm0, %v5232_v0 }
 0x45e   :  { %4667 = vmatprep.subr.bf16.mxu0 %v5232_v0  ;;  %4663 = vmatprep.mubr.msk.bf16.mxu1 %vm5233_vm0, %v5232_v0 }
 0x45f   :  { %4673 = vmatprep.subr.bf16.mxu1 %v5232_v0 }
 0x480   :  { %v2342_v55 = vpop.xlane.xlu0 %2341 }
 0x481   :  { %4896 = vrcp.f32 %v2342_v55 }
 0x484   :  { %v2348_v34 = vpop.xlane.xlu1 %2347  ;;  %v2345_v40 = vpop.xlane.xlu0 %2344 }
 0x485   :  { %4898 = vrcp.f32 %v2348_v34 }
 0x486   :  { %4900 = vrcp.f32 %v2345_v40 }
 0x488   :  { %v2354_v17 = vpop.xlane.xlu1 %2353  ;;  %v2351_v21 = vpop.xlane.xlu0 %2350 }
 0x489   :  { %4902 = vrcp.f32 %v2351_v21 }
 0x48a   :  { %4904 = vrcp.f32 %v2354_v17 }
 0x48b   :  { %v4897_v29 = vpop.eup %4896 }
 0x48c   :  { %v2400_v33 = vmul.f32 %v4897_v29, %v5938_v20  ;;  %v2360_v38 = vpop.xlane.xlu1 %2359 }
 0x48e   :  { %v2451_v63 = vpack.c.bf16 %v2400_v33, %v2400_v33 }
 0x48f   :  { %v4899_v16 = vpop.eup %4898 }
 0x490   :  { %v4901_v19 = vpop.eup %4900  ;;  %4658 = vmatmul.mubr.msk.bf16.vlgmr.msra.gmra.mrb[40].mxu0 %vm2237_vm4, %v2451_v63  ;;  %v2402_v13 = vmul.f32 %v4899_v16, %v5946_v35  ;;  %v2366_v20 = vpop.xlane.xlu1 %2365 }
 0x491   :  { %v2401_v49 = vmul.f32 %v4901_v19, %v5942_v5  ;;  %4668 = vmatpush3.bf16.msra.mxu0 %v6047_v60  ;;  %4669 = vmatprep.mubr.msk.bf16.mxu0 %vm5233_vm0, %v5232_v0  ;;  %v2357_v32 = vpop.xlane.xlu0 %2356 }
 0x492   :  { %4679 = vmatprep.subr.bf16.mxu0 %v5232_v0  ;;  %4906 = vrcp.f32 %v2357_v32  ;;  %v2453_v60 = vpack.c.bf16 %v2402_v13, %v2402_v13 }
 0x493   :  { %v2452_v26 = vpack.c.bf16 %v2401_v49, %v2401_v49  ;;  %v4903_v15 = vpop.eup %4902  ;;  %4908 = vrcp.f32 %v2360_v38  ;;  %v2430_v34 = vsel %vm2237_vm4, %v2401_v49, 0.0 }
 0x494   :  { %4910 = vrcp.f32 %v2366_v20  ;;  %v4905_v3 = vpop.eup %4904  ;;  %v2403_v35 = vmul.f32 %v4903_v15, %v5952_v46 }
 0x495   :  { %4664 = vmatmul.mubr.msk.bf16.vlgmr.msra.gmra.mrb[40].mxu1 %vm2237_vm4, %v2452_v26  ;;  %v2363_v5 = vpop.xlane.xlu0 %2362 }
 0x496   :  { %4674 = vmatpush3.bf16.msra.mxu1 %v6050_v62  ;;  %4675 = vmatprep.mubr.msk.bf16.mxu1 %vm5233_vm0, %v5232_v0  ;;  %4912 = vrcp.f32 %v2363_v5  ;;  %v2404_v62 = vmul.f32 %v4905_v3, %v5956_v7  ;;  %v2454_v43 = vpack.c.bf16 %v2403_v35, %v2403_v35 }
 0x497   :  { %4685 = vmatprep.subr.bf16.mxu1 %v5232_v0 }
 0x498   :  { %4670 = vmatmul.mubr.msk.bf16.vlgmr.msra.gmra.mrb[44].mxu0 %vm2237_vm4, %v2453_v60  ;;  %v2455_v6 = vpack.c.bf16 %v2404_v62, %v2404_v62  ;;  %v2419_v40 = vsel %vm2237_vm4, %v2404_v62, 0.0 }
 0x499   :  { %v2372_v41 = vpop.xlane.xlu1 %2371  ;;  %4680 = vmatpush3.bf16.msra.mxu0 %v6061_v57  ;;  %4681 = vmatprep.mubr.msk.bf16.mxu0 %vm5233_vm0, %v5232_v0  ;;  %v2415_v57 = vsel %vm2237_vm4, %v2400_v33, 0.0  ;;  %v2432_v33 = vsel %vm2237_vm4, %v2403_v35, 0.0 }
 0x49a   :  { %4914 = vrcp.f32 %v2372_v41  ;;  %v2369_v42 = vpop.xlane.xlu0 %2368  ;;  %4691 = vmatprep.subr.bf16.mxu0 %v5232_v0  ;;  %v2416_v53 = vadd.f32 %v2415_v57, %v2414_v14 }
 0x49b   :  { %4916 = vrcp.f32 %v2369_v42 }
 0x49c   :  { %v4907_v46 = vpop.eup %4906 }
 0x49d   :  { %4676 = vmatmul.mubr.msk.bf16.vlgmr.msra.gmra.mrb[44].mxu1 %vm2237_vm4, %v2454_v43  ;;  %v4909_v44 = vpop.eup %4908  ;;  %v2405_v47 = vmul.f32 %v4907_v46, %v5982_v25 }
 0x49e   :  { %4686 = vmatpush3.bf16.msra.mxu1 %v6064_v59  ;;  %4687 = vmatprep.mubr.msk.bf16.mxu1 %vm5233_vm0, %v5232_v0  ;;  %v2375_v54 = vpop.xlane.xlu0 %2374  ;;  %v4911_v27 = vpop.eup %4910  ;;  %v2417_v59 = vsel %vm2237_vm4, %v2402_v13, 0.0  ;;  %v2406_v18 = vmul.f32 %v4909_v44, %v5966_v61  ;;  %v2429_v61 = vsel %vm2237_vm4, %v6088_v52, 0.0 }
 0x49f   :  { %4697 = vmatprep.subr.bf16.mxu1 %v5232_v0  ;;  %v2408_v1 = vmul.f32 %v4911_v27, %v5976_v58  ;;  %v2456_v21 = vpack.c.bf16 %v2405_v47, %v2405_v47  ;;  %v2431_v19 = vadd.f32 %v2430_v34, %v2429_v61  ;;  %v2434_v52 = vsel %vm2237_vm4, %v2405_v47, 0.0 }
 0x4a0   :  { %v2378_v7 = vpop.xlane.xlu1 %2377  ;;  %4682 = vmatmul.mubr.msk.bf16.vlgmr.msra.gmra.mrb[48].mxu0 %vm2237_vm4, %v2455_v6  ;;  %v4913_v25 = vpop.eup %4912  ;;  %v2421_v38 = vsel %vm2237_vm4, %v2406_v18, 0.0  ;;  %v2457_v49 = vpack.c.bf16 %v2406_v18, %v2406_v18 }
 0x4a1   :  { %4918 = vrcp.f32 %v2378_v7  ;;  %4692 = vmatpush3.bf16.msra.mxu0 %v6055_v30  ;;  %4693 = vmatprep.mubr.msk.bf16.mxu0 %vm5233_vm0, %v5232_v0  ;;  %v2418_v30 = vadd.f32 %v2417_v59, %v2416_v53  ;;  %v2407_v63 = vmul.f32 %v4913_v25, %v5988_v37  ;;  %v2423_v37 = vsel %vm2237_vm4, %v2408_v1, 0.0 }
 0x4a2   :  { %4920 = vrcp.f32 %v2375_v54  ;;  %4703 = vmatprep.subr.bf16.mxu0 %v5232_v0  ;;  %v2381_v17 = vpop.xlane.xlu0 %2380  ;;  %v2433_v32 = vadd.f32 %v2432_v33, %v2431_v19  ;;  %v2459_v46 = vpack.c.bf16 %v2408_v1, %v2408_v1 }
 0x4a3   :  { %4922 = vrcp.f32 %v2381_v17  ;;  %v2420_v58 = vadd.f32 %v2419_v40, %v2418_v30  ;;  %v2436_v20 = vsel %vm2237_vm4, %v2407_v63, 0.0  ;;  %v2458_v3 = vpack.c.bf16 %v2407_v63, %v2407_v63 }
 0x4a4   :  { %v4915_v55 = vpop.eup %4914  ;;  %v2435_v15 = vadd.f32 %v2434_v52, %v2433_v32 }
 0x4a5   :  { %v4917_v29 = vpop.eup %4916  ;;  %v2410_v16 = vmul.f32 %v4915_v55, %v6000_v12  ;;  %4688 = vmatmul.mubr.msk.bf16.vlgmr.msra.gmra.mrb[48].mxu1 %vm2237_vm4, %v2456_v21  ;;  %v2422_v12 = vadd.f32 %v2421_v38, %v2420_v58 }
 0x4a6   :  { %4698 = vmatpush3.bf16.msra.mxu1 %v6058_v56  ;;  %4699 = vmatprep.mubr.msk.bf16.mxu1 %vm5233_vm0, %v5232_v0  ;;  %v2409_v13 = vmul.f32 %v4917_v29, %v5994_v50 }
 0x4a7   :  { %4709 = vmatprep.subr.bf16.mxu1 %v5232_v0  ;;  %v2425_v56 = vsel %vm2237_vm4, %v2410_v16, 0.0  ;;  %v2424_v50 = vadd.f32 %v2423_v37, %v2422_v12  ;;  %v2461_v27 = vpack.c.bf16 %v2410_v16, %v2410_v16 }
 0x4a8   :  { %4694 = vmatmul.mubr.msk.bf16.vlgmr.msra.gmra.mrb[52].mxu0 %vm2237_vm4, %v2457_v49  ;;  %v2438_v35 = vsel %vm2237_vm4, %v2409_v13, 0.0  ;;  %v2460_v54 = vpack.c.bf16 %v2409_v13, %v2409_v13 }
 0x4a9   :  { %4704 = vmatpush3.bf16.msra.mxu0 %v6073_v2  ;;  %4705 = vmatprep.mubr.msk.bf16.mxu0 %vm5233_vm0, %v5232_v0  ;;  %v2426_v62 = vadd.f32 %v2425_v56, %v2424_v50  ;;  %v2437_v2 = vadd.f32 %v2436_v20, %v2435_v15 }
 0x4aa   :  { %4715 = vmatprep.subr.bf16.mxu0 %v5232_v0 }
 0x4ab   :  { %v4919_v26 = vpop.eup %4918 }
 0x4ac   :  { %v4921_v5 = vpop.eup %4920  ;;  %v2412_v60 = vmul.f32 %v4919_v26, %v6014_v22  ;;  %v2439_v22 = vadd.f32 %v2438_v35, %v2437_v2 }
 0x4ad   :  { %v2411_v41 = vmul.f32 %v4921_v5, %v6012_v24  ;;  %4700 = vmatmul.mubr.msk.bf16.vlgmr.msra.gmra.mrb[52].mxu1 %vm2237_vm4, %v2458_v3  ;;  %v4923_v43 = vpop.eup %4922 }
 0x4ae   :  { %v2427_v42 = vsel %vm2237_vm4, %v2412_v60, 0.0  ;;  %4710 = vmatpush3.bf16.msra.mxu1 %v6076_v23  ;;  %4711 = vmatprep.mubr.msk.bf16.mxu1 %vm5233_vm0, %v5232_v0  ;;  %v2413_v57 = vmul.f32 %v4923_v43, %v6028_v51 }
 0x4af   :  { %v2428_v44 = vadd.f32 %v2427_v42, %v2426_v62  ;;  %v2440_v6 = vsel %vm2237_vm4, %v2411_v41, 0.0  ;;  %4721 = vmatprep.subr.bf16.mxu1 %v5232_v0 }
 0x4b0   :  { %4706 = vmatmul.mubr.msk.bf16.vlgmr.msra.gmra.mrb[56].mxu0 %vm2237_vm4, %v2459_v46  ;;  %v2441_v24 = vadd.f32 %v2440_v6, %v2439_v22  ;;  %v2442_v23 = vsel %vm2237_vm4, %v2413_v57, 0.0 }
 0x4b1   :  { %v2445_v47 = vmul.f32 0.125, %v2428_v44  ;;  %4716 = vmatpush3.bf16.msra.mxu0 %v6067_v31  ;;  %4717 = vmatprep.mubr.msk.bf16.mxu0 %vm5233_vm0, %v5232_v0  ;;  %v2462_v31 = vpack.c.bf16 %v2411_v41, %v2411_v41 }
 0x4b2   :  { %4727 = vmatprep.subr.bf16.mxu0 %v5232_v0  ;;  %v2443_v7 = vadd.f32 %v2442_v23, %v2441_v24 }
 0x4b3   :  { %2447 = vst.msk [vmem:[#allocation20] sm:$0xff] %vm2237_vm4, %v2445_v47 }
 0x4b4   :  { %v2446_v51 = vmul.f32 0.125, %v2443_v7 }
 0x4b5   :  { %4712 = vmatmul.mubr.msk.bf16.vlgmr.msra.gmra.mrb[56].mxu1 %vm2237_vm4, %v2460_v54 }
 0x4b6   :  { %4722 = vmatpush3.bf16.msra.mxu1 %v6070_v45  ;;  %4723 = vmatprep.mubr.msk.bf16.mxu1 %vm5233_vm0, %v5232_v0  ;;  %2448 = vst.msk [vmem:[#allocation20 + $0x8] sm:$0xff] %vm2237_vm4, %v2446_v51  ;;  %v2463_v45 = vpack.c.bf16 %v2412_v60, %v2412_v60 }
 0x4b7   :  { %4733 = vmatprep.subr.bf16.mxu1 %v5232_v0 }
 0x4b8   :  { %4718 = vmatmul.mubr.msk.bf16.vlgmr.msra.gmra.mrb[60].mxu0 %vm2237_vm4, %v2461_v27 }
 0x4b9   :  { %4728 = vmatpush3.bf16.msra.mxu0 %v6079_v39  ;;  %4729 = vmatprep.mubr.msk.bf16.mxu0 %vm5233_vm0, %v5232_v0  ;;  %v2464_v39 = vpack.c.bf16 %v2413_v57, %v2413_v57 }
 0x4ba   :  { %4739 = vmatprep.subr.bf16.mxu0 %v5232_v0 }
 0x4bd   :  { %4724 = vmatmul.mubr.msk.bf16.vlgmr.msra.gmra.mrb[60].mxu1 %vm2237_vm4, %v2462_v31 }
 0x4be   :  { %4734 = vmatpush3.bf16.msra.mxu1 %v6082_v36  ;;  %4735 = vmatprep.mubr.msk.bf16.mxu1 %vm5233_vm0, %v5232_v0 }
 0x4bf   :  { %4747 = vmatprep.subr.bf16.mxu1 %v5232_v0 }
 0x4c0   :  { %4730 = vmatmul.mubr.msk.bf16.vlgmr.msra.gmra.mrb[64].mxu0 %vm2237_vm4, %v2463_v45 }
 0x4c1   :  { %4743 = vmatprep.mubr.msk.bf16.mxu0 %vm5233_vm0, %v5232_v0 }
 0x4c5   :  { %4736 = vmatmul.mubr.msk.bf16.vlgmr.msra.gmra.mrb[64].mxu1 %vm2237_vm4, %v2464_v39 }
 0x4c6   :  { %4751 = vmatprep.mubr.msk.bf16.mxu1 %vm5233_vm0, %v5232_v0 }
 0x52e   :  { %v2506_v14 = vpop.f32.mrb[36].mxu0 }
 0x52f   :  { %v2552_v59 = vpop.f32.mrb[36].mxu1  ;;  %v4647_v36 = vpop.f32.mrb[37].mxu0 }
 0x530   :  { %v4653_v18 = vpop.f32.mrb[37].mxu1  ;;  %v2509_v25 = vpop.f32.mrb[38].mxu0 }
 0x531   :  { %v2555_v53 = vpop.f32.mrb[38].mxu1  ;;  %v4648_v55 = vpop.f32.mrb[39].mxu0 }
 0x532   :  { %v4654_v34 = vpop.f32.mrb[39].mxu1 }
 0x563   :  { %v2598_v40 = vpop.f32.mrb[40].mxu0 }
 0x564   :  { %v4659_v1 = vpop.f32.mrb[41].mxu0 }
 0x565   :  { %v2601_v17 = vpop.f32.mrb[42].mxu0 }
 0x566   :  { %v4660_v21 = vpop.f32.mrb[43].mxu0 }
 0x568   :  { %v2644_v61 = vpop.f32.mrb[40].mxu1 }
 0x569   :  { %v4665_v30 = vpop.f32.mrb[41].mxu1 }
 0x56a   :  { %v2647_v29 = vpop.f32.mrb[42].mxu1 }
 0x56b   :  { %v4666_v33 = vpop.f32.mrb[43].mxu1  ;;  %v2690_v38 = vpop.f32.mrb[44].mxu0 }
 0x56c   :  { %v3202_v63 = vcombine.low %v2506_v14, %v2690_v38  ;;  %v3203_v16 = vcombine.high %v2506_v14, %v2690_v38  ;;  %v4671_v19 = vpop.f32.mrb[45].mxu0 }
 0x56d   :  { %v2693_v58 = vpop.f32.mrb[46].mxu0 }
 0x56e   :  { %v4672_v49 = vpop.f32.mrb[47].mxu0  ;;  %v3210_v60 = vrot.slane %v3202_v63, %v5550_v48  ;;  %v3217_v3 = vrot.slane %v3203_v16, %v5550_v48 }
 0x570   :  { %v2736_v52 = vpop.f32.mrb[44].mxu1 }
 0x571   :  { %v3338_v13 = vcombine.low %v2552_v59, %v2736_v52  ;;  %v3339_v37 = vcombine.high %v2552_v59, %v2736_v52  ;;  %v4677_v32 = vpop.f32.mrb[45].mxu1 }
 0x572   :  { %v2739_v12 = vpop.f32.mrb[46].mxu1 }
 0x573   :  { %v4678_v20 = vpop.f32.mrb[47].mxu1  ;;  %v2782_v56 = vpop.f32.mrb[48].mxu0  ;;  %v3346_v51 = vrot.slane %v3338_v13, %v5550_v48  ;;  %v3353_v27 = vrot.slane %v3339_v37, %v5550_v48 }
 0x574   :  { %v3218_v26 = vcombine.low %v2598_v40, %v2782_v56  ;;  %v3219_v15 = vcombine.high %v2598_v40, %v2782_v56  ;;  %v4683_v50 = vpop.f32.mrb[49].mxu0 }
 0x575   :  { %v2785_v5 = vpop.f32.mrb[50].mxu0 }
 0x576   :  { %v3226_v35 = vrot.slane %v3218_v26, %v5550_v48  ;;  %v3233_v41 = vrot.slane %v3219_v15, %v5550_v48  ;;  %v4684_v62 = vpop.f32.mrb[51].mxu0 }
 0x578   :  { %v3266_v2 = vcombine.low %v3210_v60, %v3226_v35  ;;  %v3267_v42 = vcombine.high %v3210_v60, %v3226_v35  ;;  %v3282_v43 = vcombine.low %v3217_v3, %v3233_v41  ;;  %v3283_v46 = vcombine.high %v3217_v3, %v3233_v41  ;;  %v2828_v44 = vpop.f32.mrb[48].mxu1 }
 0x579   :  { %v3354_v22 = vcombine.low %v2644_v61, %v2828_v44  ;;  %v3355_v6 = vcombine.high %v2644_v61, %v2828_v44  ;;  %v4689_v57 = vpop.f32.mrb[49].mxu1 }
 0x57a   :  { %v3274_v24 = vrot.slane %v3266_v2, %v5555_v10  ;;  %v3281_v47 = vrot.slane %v3267_v42, %v5555_v10  ;;  %v3290_v23 = vrot.slane %v3282_v43, %v5555_v10  ;;  %v3297_v7 = vrot.slane %v3283_v46, %v5555_v10  ;;  %v2831_v54 = vpop.f32.mrb[50].mxu1 }
 0x57b   :  { %v3362_v31 = vrot.slane %v3354_v22, %v5550_v48  ;;  %v3369_v45 = vrot.slane %v3355_v6, %v5550_v48  ;;  %v4690_v39 = vpop.f32.mrb[51].mxu1  ;;  %v6216_v14 = vpop.f32.mrb[52].mxu0 }
 0x57c   :  { %v4421_v59 = vcombine.low %v3274_v24, %v3281_v47  ;;  %v4423_v36 = vcombine.high %v3274_v24, %v3281_v47  ;;  %v4425_v18 = vcombine.low %v3290_v23, %v3297_v7  ;;  %v4427_v25 = vcombine.high %v3290_v23, %v3297_v7  ;;  %v4695_v53 = vpop.f32.mrb[53].mxu0 }
 0x57d   :  { %v3402_v55 = vcombine.low %v3346_v51, %v3362_v31  ;;  %v3403_v34 = vcombine.high %v3346_v51, %v3362_v31  ;;  %v3418_v40 = vcombine.low %v3353_v27, %v3369_v45  ;;  %v3419_v1 = vcombine.high %v3353_v27, %v3369_v45  ;;  %v2877_v17 = vpop.f32.mrb[54].mxu0 }
 0x57e   :  { %v4696_v21 = vpop.f32.mrb[55].mxu0  ;;  %v3482_v61 = vrot.slane %v4421_v59, %v5550_v48  ;;  %v3498_v30 = vrot.slane %v4423_v36, %v5550_v48  ;;  %v3514_v29 = vrot.slane %v4425_v18, %v5550_v48  ;;  %v3530_v33 = vrot.slane %v4427_v25, %v5550_v48 }
 0x57f   :  { %v3410_v38 = vrot.slane %v3402_v55, %v5555_v10  ;;  %v3417_v63 = vrot.slane %v3403_v34, %v5555_v10  ;;  %v3426_v16 = vrot.slane %v3418_v40, %v5555_v10  ;;  %v3433_v19 = vrot.slane %v3419_v1, %v5555_v10 }
 0x580   :  { %v6226_v58 = vpop.f32.mrb[52].mxu1  ;;  %v3539_v49 = vcombine.high %v3482_v61, %v3498_v30  ;;  %v3571_v52 = vcombine.high %v3514_v29, %v3530_v33  ;;  %v3538_v13 = vcombine.low %v3482_v61, %v3498_v30  ;;  %v3570_v37 = vcombine.low %v3514_v29, %v3530_v33 }
 0x581   :  { %v4429_v32 = vcombine.low %v3410_v38, %v3417_v63  ;;  %v4431_v12 = vcombine.high %v3410_v38, %v3417_v63  ;;  %v4433_v20 = vcombine.low %v3426_v16, %v3433_v19  ;;  %v4435_v56 = vcombine.high %v3426_v16, %v3433_v19  ;;  %v4701_v26 = vpop.f32.mrb[53].mxu1 }
 0x582   :  { %v2923_v15 = vpop.f32.mrb[54].mxu1  ;;  %v3553_v50 = vrot.slane %v3539_v49, %v5555_v10  ;;  %v3585_v5 = vrot.slane %v3571_v52, %v5555_v10  ;;  %v6231_v60 = vrot.slane %v3538_v13, %v5555_v10  ;;  %v6234_v3 = vrot.slane %v3570_v37, %v5555_v10 }
 0x583   :  { %v4702_v35 = vpop.f32.mrb[55].mxu1  ;;  %v2966_v41 = vpop.f32.mrb[56].mxu0  ;;  %v3618_v62 = vrot.slane %v4429_v32, %v5550_v48  ;;  %v3634_v2 = vrot.slane %v4431_v12, %v5550_v48  ;;  %v3650_v42 = vrot.slane %v4433_v20, %v5550_v48  ;;  %v3666_v43 = vrot.slane %v4435_v56, %v5550_v48 }
 0x584   :  { %v4707_v46 = vpop.f32.mrb[57].mxu0  ;;  %v3604_v44 = vcombine.low %v3553_v50, %v3585_v5  ;;  %v3602_v22 = vcombine.low %v6231_v60, %v6234_v3  ;;  %v3603_v6 = vcombine.high %v6231_v60, %v6234_v3  ;;  %v3605_v57 = vcombine.high %v3553_v50, %v3585_v5 }
 0x585   :  { %v2969_v24 = vpop.f32.mrb[58].mxu0  ;;  %v3675_v47 = vcombine.high %v3618_v62, %v3634_v2  ;;  %v3707_v23 = vcombine.high %v3650_v42, %v3666_v43  ;;  %v3674_v7 = vcombine.low %v3618_v62, %v3634_v2  ;;  %v3706_v54 = vcombine.low %v3650_v42, %v3666_v43 }
 0x586   :  { %v4708_v51 = vpop.f32.mrb[59].mxu0 }
 0x587   :  { %v3689_v27 = vrot.slane %v3675_v47, %v5555_v10  ;;  %v3721_v31 = vrot.slane %v3707_v23, %v5555_v10  ;;  %v6247_v45 = vrot.slane %v3674_v7, %v5555_v10  ;;  %v6250_v39 = vrot.slane %v3706_v54, %v5555_v10 }
 0x588   :  { %v3012_v59 = vpop.f32.mrb[56].mxu1 }
 0x589   :  { %v4713_v36 = vpop.f32.mrb[57].mxu1  ;;  %v3740_v18 = vcombine.low %v3689_v27, %v3721_v31  ;;  %v3739_v25 = vcombine.high %v6247_v45, %v6250_v39  ;;  %v3738_v53 = vcombine.low %v6247_v45, %v6250_v39  ;;  %v3741_v55 = vcombine.high %v3689_v27, %v3721_v31 }
 0x58a   :  { %v3015_v34 = vpop.f32.mrb[58].mxu1 }
 0x58b   :  { %v4714_v40 = vpop.f32.mrb[59].mxu1  ;;  %v3058_v1 = vpop.f32.mrb[60].mxu0  ;;  %v4813_v17 = vpack.i.bf16 %v3740_v18, %v3604_v44  ;;  %v4808_v21 = vpack.i.bf16 %v3739_v25, %v3603_v6  ;;  %v4818_v61 = vpack.i.bf16 %v3741_v55, %v3605_v57 }
 0x58c   :  { %v3234_v30 = vcombine.low %v6216_v14, %v3058_v1  ;;  %v3235_v29 = vcombine.high %v6216_v14, %v3058_v1  ;;  %v4719_v33 = vpop.f32.mrb[61].mxu0 }
 0x58d   :  { %4814 = vrot.lane.b32.xlu0 %v4813_v17, %s5230_s29  ;;  %4809 = vrot.lane.b32.xlu1 %v4808_v21, %s5221_s30  ;;  %v3061_v38 = vpop.f32.mrb[62].mxu0  ;;  %s5246_s30 = smov 20  }
 0x58e   :  { %v4720_v63 = vpop.f32.mrb[63].mxu0  ;;  %v3242_v26 = vrot.slane %v3234_v30, %v5550_v48  ;;  %v3249_v15 = vrot.slane %v3235_v29, %v5550_v48 }
 0x590   :  { %v3104_v16 = vpop.f32.mrb[60].mxu1 }
 0x591   :  { %v3370_v19 = vcombine.low %v6226_v58, %v3104_v16  ;;  %v3371_v49 = vcombine.high %v6226_v58, %v3104_v16  ;;  %4819 = vrot.lane.b32.xlu1 %v4818_v61, %s5245_s7  ;;  %v4725_v52 = vpop.f32.mrb[61].mxu1 }
 0x592   :  { %v3107_v13 = vpop.f32.mrb[62].mxu1 }
 0x593   :  { %v4726_v37 = vpop.f32.mrb[63].mxu1  ;;  %v3150_v32 = vpop.f32.mrb[64].mxu0  ;;  %v3378_v7 = vrot.slane %v3370_v19, %v5550_v48  ;;  %v3385_v54 = vrot.slane %v3371_v49, %v5550_v48 }
 0x594   :  { %v3250_v12 = vcombine.low %v2966_v41, %v3150_v32  ;;  %v3251_v14 = vcombine.high %v2966_v41, %v3150_v32  ;;  %v4731_v20 = vpop.f32.mrb[65].mxu0 }
 0x595   :  { %v3153_v56 = vpop.f32.mrb[66].mxu0 }
 0x596   :  { %v3258_v50 = vrot.slane %v3250_v12, %v5550_v48  ;;  %v3265_v5 = vrot.slane %v3251_v14, %v5550_v48  ;;  %v4732_v35 = vpop.f32.mrb[67].mxu0 }
 0x598   :  { %v3298_v58 = vcombine.low %v3242_v26, %v3258_v50  ;;  %v3299_v62 = vcombine.high %v3242_v26, %v3258_v50  ;;  %v3314_v2 = vcombine.low %v3249_v15, %v3265_v5  ;;  %v3315_v42 = vcombine.high %v3249_v15, %v3265_v5  ;;  %v3196_v43 = vpop.f32.mrb[64].mxu1  ;;  %v4851_v15 = vld [vmem:[#allocation10] sm:$0xff]  }
 0x599   :  { %v3386_v46 = vcombine.low %v3012_v59, %v3196_v43  ;;  %v3387_v44 = vcombine.high %v3012_v59, %v3196_v43  ;;  %v4737_v6 = vpop.f32.mrb[65].mxu1  ;;  %4740 = vmatpush3.bf16.msra.mxu0 %v4851_v15 }
 0x59a   :  { %v3306_v41 = vrot.slane %v3298_v58, %v5555_v10  ;;  %v3313_v57 = vrot.slane %v3299_v62, %v5555_v10  ;;  %v3322_v24 = vrot.slane %v3314_v2, %v5555_v10  ;;  %v3329_v47 = vrot.slane %v3315_v42, %v5555_v10  ;;  %v3199_v23 = vpop.f32.mrb[66].mxu1  ;;  %4741 = vmatprep.subr.bf16.mxu0 %v5232_v0 }
 0x59b   :  { %v3394_v51 = vrot.slane %v3386_v46, %v5550_v48  ;;  %v3401_v27 = vrot.slane %v3387_v44, %v5550_v48  ;;  %v4738_v31 = vpop.f32.mrb[67].mxu1 }
 0x59c   :  { %v4422_v59 = vcombine.low %v3306_v41, %v3313_v57  ;;  %v4424_v36 = vcombine.high %v3306_v41, %v3313_v57  ;;  %v4426_v18 = vcombine.low %v3322_v24, %v3329_v47  ;;  %v4428_v25 = vcombine.high %v3322_v24, %v3329_v47 }
 0x59d   :  { %v3434_v55 = vcombine.low %v3378_v7, %v3394_v51  ;;  %v3435_v34 = vcombine.high %v3378_v7, %v3394_v51  ;;  %v3450_v40 = vcombine.low %v3385_v54, %v3401_v27  ;;  %v3451_v1 = vcombine.high %v3385_v54, %v3401_v27 }
 0x59e   :  { %v3489_v17 = vrot.slane %v4422_v59, %v5550_v48  ;;  %v3505_v21 = vrot.slane %v4424_v36, %v5550_v48  ;;  %v3521_v61 = vrot.slane %v4426_v18, %v5550_v48  ;;  %v3537_v30 = vrot.slane %v4428_v25, %v5550_v48 }
 0x59f   :  { %v3442_v29 = vrot.slane %v3434_v55, %v5555_v10  ;;  %v3449_v33 = vrot.slane %v3435_v34, %v5555_v10  ;;  %v3458_v38 = vrot.slane %v3450_v40, %v5555_v10  ;;  %v3465_v63 = vrot.slane %v3451_v1, %v5555_v10 }
 0x5a0   :  { %v3554_v16 = vcombine.low %v3489_v17, %v3505_v21  ;;  %v3586_v19 = vcombine.low %v3521_v61, %v3537_v30  ;;  %v3555_v49 = vcombine.high %v3489_v17, %v3505_v21  ;;  %v3587_v52 = vcombine.high %v3521_v61, %v3537_v30 }
 0x5a1   :  { %v4430_v13 = vcombine.low %v3442_v29, %v3449_v33  ;;  %v4432_v37 = vcombine.high %v3442_v29, %v3449_v33  ;;  %v4434_v32 = vcombine.low %v3458_v38, %v3465_v63  ;;  %v4436_v12 = vcombine.high %v3458_v38, %v3465_v63 }
 0x5a2   :  { %v3562_v14 = vrot.slane %v3554_v16, %v5555_v10  ;;  %v3594_v20 = vrot.slane %v3586_v19, %v5555_v10  ;;  %v3569_v56 = vrot.slane %v3555_v49, %v5555_v10  ;;  %v3601_v26 = vrot.slane %v3587_v52, %v5555_v10 }
 0x5a3   :  { %v3625_v50 = vrot.slane %v4430_v13, %v5550_v48  ;;  %v3641_v5 = vrot.slane %v4432_v37, %v5550_v48  ;;  %v3657_v35 = vrot.slane %v4434_v32, %v5550_v48  ;;  %v3673_v58 = vrot.slane %v4436_v12, %v5550_v48  ;;  %v4852_v48 = vld [vmem:[#allocation10 + $0x8] sm:$0xff]  }
 0x5a4   :  { %v3607_v62 = vcombine.high %v3562_v14, %v3594_v20  ;;  %v3606_v2 = vcombine.low %v3562_v14, %v3594_v20  ;;  %v3609_v42 = vcombine.high %v3569_v56, %v3601_v26  ;;  %v3608_v43 = vcombine.low %v3569_v56, %v3601_v26  ;;  %4742 = vmatpush3.bf16.msra.mxu0 %v4852_v48 }
 0x5a5   :  { %v3690_v46 = vcombine.low %v3625_v50, %v3641_v5  ;;  %v3722_v44 = vcombine.low %v3657_v35, %v3673_v58  ;;  %v3691_v6 = vcombine.high %v3625_v50, %v3641_v5  ;;  %v3723_v41 = vcombine.high %v3657_v35, %v3673_v58  ;;  %4755 = vmatprep.subr.bf16.mxu0 %v5232_v0 }
 0x5a6   :  { %v3828_v58 = vsub.s32 3, %v5508_v8 }
 0x5a7   :  { %v3698_v57 = vrot.slane %v3690_v46, %v5555_v10  ;;  %v3730_v24 = vrot.slane %v3722_v44, %v5555_v10  ;;  %v3705_v47 = vrot.slane %v3691_v6, %v5555_v10  ;;  %v3737_v23 = vrot.slane %v3723_v41, %v5555_v10 }
 0x5a9   :  { %v3743_v7 = vcombine.high %v3698_v57, %v3730_v24  ;;  %v3742_v54 = vcombine.low %v3698_v57, %v3730_v24  ;;  %v3745_v51 = vcombine.high %v3705_v47, %v3737_v23  ;;  %v3744_v27 = vcombine.low %v3705_v47, %v3737_v23 }
 0x5ab   :  { %v4828_v31 = vpack.i.bf16 %v3743_v7, %v3607_v62  ;;  %v4823_v59 = vpack.i.bf16 %v3742_v54, %v3606_v2  ;;  %v4838_v36 = vpack.i.bf16 %v3745_v51, %v3609_v42  ;;  %v4833_v18 = vpack.i.bf16 %v3744_v27, %v3608_v43  ;;  %v6310_v62 = vld [vmem:[#allocation16] sm:$0xff]  ;;  %v4937_v42 = vld [vmem:[#allocation5] sm:$0xff]  }
 0x5ac   :  { %v3829_v2 = vrot.slane %v6310_v62, %v3828_v58  ;;  %v3886_v43 = vunpack.c.l.bf16 %v4937_v42  ;;  %v3887_v41 = vunpack.c.h.bf16 %v4937_v42 }
 0x5ad   :  { %4829 = vrot.lane.b32.xlu0 %v4828_v31, %s5246_s30  ;;  %4824 = vrot.lane.b32.xlu1 %v4823_v59, %s5247_s27 }
 0x5b1   :  { %4839 = vrot.lane.b32.xlu0 %v4838_v36, %s5248_s23  ;;  %4834 = vrot.lane.b32.xlu1 %v4833_v18, %s5249_s3 }
 0x5ff   :  { %v4810_v10 = vpop.permute.xlu1 %4809  ;;  %v4815_v25 = vpop.permute.xlu0 %4814 }
 0x600   :  { %v4812_v55 = vunpack.i.h.bf16 %v4810_v10  ;;  %v4811_v34 = vunpack.i.l.bf16 %v4810_v10  ;;  %v4817_v1 = vunpack.i.h.bf16 %v4815_v25  ;;  %v4816_v17 = vunpack.i.l.bf16 %v4815_v25 }
 0x602   :  { %v3802_v21 = vsel %vm1482_vm2, %v3602_v22, %v4811_v34  ;;  %v3803_v61 = vsel %vm1482_vm2, %v3738_v53, %v4812_v55 }
 0x603   :  { %v4820_v40 = vpop.permute.xlu1 %4819  ;;  %v3804_v63 = vsel %vm2237_vm4, %v3802_v21, %v4816_v17  ;;  %v3805_v16 = vsel %vm2237_vm4, %v3803_v61, %v4817_v1  ;;  %v4854_v1 = vld [vmem:[#allocation11 + $0x8] sm:$0xff]   ;;  %v6319_v17 = vld [vmem:[#allocation16 + $0x8] sm:$0xff]  ;;  %v5250_v61 = vmov 0  }
 0x604   :  { %v4822_v30 = vunpack.i.h.bf16 %v4820_v40  ;;  %v4821_v29 = vunpack.i.l.bf16 %v4820_v40  ;;  %v4853_v40 = vld [vmem:[#allocation11] sm:$0xff]   ;;  %v4001_v21 = vrot.slane %v6319_v17, %v188_v11  ;;  %4844 = vset.pattern.permute.xlu0 %v5250_v61  ;;  %4843 = vset.pattern.permute.xlu1 %v5250_v61 }
 0x605   :  { %4748 = vmatpush3.bf16.msra.mxu1 %v4853_v40  ;;  %v4111_v40 = vrot.slane %v6319_v17, %v319_v9 }
 0x606   :  { %v3807_v60 = vsel %vm3806_vm6, %v3804_v63, %v4821_v29  ;;  %v3808_v3 = vsel %vm3806_vm6, %v3805_v16, %v4822_v30  ;;  %4749 = vmatprep.subr.bf16.mxu1 %v5232_v0  ;;  %v4011_v30 = vld [vmem:[#allocation17 + $0x8] sm:$0xff] }
 0x609   :  { %4750 = vmatpush3.bf16.msra.mxu1 %v4854_v1 }
 0x60a   :  { %4763 = vmatprep.subr.bf16.mxu1 %v5232_v0 }
 0x61f   :  { %v4830_v33 = vpop.permute.xlu0 %4829  ;;  %v4825_v38 = vpop.permute.xlu1 %4824 }
 0x620   :  { %v4827_v19 = vunpack.i.h.bf16 %v4825_v38  ;;  %v4826_v49 = vunpack.i.l.bf16 %v4825_v38  ;;  %v4832_v22 = vunpack.i.h.bf16 %v4830_v33  ;;  %v4831_v52 = vunpack.i.l.bf16 %v4830_v33 }
 0x622   :  { %v3811_v13 = vsel %vm3809_vm7, %v3808_v3, %v4827_v19  ;;  %v3810_v45 = vsel %vm3809_vm7, %v3807_v60, %v4826_v49  ;;  %v3919_v49 = vsub.s32 4, %v5508_v8  ;;  %v3925_v60 = vsub.s32 5, %v5508_v8 }
 0x623   :  { %v4840_v39 = vpop.permute.xlu0 %4839  ;;  %v4835_v53 = vpop.permute.xlu1 %4834  ;;  %v3813_v20 = vsel %vm3812_vm8, %v3810_v45, %v4831_v52  ;;  %v3814_v56 = vsel %vm3812_vm8, %v3811_v13, %v4832_v22 }
 0x624   :  { %v4842_v37 = vunpack.i.h.bf16 %v4840_v39  ;;  %v4841_v32 = vunpack.i.l.bf16 %v4840_v39  ;;  %v4837_v12 = vunpack.i.h.bf16 %v4835_v53  ;;  %v4836_v14 = vunpack.i.l.bf16 %v4835_v53 }
 0x625   :  { %v3920_v11 = vrot.slane %v6310_v62, %v3919_v49  ;;  %v3926_v39 = vrot.slane %v6310_v62, %v3925_v60 }
 0x626   :  { %v3816_v26 = vsel %vm3815_vm9, %v3813_v20, %v4836_v14  ;;  %v3817_v15 = vsel %vm3815_vm9, %v3814_v56, %v4837_v12  ;;  %v4855_v14 = vld [vmem:[#allocation14] sm:$0xff]   ;;  %v4856_v20 = vld [vmem:[#allocation14 + $0x8] sm:$0xff]  }
 0x627   :  { %v3819_v50 = vsel %vm3818_vm10, %v3816_v26, %v4841_v32  ;;  %v3820_v5 = vsel %vm3818_vm10, %v3817_v15, %v4842_v37 }
 0x628   :  { %v3821_v35 = vpack.c.bf16 %v3820_v5, %v3819_v50 }
 0x62a   :  { %4744 = vmatmul.mubr.msk.bf16.vlgmr.msra.gmra.mrb[68].mxu0 %vm207_vm1, %v3821_v35 }
 0x62b   :  { %4759 = vmatprep.mubr.msk.bf16.mxu0 %vm5233_vm0, %v5232_v0 }
 0x6fd   :  { %v3879_v46 = vpop.f32.mrb[68].mxu0 }
 0x6fe   :  { %v3880_v44 = vadd.f32 %v3879_v46, %v3829_v2  ;;  %v4745_v6 = vpop.f32.mrb[69].mxu0 }
 0x6ff   :  { %v3882_v57 = vpop.f32.mrb[70].mxu0  ;;  %v4012_v6 = vld [vmem:[#allocation17 + $0x10] sm:$0xff] }
 0x700   :  { %v3883_v24 = vadd.f32 %v3882_v57, %v3829_v2  ;;  %v4746_v47 = vpop.f32.mrb[71].mxu0  ;;  %v3888_v23 = vadd.f32 %v3886_v43, %v3880_v44  ;;  %v4010_v44 = vld [vmem:[#allocation17] sm:$0xff]  ;;  %v4013_v57 = vld [vmem:[#allocation17 + $0x18] sm:$0xff] }
 0x702   :  { %v3890_v48 = vsel %vm207_vm1, %v3888_v23, 0.0  ;;  %v3889_v7 = vadd.f32 %v3887_v41, %v3883_v24  ;;  %v4857_v41 = vld [vmem:[#allocation13] sm:$0xff]   ;;  %v4858_v24 = vld [vmem:[#allocation13 + $0x8] sm:$0xff]  }
 0x703   :  { %3891 = vadd.xlane.f32.xlu1 %v3890_v48  ;;  %4756 = vmatpush3.bf16.msra.mxu0 %v4857_v41 }
 0x704   :  { %v3893_v54 = vsel %vm207_vm1, %v3889_v7, 0.0  ;;  %4757 = vmatprep.subr.bf16.mxu0 %v5232_v0 }
 0x705   :  { %3894 = vadd.xlane.f32.xlu0 %v3893_v54 }
 0x707   :  { %4758 = vmatpush3.bf16.msra.mxu0 %v4858_v24 }
 0x790   :  { %v3892_v51 = vpop.xlane.xlu1 %3891 }
 0x791   :  { %v3897_v27 = vmul.f32 0.03125, %v3892_v51 }
 0x792   :  { %v3895_v31 = vpop.xlane.xlu0 %3894 }
 0x793   :  { %v3899_v59 = vsub.f32 %v3888_v23, %v3897_v27  ;;  %v3898_v36 = vmul.f32 0.03125, %v3895_v31  ;;  %v3992_v23 = vsub.s32 6, %v5508_v8 }
 0x795   :  { %v3900_v18 = vsub.f32 %v3889_v7, %v3898_v36  ;;  %v3901_v10 = vmul.f32 %v3899_v59, %v3899_v59  ;;  %v3993_v48 = vrot.slane %v6310_v62, %v3992_v23 }
 0x797   :  { %v3903_v25 = vsel %vm207_vm1, %v3901_v10, 0.0  ;;  %v3902_v55 = vmul.f32 %v3900_v18, %v3900_v18 }
 0x798   :  { %3904 = vadd.xlane.f32.xlu0 %v3903_v25 }
 0x799   :  { %v3906_v34 = vsel %vm207_vm1, %v3902_v55, 0.0 }
 0x79a   :  { %3907 = vadd.xlane.f32.xlu1 %v3906_v34 }
 0x7ae   :  { %4003 = vrot.lane.b32.xlu0 %v4001_v21, %s5241_s21 }
 0x7b2   :  { %4021 = vperm.xlu0 %4844, %v4011_v30  }
 0x825   :  { %v3905_v29 = vpop.xlane.xlu0 %3904 }
 0x826   :  { %v3909_v33 = vmul.f32 0.03125, %v3905_v29 }
 0x827   :  { %v3908_v38 = vpop.xlane.xlu1 %3907 }
 0x828   :  { %v3911_v63 = vadd.f32 1e-05, %v3909_v33  ;;  %v3910_v16 = vmul.f32 0.03125, %v3908_v38 }
 0x829   :  { %v4004_v56 = vpop.permute.xlu0 %4003 }
 0x82a   :  { %4924 = vrsqrt.f32 %v3911_v63  ;;  %v3912_v19 = vadd.f32 1e-05, %v3910_v16 }
 0x82c   :  { %4926 = vrsqrt.f32 %v3912_v19 }
 0x831   :  { %v4022_v31 = vpop.permute.xlu0 %4021 }
 0x834   :  { %v4925_v3 = vpop.eup %4924 }
 0x835   :  { %v3915_v22 = vmul.f32 %v4925_v3, %v3899_v59 }
 0x836   :  { %v4927_v52 = vpop.eup %4926 }
 0x837   :  { %v3921_v13 = vmul.f32 %v3920_v11, %v3915_v22  ;;  %v3916_v45 = vmul.f32 %v4927_v52, %v3900_v18 }
 0x839   :  { %v3922_v53 = vmul.f32 %v3920_v11, %v3916_v45  ;;  %v6335_v37 = vadd.f32 %v3926_v39, %v3921_v13 }
 0x83b   :  { %v6337_v32 = vadd.f32 %v3926_v39, %v3922_v53 }
 0x83d   :  { %v3929_v12 = vpack.c.bf16 %v6337_v32, %v6335_v37 }
 0x83f   :  { %4752 = vmatmul.mubr.msk.bf16.vlgmr.msra.gmra.mrb[68].mxu1 %vm207_vm1, %v3929_v12 }
 0x840   :  { %4767 = vmatprep.mubr.msk.bf16.mxu1 %vm5233_vm0, %v5232_v0  ;;  %4764 = vmatpush3.bf16.msra.mxu1 %v4855_v14 }
 0x841   :  { %4765 = vmatprep.subr.bf16.mxu1 %v5232_v0 }
 0x844   :  { %4766 = vmatpush3.bf16.msra.mxu1 %v4856_v20 }
 0x912   :  { %v3983_v26 = vpop.f32.mrb[68].mxu1 }
 0x913   :  { %v4006_v15 = vadd.f32 %v4004_v56, %v3983_v26  ;;  %v4753_v50 = vpop.f32.mrb[69].mxu1  ;;  %v3994_v51 = vadd.f32 %v3993_v48, %v3983_v26 }
 0x914   :  { %v3986_v5 = vpop.f32.mrb[70].mxu1 }
 0x915   :  { %v4007_v35 = vadd.f32 %v4004_v56, %v3986_v5  ;;  %v4754_v2 = vpop.f32.mrb[71].mxu1  ;;  %v4008_v42 = vmax.f32 %v4006_v15, 0.0  ;;  %v3995_v7 = vadd.f32 %v3993_v48, %v3986_v5  ;;  %v3996_v36 = vmax.f32 %v3994_v51, 0.0 }
 0x916   :  { %v4045_v2 = vsub.s32 7, %v5508_v8 }
 0x917   :  { %v4009_v43 = vmax.f32 %v4007_v35, 0.0  ;;  %v3997_v27 = vmax.f32 %v3995_v7, 0.0 }
 0x919   :  { %v4103_v46 = vpack.c.bf16 %v4009_v43, %v4008_v42  ;;  %v4025_v0 = vmul.f32 %v4022_v31, %v3997_v27  ;;  %v4200_v42 = vrot.slane %v6319_v17, %v325_v28 }
 0x91b   :  { %4113 = vrot.lane.b32.xlu1 %v4103_v46, %s5244_s22  ;;  %v4206_v46 = vrot.slane %v6319_v17, %v3828_v58 }
 0x91f   :  { %4016 = vperm.xlu1 %4843, %v4010_v44   ;;  %v4046_v44 = vrot.slane %v6310_v62, %v4045_v2 }
 0x923   :  { %4028 = vperm.xlu1 %4843, %v4012_v6  }
 0x927   :  { %4033 = vperm.xlu1 %4843, %v4013_v57  }
 0x98d   :  { %v4114_v47 = vpop.permute.xlu1 %4113 }
 0x98e   :  { %4768 = vmatmul.mubr.msk.bf16.vlgmr.msra.gmra.mrb[72].mxu1 %vm207_vm1, %v4114_v47 }
 0x99e   :  { %v4017_v54 = vpop.permute.xlu1 %4016 }
 0x99f   :  { %v4024_v18 = vmul.f32 %v4017_v54, %v3996_v36 }
 0x9a2   :  { %v4029_v59 = vpop.permute.xlu1 %4028 }
 0x9a3   :  { %v4036_v25 = vadd.f32 %v4029_v59, %v4024_v18 }
 0x9a6   :  { %v4034_v10 = vpop.permute.xlu1 %4033 }
 0x9a7   :  { %v4037_v55 = vadd.f32 %v4034_v10, %v4025_v0 }
 0x9a9   :  { %v4038_v34 = vpack.c.bf16 %v4037_v55, %v4036_v25 }
 0x9ab   :  { %4760 = vmatmul.mubr.msk.bf16.vlgmr.msra.gmra.mrb[72].mxu0 %vm207_vm1, %v4038_v34 }
 0xa61   :  { %v4164_v1 = vpop.f32.mrb[72].mxu1 }
 0xa62   :  { %v4165_v21 = vadd.f32 %v4164_v1, %v4111_v40  ;;  %v4769_v61 = vpop.f32.mrb[73].mxu1 }
 0xa63   :  { %v4167_v30 = vpop.f32.mrb[74].mxu1 }
 0xa64   :  { %v4168_v29 = vadd.f32 %v4167_v30, %v4111_v40  ;;  %v4770_v33 = vpop.f32.mrb[75].mxu1  ;;  %v4171_v38 = vsel %vm207_vm1, %v4165_v21, 0.0 }
 0xa65   :  { %4172 = vadd.xlane.f32.xlu0 %v4171_v38 }
 0xa66   :  { %v4174_v63 = vsel %vm207_vm1, %v4168_v29, 0.0 }
 0xa67   :  { %4175 = vadd.xlane.f32.xlu1 %v4174_v63  ;;  %v4242_v63 = vrot.slane %v6319_v17, %v3919_v49 }
 0xa7e   :  { %v4096_v16 = vpop.f32.mrb[72].mxu0 }
 0xa7f   :  { %v4761_v19 = vpop.f32.mrb[73].mxu0  ;;  %v4097_v24 = vadd.f32 %v4096_v16, %v4046_v44 }
 0xa80   :  { %v4099_v11 = vpop.f32.mrb[74].mxu0 }
 0xa81   :  { %v4762_v3 = vpop.f32.mrb[75].mxu0  ;;  %v4100_v51 = vadd.f32 %v4099_v11, %v4046_v44  ;;  %v4248_v11 = vrot.slane %v6319_v17, %v3925_v60 }
 0xaf2   :  { %v4173_v22 = vpop.xlane.xlu0 %4172 }
 0xaf3   :  { %v4177_v52 = vmul.f32 0.03125, %v4173_v22  ;;  %v4254_v22 = vrot.slane %v6319_v17, %v3992_v23 }
 0xaf4   :  { %v4176_v13 = vpop.xlane.xlu1 %4175 }
 0xaf5   :  { %v4179_v9 = vsub.f32 %v4165_v21, %v4177_v52  ;;  %v4178_v45 = vmul.f32 0.03125, %v4176_v13  ;;  %v4264_v21 = vrot.slane %v6319_v17, 7 }
 0xaf7   :  { %v4180_v39 = vsub.f32 %v4168_v29, %v4178_v45  ;;  %v4181_v53 = vmul.f32 %v4179_v9, %v4179_v9  ;;  %4771 = vpush %v4264_v21 }
 0xaf9   :  { %v4183_v12 = vsel %vm207_vm1, %v4181_v53, 0.0  ;;  %v4182_v14 = vmul.f32 %v4180_v39, %v4180_v39 }
 0xafa   :  { %4184 = vadd.xlane.f32.xlu0 %v4183_v12 }
 0xafb   :  { %v4186_v20 = vsel %vm207_vm1, %v4182_v14, 0.0 }
 0xafe   :  { %4187 = vadd.xlane.f32.xlu0 %v4186_v20 }
 0xb87   :  { %v4185_v56 = vpop.xlane.xlu0 %4184 }
 0xb88   :  { %v4189_v26 = vmul.f32 0.03125, %v4185_v56 }
 0xb8a   :  { %v4191_v15 = vadd.f32 1e-05, %v4189_v26 }
 0xb8b   :  { %v4188_v50 = vpop.xlane.xlu0 %4187 }
 0xb8c   :  { %4928 = vrsqrt.f32 %v4191_v15  ;;  %v4190_v5 = vmul.f32 0.03125, %v4188_v50 }
 0xb8e   :  { %v4192_v35 = vadd.f32 1e-05, %v4190_v5 }
 0xb90   :  { %4930 = vrsqrt.f32 %v4192_v35 }
 0xb96   :  { %v4929_v43 = vpop.eup %4928 }
 0xb97   :  { %v4195_v6 = vmul.f32 %v4929_v43, %v4179_v9 }
 0xb99   :  { %v4201_v41 = vmul.f32 %v4200_v42, %v4195_v6 }
 0xb9a   :  { %v4931_v57 = vpop.eup %4930 }
 0xb9b   :  { %v4207_v47 = vadd.f32 %v4206_v46, %v4201_v41  ;;  %v4196_v48 = vmul.f32 %v4931_v57, %v4180_v39 }
 0xb9d   :  { %v4209_v7 = vadd.f32 %v4207_v47, %v4097_v24  ;;  %v4202_v54 = vmul.f32 %v4200_v42, %v4196_v48 }
 0xb9f   :  { %v4211_v27 = vadd.f32 %v4209_v7, %v6335_v37  ;;  %v4208_v31 = vadd.f32 %v4206_v46, %v4202_v54 }
 0xba1   :  { %v4213_v28 = vsel %vm207_vm1, %v4211_v27, 0.0  ;;  %v4210_v59 = vadd.f32 %v4208_v31, %v4100_v51 }
 0xba2   :  { %4214 = vadd.xlane.f32.xlu1 %v4213_v28 }
 0xba3   :  { %v4212_v58 = vadd.f32 %v4210_v59, %v6337_v32 }
 0xba5   :  { %v4216_v62 = vsel %vm207_vm1, %v4212_v58, 0.0 }
 0xba6   :  { %4217 = vadd.xlane.f32.xlu0 %v4216_v62 }
 0xc2f   :  { %v4215_v36 = vpop.xlane.xlu1 %4214 }
 0xc30   :  { %v4219_v0 = vmul.f32 0.03125, %v4215_v36 }
 0xc32   :  { %v4221_v18 = vsub.f32 %v4211_v27, %v4219_v0 }
 0xc33   :  { %v4218_v10 = vpop.xlane.xlu0 %4217 }
 0xc34   :  { %v4220_v25 = vmul.f32 0.03125, %v4218_v10  ;;  %v4223_v55 = vmul.f32 %v4221_v18, %v4221_v18 }
 0xc36   :  { %v4222_v34 = vsub.f32 %v4212_v58, %v4220_v25  ;;  %v4225_v40 = vsel %vm207_vm1, %v4223_v55, 0.0 }
 0xc37   :  { %4226 = vadd.xlane.f32.xlu1 %v4225_v40 }
 0xc38   :  { %v4224_v37 = vmul.f32 %v4222_v34, %v4222_v34 }
 0xc3a   :  { %v4228_v1 = vsel %vm207_vm1, %v4224_v37, 0.0 }
 0xc3b   :  { %4229 = vadd.xlane.f32.xlu0 %v4228_v1 }
 0xcc4   :  { %v4227_v32 = vpop.xlane.xlu1 %4226 }
 0xcc5   :  { %v4231_v61 = vmul.f32 0.03125, %v4227_v32 }
 0xcc7   :  { %v4233_v30 = vadd.f32 1e-05, %v4231_v61 }
 0xcc8   :  { %v4230_v29 = vpop.xlane.xlu0 %4229 }
 0xcc9   :  { %4932 = vrsqrt.f32 %v4233_v30  ;;  %v4232_v33 = vmul.f32 0.03125, %v4230_v29 }
 0xccb   :  { %v4234_v38 = vadd.f32 1e-05, %v4232_v33 }
 0xccd   :  { %4934 = vrsqrt.f32 %v4234_v38 }
 0xcd3   :  { %v4933_v16 = vpop.eup %4932 }
 0xcd4   :  { %v4237_v19 = vmul.f32 %v4933_v16, %v4221_v18 }
 0xcd6   :  { %v4243_v3 = vmul.f32 %v4242_v63, %v4237_v19 }
 0xcd7   :  { %v4935_v52 = vpop.eup %4934 }
 0xcd8   :  { %v4249_v13 = vadd.f32 %v4248_v11, %v4243_v3  ;;  %v4238_v9 = vmul.f32 %v4935_v52, %v4222_v34 }
 0xcda   :  { %v4255_v45 = vmul.f32 %v4254_v22, %v4249_v13  ;;  %v4244_v39 = vmul.f32 %v4242_v63, %v4238_v9 }
 0xcdc   :  { %v4257_v53 = vsel %vm207_vm1, %v4255_v45, 0.0  ;;  %v4250_v12 = vadd.f32 %v4248_v11, %v4244_v39 }
 0xcdd   :  { %4258 = vadd.xlane.f32.xlu1 %v4257_v53 }
 0xcde   :  { %v4256_v49 = vmul.f32 %v4254_v22, %v4250_v12 }
 0xce0   :  { %v4260_v14 = vsel %vm207_vm1, %v4256_v49, 0.0 }
 0xce1   :  { %4261 = vadd.xlane.f32.xlu0 %v4260_v14 }
 0xce2   :  { %5169 = shalt.err (!%p5166_p0)
}
 0xce3   :  { %s5170_s26 = scalar_lea.hbm %s6426_s11, 256 }
 0xce4   :  { %p5171_p1 = scmp.ne.s32.totalorder %s6426_s11, %s5170_s26  ;;  %p5174_p2 = scmp.lt.u32.totalorder %s5170_s26, %s6426_s11 }
 0xce6   :  { %p5176_p3 = pnand %p5174_p2, %p5171_p1 }
 0xce8   :  { %5179 = shalt.err (!%p5176_p3)
}
 0xce9   :  { %4306 = dma.vmem_to_hbm [thread:$0]  %s4301_s15, 256, %s6426_s11, [#allocation21], %s5229_s6, %s5229_s6, %s5230_s29   ;;  %v4274_v23 = vsub.s32 %v5801_v4, %v5508_v8  ;;  %vm4280_vm11 = vcmask 1041409   ;;  %vm4283_vm12 = vcmask 58368  }
 0xcea   :  { %s4772_s4 = spop %4771  ;;  %s5252_s9 = smov [#allocation19]  }
 0xceb   :  { %v4266_v17 = vstv %s4772_s4  ;;  %s4291_s13 = sshll.u32 %s5252_s9, 4  ;;  %s4292_s13 = int_to_ptr.vmem [resolvable:$true] %s4291_s13 }
 0xcec   :  { %s5180_s14 = scalar_lea.vmem %s4292_s13, 32  ;;  %p5185_p5 = scmp.lt.s32.totalorder %s4292_s13, %s4292_s13 }
 0xced   :  { %p5181_p4 = scmp.ne.s32.totalorder %s4292_s13, %s5180_s14  ;;  %p5186_p6 = scmp.lt.s32.totalorder %s5180_s14, %s5180_s14 }
 0xcef   :  { %p5187_p7 = por %p5186_p6, %p5185_p5 }
 0xcf1   :  { %p5188_p8 = pnand %p5187_p7, %p5181_p4 }
 0xd6a   :  { %v4259_v60 = vpop.xlane.xlu1 %4258 }
 0xd6b   :  { %v4268_v20 = vadd.f32 %v4266_v17, %v4259_v60 }
 0xd6d   :  { %v4275_v15 = vrot.slane %v4268_v20, %v4274_v23 }
 0xd6e   :  { %v4262_v56 = vpop.xlane.xlu0 %4261 }
 0xd6f   :  { %v4269_v26 = vadd.f32 %v4266_v17, %v4262_v56 }
 0xd71   :  { %v4279_v50 = vrot.slane %v4269_v26, %v4274_v23 }
 0xd73   :  { %v4281_v5 = vsel %vm4280_vm11, %v4279_v50, %v4275_v15 }
 0xd74   :  { %4284 = vst.msk [vmem:[#allocation19] sm:$0x3] %vm4283_vm12, %v4281_v5 }
 0xd75   :  { %5191 = shalt.err (!%p5188_p8)
}
 0xd76   :  { %s5192_s29 = scalar_lea.hbm %s6425_s10, 32 }
 0xd77   :  { %p5193_p9 = scmp.ne.s32.totalorder %s6425_s10, %s5192_s29  ;;  %p5196_p10 = scmp.lt.u32.totalorder %s5192_s29, %s6425_s10 }
 0xd79   :  { %p5198_p11 = pnand %p5196_p10, %p5193_p9 }
 0xd7b   :  { %5201 = shalt.err (!%p5198_p11)
}
 0xd7c   :  { %4294 = dma.vmem_to_hbm [thread:$0]  %s4292_s13, 32, %s6425_s10, [#allocation4]  }
 0xd7d   :  { %5214 = dma.done.wait [#allocation4], 32  }
 0xd7e   :  { %5215 = vsyncadd [#allocation4], 4294967264 }
 0xd7f   :  { %5216 = dma.done.wait [#allocation21], 256  }
 0xd80   :  { %5217 = vsyncadd [#allocation21], 4294967040 }
 0xd81   :  { %4313 = vsyncpa [#allocation3], 1 }
 0xd82   :  { %4314 = vsyncpa [#allocation6], 1 }
 0xd83   :  { %4315 = vsyncpa [#allocation9], 1 }
 0xd84   :  { %4316 = vsyncpa [#allocation12], 1 }
 0xd85   :  { %4317 = vsyncpa [#allocation15], 1 }
 0xd86   :  { %4318 = vsyncpa [#allocation18], 1 }
 0xd87   :  { %4319 = vsyncpa [#allocation4], 1 }
 0xd88   :  { %4320 = vsyncpa [#allocation21], 1 }

</bundles_post_ra>
